<compile_context>
chip_gen: v6e
topology: v6e:2x2x1
jax: 0.10.0
libtpu: 0.0.40
codegen_flags: <defaults>
</compile_context>

<pallas_src>
import functools

import jax
import jax.numpy as jnp
from jax.experimental import pallas as pl
from jax.experimental.pallas import tpu as pltpu

SELU_ALPHA = 1.6732632423543772
SELU_SCALE = 1.0507009873554805

HIDDEN = 200       # hidden width from the module definition
HIDDEN_PAD = 256   # zero-padded width used inside the kernel (dense lanes / full MXU)


def mlp_kernel(x_ref,                       # (n_particles, bt) bf16   -- x^T tile
               w1_ref, b1_ref,              # (256, n_particles) bf16, (256, 1)
               wh_ref, bh_ref,              # (4, 256, 256) bf16,      (4, 256, 1)
               w6_ref, b6_ref,              # (1, 256) bf16,           (1, 1) f32
               o_ref,                       # (1, bt) f32
               *, act_dtype):
    """Whole forward pass fused; weights resident in VMEM; batch lives on lanes."""

    def linear_relu(h, w, b):
        # bf16 operands into the MXU, f32 accumulation; bias/ReLU in act_dtype
        # (bf16 on v6e/v7x, f32 on v5e); next-layer operand is bf16 either way.
        y = jnp.dot(w, h, preferred_element_type=jnp.float32).astype(act_dtype) + b
        return jnp.maximum(y, 0.0).astype(jnp.bfloat16)

    h = linear_relu(x_ref[...], w1_ref[...], b1_ref[...])       # (256, bt)
    for k in range(4):                                          # fc2..fc5, static unroll
        h = linear_relu(h, wh_ref[k], bh_ref[k])

    # fc6 + SELU: (1, 256) @ (256, bt) -> (1, bt) lane-dense, no transposes anywhere.
    z = jnp.dot(w6_ref[...], h, preferred_element_type=jnp.float32) + b6_ref[...]
    selu = SELU_SCALE * jnp.where(
        z > 0.0, z, SELU_ALPHA * (jnp.exp(jnp.minimum(z, 0.0)) - 1.0))
    o_ref[...] = selu.astype(o_ref.dtype)


def _pad_to(a, shape):
    return jnp.pad(a, [(0, t - s) for s, t in zip(a.shape, shape)])


def _default_act_dtype():
    """bf16 elementwise on chips with a bf16 VPU (v6e/v7x); f32 otherwise (v5e etc.)."""
    try:
        kind = jax.devices()[0].device_kind.lower()
    except Exception:
        return jnp.float32
    if ("v6" in kind) or ("v7" in kind):
        return jnp.bfloat16
    return jnp.float32


def prepare_params(params, act_dtype):
    """params: list of (W, b) in PyTorch layout, W shaped (out, in).
    Returns kernel operands: bf16 weights zero-padded to HIDDEN_PAD, biases as
    (out, 1) columns in act_dtype; the four hidden layers packed into one stack."""
    (w1, b1), (w2, b2), (w3, b3), (w4, b4), (w5, b5), (w6, b6) = params
    n_particles = w1.shape[1]

    w1p = _pad_to(w1, (HIDDEN_PAD, n_particles)).astype(jnp.bfloat16)
    b1p = _pad_to(b1, (HIDDEN_PAD,)).reshape(HIDDEN_PAD, 1).astype(act_dtype)

    wh = jnp.stack([_pad_to(w, (HIDDEN_PAD, HIDDEN_PAD))
                    for w in (w2, w3, w4, w5)]).astype(jnp.bfloat16)
    bh = jnp.stack([_pad_to(b, (HIDDEN_PAD,)).reshape(HIDDEN_PAD, 1)
                    for b in (b2, b3, b4, b5)]).astype(act_dtype)

    w6p = _pad_to(w6, (1, HIDDEN_PAD)).astype(jnp.bfloat16)
    b6p = b6.reshape(1, 1).astype(jnp.float32)
    return [w1p, b1p, wh, bh, w6p, b6p]


def reference_network1(x, params, *, batch_tile=256, act_dtype=None):
    """x: (B, n_particles). params: list of (W, b) with W in PyTorch (out, in) layout."""
    assert batch_tile % 128 == 0, "batch_tile must be a multiple of 128 (lane width)"
    B, n_particles = x.shape
    if act_dtype is None:
        act_dtype = _default_act_dtype()
    flat = prepare_params(params, act_dtype)

    bt = batch_tile
    num_tiles = pl.cdiv(B, bt)
    B_pad = num_tiles * bt

    # Transposed, bf16 input: (n_particles, B_pad), batch on lanes.
    xt = x.astype(jnp.bfloat16).T
    if B_pad != B:
        xt = jnp.pad(xt, ((0, 0), (0, B_pad - B)))

    def resident(arr):
        # Same full block every grid step -> kept resident in VMEM, no re-DMA.
        return pl.BlockSpec(arr.shape, lambda i, nd=arr.ndim: (0,) * nd)

    in_specs = [pl.BlockSpec((n_particles, bt), lambda i: (0, i))]
    in_specs += [resident(a) for a in flat]

    out = pl.pallas_call(
        functools.partial(mlp_kernel, act_dtype=act_dtype),
        out_shape=jax.ShapeDtypeStruct((1, B_pad), jnp.float32),
        grid_spec=pltpu.PrefetchScalarGridSpec(
            num_scalar_prefetch=0,
            grid=(num_tiles,),
            in_specs=in_specs,
            out_specs=pl.BlockSpec((1, bt), lambda i: (0, i)),
        ),
        compiler_params=pltpu.CompilerParams(
            dimension_semantics=("parallel",),   # batch tiles shard across v7x TCs
        ),
    )(xt, *flat)

    # (1, B_pad) lane-dense slab -> (B, 1)
    return out.reshape(B_pad, 1)[:B]


def init_params(key, n_particles):
    """Deterministic PyTorch-Linear-like init; W in (out, in) layout, b in (out,)."""
    sizes = [(HIDDEN, n_particles), (HIDDEN, HIDDEN), (HIDDEN, HIDDEN),
             (HIDDEN, HIDDEN), (HIDDEN, HIDDEN), (1, HIDDEN)]
    params = []
    for (fan_out, fan_in) in sizes:
        key, kw, kb = jax.random.split(key, 3)
        bound = 1.0 / jnp.sqrt(fan_in)
        w = jax.random.uniform(kw, (fan_out, fan_in), jnp.float32, -bound, bound)
        b = jax.random.uniform(kb, (fan_out,), jnp.float32, -bound, bound)
        params.append((w, b))
    return params


def reference_forward_f32(x, params):
    """Pure-JAX f32 reference of the PyTorch forward."""
    h = x
    for i, (w, b) in enumerate(params):
        h = h @ w.T + b
        if i < len(params) - 1:
            h = jnp.maximum(h, 0.0)
        else:
            h = SELU_SCALE * jnp.where(h > 0.0, h, SELU_ALPHA * (jnp.exp(h) - 1.0))
    return h


def reference_forward_mirror(x, params, act_dtype):
    """Mirrors the kernel numerics: bf16 matmul operands, f32 MXU accumulation,
    bias/ReLU in act_dtype, bf16 activations between layers, f32 SELU."""
    h = x.astype(jnp.bfloat16).astype(jnp.float32)
    for i, (w, b) in enumerate(params):
        wq = w.astype(jnp.bfloat16).astype(jnp.float32)
        y = jnp.dot(h, wq.T, precision=jax.lax.Precision.HIGHEST)
        if i < len(params) - 1:
            y = (y.astype(act_dtype) + b.astype(act_dtype)).astype(jnp.float32)
            h = jnp.maximum(y, 0.0).astype(jnp.bfloat16).astype(jnp.float32)
        else:
            z = y + b.astype(jnp.float32)
            h = SELU_SCALE * jnp.where(
                z > 0.0, z, SELU_ALPHA * (jnp.exp(jnp.minimum(z, 0.0)) - 1.0))
    return h


if __name__ == "__main__":
    key = jax.random.PRNGKey(0)
    n_particles = 8
    batch = 1024            # 4 grid steps at batch_tile=256 -> >=2 tiles per v7x TC

    kx, kp = jax.random.split(key)
    x = jax.random.normal(kx, (batch, n_particles), jnp.float32)
    params = init_params(kp, n_particles)

    act_dtype = _default_act_dtype()
    out = jax.block_until_ready(
        reference_network1(x, params, batch_tile=256, act_dtype=act_dtype))
    assert out.shape == (batch, 1)

    ref_mirror = reference_forward_mirror(x, params, act_dtype)  # plumbing check
    ref_f32 = reference_forward_f32(x, params)                   # semantics at bf16 accuracy
    assert jnp.allclose(out, ref_mirror, atol=5e-3, rtol=5e-3), "mismatch vs mirror ref"
    assert jnp.allclose(out, ref_f32, atol=3e-2, rtol=3e-2), "mismatch vs f32 reference"

    print("KERNEL_OK")
</pallas_src>

<mosaic_0001>
module attributes {stable_mosaic.version = 11 : i64} {
  func.func @mlp_kernel(%arg0: i32, %arg1: memref<8x256xbf16, #tpu.memory_space<vmem>>, %arg2: memref<256x8xbf16, #tpu.memory_space<vmem>>, %arg3: memref<256x1xf32, #tpu.memory_space<vmem>>, %arg4: memref<4x256x256xbf16, #tpu.memory_space<vmem>>, %arg5: memref<4x256x1xf32, #tpu.memory_space<vmem>>, %arg6: memref<1x256xbf16, #tpu.memory_space<vmem>>, %arg7: memref<1x1xf32, #tpu.memory_space<vmem>>, %arg8: memref<1x256xf32, #tpu.memory_space<vmem>>) attributes {dimension_semantics = [#tpu.dimension_semantics<parallel>], iteration_bounds = array<i64: 4>, scalar_prefetch = 0 : i64, scratch_operands = 0 : i64, tpu.core_type = #tpu.core_type<tc>, window_params = [{transform_indices = @transform_0, window_bounds = array<i64: 8, 256>}, {pipeline_mode = #tpu.pipeline_mode<synchronous>, transform_indices = @transform_1, window_bounds = array<i64: 256, 8>}, {pipeline_mode = #tpu.pipeline_mode<synchronous>, transform_indices = @transform_2, window_bounds = array<i64: 256, 1>}, {pipeline_mode = #tpu.pipeline_mode<synchronous>, transform_indices = @transform_3, window_bounds = array<i64: 4, 256, 256>}, {pipeline_mode = #tpu.pipeline_mode<synchronous>, transform_indices = @transform_4, window_bounds = array<i64: 4, 256, 1>}, {pipeline_mode = #tpu.pipeline_mode<synchronous>, transform_indices = @transform_5, window_bounds = array<i64: 1, 256>}, {pipeline_mode = #tpu.pipeline_mode<synchronous>, transform_indices = @transform_6, window_bounds = array<i64: 1, 1>}, {transform_indices = @transform_7, window_bounds = array<i64: 1, 256>}]} {
    %c0 = arith.constant 0 : index
    %c0_0 = arith.constant 0 : index
    %0 = vector.load %arg1[%c0, %c0_0] : memref<8x256xbf16, #tpu.memory_space<vmem>>, vector<8x256xbf16>
    %c0_1 = arith.constant 0 : index
    %c0_2 = arith.constant 0 : index
    %1 = vector.load %arg2[%c0_1, %c0_2] : memref<256x8xbf16, #tpu.memory_space<vmem>>, vector<256x8xbf16>
    %c0_3 = arith.constant 0 : index
    %c0_4 = arith.constant 0 : index
    %2 = vector.load %arg3[%c0_3, %c0_4] : memref<256x1xf32, #tpu.memory_space<vmem>>, vector<256x1xf32>
    %cst = arith.constant dense<0.000000e+00> : vector<256x256xf32>
    %3 = tpu.matmul %1, %0, %cst {dimension_numbers = #tpu.dot_dimension_numbers<[1], [0], [0], [1], [0, 0, 1, 1], [], []>} : vector<256x8xbf16>, vector<8x256xbf16>, vector<256x256xf32> -> vector<256x256xf32>
    %4 = vector.broadcast %2 : vector<256x1xf32> to vector<256x256xf32>
    %5 = arith.addf %3, %4 : vector<256x256xf32>
    %cst_5 = arith.constant 0.000000e+00 : f32
    %6 = vector.broadcast %cst_5 : f32 to vector<256x256xf32>
    %7 = arith.maximumf %5, %6 : vector<256x256xf32>
    %8 = arith.truncf %7 : vector<256x256xf32> to vector<256x256xbf16>
    %c0_6 = arith.constant 0 : index
    %c0_7 = arith.constant 0 : index
    %c0_8 = arith.constant 0 : index
    %9 = vector.load %arg4[%c0_6, %c0_7, %c0_8] : memref<4x256x256xbf16, #tpu.memory_space<vmem>>, vector<1x256x256xbf16>
    %10 = vector.shape_cast %9 : vector<1x256x256xbf16> to vector<256x256xbf16>
    %c0_9 = arith.constant 0 : index
    %c0_10 = arith.constant 0 : index
    %c0_11 = arith.constant 0 : index
    %11 = vector.load %arg5[%c0_9, %c0_10, %c0_11] : memref<4x256x1xf32, #tpu.memory_space<vmem>>, vector<1x256x1xf32>
    %12 = vector.shape_cast %11 : vector<1x256x1xf32> to vector<256x1xf32>
    %cst_12 = arith.constant dense<0.000000e+00> : vector<256x256xf32>
    %13 = tpu.matmul %10, %8, %cst_12 {dimension_numbers = #tpu.dot_dimension_numbers<[1], [0], [0], [1], [0, 0, 1, 1], [], []>} : vector<256x256xbf16>, vector<256x256xbf16>, vector<256x256xf32> -> vector<256x256xf32>
    %14 = vector.broadcast %12 : vector<256x1xf32> to vector<256x256xf32>
    %15 = arith.addf %13, %14 : vector<256x256xf32>
    %cst_13 = arith.constant 0.000000e+00 : f32
    %16 = vector.broadcast %cst_13 : f32 to vector<256x256xf32>
    %17 = arith.maximumf %15, %16 : vector<256x256xf32>
    %18 = arith.truncf %17 : vector<256x256xf32> to vector<256x256xbf16>
    %c1 = arith.constant 1 : index
    %c0_14 = arith.constant 0 : index
    %c0_15 = arith.constant 0 : index
    %19 = vector.load %arg4[%c1, %c0_14, %c0_15] : memref<4x256x256xbf16, #tpu.memory_space<vmem>>, vector<1x256x256xbf16>
    %20 = vector.shape_cast %19 : vector<1x256x256xbf16> to vector<256x256xbf16>
    %c1_16 = arith.constant 1 : index
    %c0_17 = arith.constant 0 : index
    %c0_18 = arith.constant 0 : index
    %21 = vector.load %arg5[%c1_16, %c0_17, %c0_18] : memref<4x256x1xf32, #tpu.memory_space<vmem>>, vector<1x256x1xf32>
    %22 = vector.shape_cast %21 : vector<1x256x1xf32> to vector<256x1xf32>
    %cst_19 = arith.constant dense<0.000000e+00> : vector<256x256xf32>
    %23 = tpu.matmul %20, %18, %cst_19 {dimension_numbers = #tpu.dot_dimension_numbers<[1], [0], [0], [1], [0, 0, 1, 1], [], []>} : vector<256x256xbf16>, vector<256x256xbf16>, vector<256x256xf32> -> vector<256x256xf32>
    %24 = vector.broadcast %22 : vector<256x1xf32> to vector<256x256xf32>
    %25 = arith.addf %23, %24 : vector<256x256xf32>
    %cst_20 = arith.constant 0.000000e+00 : f32
    %26 = vector.broadcast %cst_20 : f32 to vector<256x256xf32>
    %27 = arith.maximumf %25, %26 : vector<256x256xf32>
    %28 = arith.truncf %27 : vector<256x256xf32> to vector<256x256xbf16>
    %c2 = arith.constant 2 : index
    %c0_21 = arith.constant 0 : index
    %c0_22 = arith.constant 0 : index
    %29 = vector.load %arg4[%c2, %c0_21, %c0_22] : memref<4x256x256xbf16, #tpu.memory_space<vmem>>, vector<1x256x256xbf16>
    %30 = vector.shape_cast %29 : vector<1x256x256xbf16> to vector<256x256xbf16>
    %c2_23 = arith.constant 2 : index
    %c0_24 = arith.constant 0 : index
    %c0_25 = arith.constant 0 : index
    %31 = vector.load %arg5[%c2_23, %c0_24, %c0_25] : memref<4x256x1xf32, #tpu.memory_space<vmem>>, vector<1x256x1xf32>
    %32 = vector.shape_cast %31 : vector<1x256x1xf32> to vector<256x1xf32>
    %cst_26 = arith.constant dense<0.000000e+00> : vector<256x256xf32>
    %33 = tpu.matmul %30, %28, %cst_26 {dimension_numbers = #tpu.dot_dimension_numbers<[1], [0], [0], [1], [0, 0, 1, 1], [], []>} : vector<256x256xbf16>, vector<256x256xbf16>, vector<256x256xf32> -> vector<256x256xf32>
    %34 = vector.broadcast %32 : vector<256x1xf32> to vector<256x256xf32>
    %35 = arith.addf %33, %34 : vector<256x256xf32>
    %cst_27 = arith.constant 0.000000e+00 : f32
    %36 = vector.broadcast %cst_27 : f32 to vector<256x256xf32>
    %37 = arith.maximumf %35, %36 : vector<256x256xf32>
    %38 = arith.truncf %37 : vector<256x256xf32> to vector<256x256xbf16>
    %c3 = arith.constant 3 : index
    %c0_28 = arith.constant 0 : index
    %c0_29 = arith.constant 0 : index
    %39 = vector.load %arg4[%c3, %c0_28, %c0_29] : memref<4x256x256xbf16, #tpu.memory_space<vmem>>, vector<1x256x256xbf16>
    %40 = vector.shape_cast %39 : vector<1x256x256xbf16> to vector<256x256xbf16>
    %c3_30 = arith.constant 3 : index
    %c0_31 = arith.constant 0 : index
    %c0_32 = arith.constant 0 : index
    %41 = vector.load %arg5[%c3_30, %c0_31, %c0_32] : memref<4x256x1xf32, #tpu.memory_space<vmem>>, vector<1x256x1xf32>
    %42 = vector.shape_cast %41 : vector<1x256x1xf32> to vector<256x1xf32>
    %cst_33 = arith.constant dense<0.000000e+00> : vector<256x256xf32>
    %43 = tpu.matmul %40, %38, %cst_33 {dimension_numbers = #tpu.dot_dimension_numbers<[1], [0], [0], [1], [0, 0, 1, 1], [], []>} : vector<256x256xbf16>, vector<256x256xbf16>, vector<256x256xf32> -> vector<256x256xf32>
    %44 = vector.broadcast %42 : vector<256x1xf32> to vector<256x256xf32>
    %45 = arith.addf %43, %44 : vector<256x256xf32>
    %cst_34 = arith.constant 0.000000e+00 : f32
    %46 = vector.broadcast %cst_34 : f32 to vector<256x256xf32>
    %47 = arith.maximumf %45, %46 : vector<256x256xf32>
    %48 = arith.truncf %47 : vector<256x256xf32> to vector<256x256xbf16>
    %c0_35 = arith.constant 0 : index
    %c0_36 = arith.constant 0 : index
    %49 = vector.load %arg6[%c0_35, %c0_36] : memref<1x256xbf16, #tpu.memory_space<vmem>>, vector<1x256xbf16>
    %cst_37 = arith.constant dense<0.000000e+00> : vector<1x256xf32>
    %50 = tpu.matmul %49, %48, %cst_37 {dimension_numbers = #tpu.dot_dimension_numbers<[1], [0], [0], [1], [0, 0, 1, 1], [], []>} : vector<1x256xbf16>, vector<256x256xbf16>, vector<1x256xf32> -> vector<1x256xf32>
    %c0_38 = arith.constant 0 : index
    %c0_39 = arith.constant 0 : index
    %51 = vector.load %arg7[%c0_38, %c0_39] : memref<1x1xf32, #tpu.memory_space<vmem>>, vector<1x1xf32>
    %52 = vector.broadcast %51 : vector<1x1xf32> to vector<1x256xf32>
    %53 = arith.addf %50, %52 : vector<1x256xf32>
    %cst_40 = arith.constant 0.000000e+00 : f32
    %54 = vector.broadcast %cst_40 : f32 to vector<1x256xf32>
    %55 = arith.cmpf ogt, %53, %54 : vector<1x256xf32>
    %cst_41 = arith.constant 0.000000e+00 : f32
    %56 = vector.broadcast %cst_41 : f32 to vector<1x256xf32>
    %57 = arith.minimumf %53, %56 : vector<1x256xf32>
    %58 = math.exp %57 : vector<1x256xf32>
    %cst_42 = arith.constant 1.000000e+00 : f32
    %59 = vector.broadcast %cst_42 : f32 to vector<1x256xf32>
    %60 = arith.subf %58, %59 : vector<1x256xf32>
    %cst_43 = arith.constant 1.67326319 : f32
    %61 = vector.broadcast %cst_43 : f32 to vector<1x256xf32>
    %62 = arith.mulf %61, %60 : vector<1x256xf32>
    %63 = arith.select %55, %53, %62 : vector<1x256xi1>, vector<1x256xf32>
    %cst_44 = arith.constant 1.05070102 : f32
    %64 = vector.broadcast %cst_44 : f32 to vector<1x256xf32>
    %65 = arith.mulf %64, %63 : vector<1x256xf32>
    %c0_45 = arith.constant 0 : index
    %c0_46 = arith.constant 0 : index
    %66 = vector.load %arg8[%c0_45, %c0_46] : memref<1x256xf32, #tpu.memory_space<vmem>>, vector<1x256xf32>
    tpu.vector_store %arg8[%c0_45, %c0_46], %65 {strides = array<i32>} : memref<1x256xf32, #tpu.memory_space<vmem>>, vector<1x256xf32>,
    return
  }
  func.func @transform_0(%arg0: i32) -> (i32, i32) {
    %c0_i32 = arith.constant 0 : i32
    %c0_i32_0 = arith.constant 0 : i32
    return %c0_i32, %arg0 : i32, i32
  }
  func.func @transform_1(%arg0: i32) -> (i32, i32) {
    %c0_i32 = arith.constant 0 : i32
    %c0_i32_0 = arith.constant 0 : i32
    %c0_i32_1 = arith.constant 0 : i32
    return %c0_i32, %c0_i32_0 : i32, i32
  }
  func.func @transform_2(%arg0: i32) -> (i32, i32) {
    %c0_i32 = arith.constant 0 : i32
    %c0_i32_0 = arith.constant 0 : i32
    %c0_i32_1 = arith.constant 0 : i32
    return %c0_i32, %c0_i32_0 : i32, i32
  }
  func.func @transform_3(%arg0: i32) -> (i32, i32, i32) {
    %c0_i32 = arith.constant 0 : i32
    %c0_i32_0 = arith.constant 0 : i32
    %c0_i32_1 = arith.constant 0 : i32
    %c0_i32_2 = arith.constant 0 : i32
    return %c0_i32, %c0_i32_0, %c0_i32_1 : i32, i32, i32
  }
  func.func @transform_4(%arg0: i32) -> (i32, i32, i32) {
    %c0_i32 = arith.constant 0 : i32
    %c0_i32_0 = arith.constant 0 : i32
    %c0_i32_1 = arith.constant 0 : i32
    %c0_i32_2 = arith.constant 0 : i32
    return %c0_i32, %c0_i32_0, %c0_i32_1 : i32, i32, i32
  }
  func.func @transform_5(%arg0: i32) -> (i32, i32) {
    %c0_i32 = arith.constant 0 : i32
    %c0_i32_0 = arith.constant 0 : i32
    %c0_i32_1 = arith.constant 0 : i32
    return %c0_i32, %c0_i32_0 : i32, i32
  }
  func.func @transform_6(%arg0: i32) -> (i32, i32) {
    %c0_i32 = arith.constant 0 : i32
    %c0_i32_0 = arith.constant 0 : i32
    %c0_i32_1 = arith.constant 0 : i32
    return %c0_i32, %c0_i32_0 : i32, i32
  }
  func.func @transform_7(%arg0: i32) -> (i32, i32) {
    %c0_i32 = arith.constant 0 : i32
    %c0_i32_0 = arith.constant 0 : i32
    return %c0_i32, %arg0 : i32, i32
  }
}

</mosaic_0001>

<bundles_post_ra>
// kernel: tpu_custom_call.1
= control target key start
LH: loop header
LB: loop body
LE: loop exit
PB: predicated region body
PF: predicated region fallthrough
CT: control target
= control target key end

     0   :  { %s6637_s0 = inlined_call_operand.vmem [shape: bf16[8,1024], index: 0, kind: input, shape index: {}]   ;;  %s6638_s1 = inlined_call_operand.vmem [shape: bf16[256,8], index: 1, kind: input, shape index: {}]   ;;  %s6639_s2 = inlined_call_operand.vmem [shape: f32[256,1], index: 2, kind: input, shape index: {}]   ;;  %s6640_s3 = inlined_call_operand.vmem [shape: bf16[4,256,256], index: 3, kind: input, shape index: {}]   ;;  %s6641_s4 = inlined_call_operand.vmem [shape: f32[4,256,1], index: 4, kind: input, shape index: {}]   ;;  %s6642_s5 = inlined_call_operand.vmem [shape: bf16[1,256], index: 5, kind: input, shape index: {}]   ;;  %s6643_s6 = inlined_call_operand.<no memory space> [shape: f32[1,1], index: 6, kind: input, shape index: {}]   ;;  %s6644_s7 = inlined_call_operand.hbm [shape: f32[1,1024], index: 7, kind: output, shape index: {}]  }
   0x1   :  { %v12_v0 = vstv %s6643_s6 }
   0x2   :  { %13 = vst [vmem:[#allocation2] sm:$0x1] %v12_v0 }
   0x3   :  { %14 = vsyncpa [#allocation4], 0 }
   0x4   :  { %16 = vsyncpa [#allocation4 + $0x1], 0  ;;  %s4564_s26 = smov 0   ;;  %s4566_s27 = smov 0  }
   0x5   :  { %s4568_s28 = smov 0   ;;  %s4570_s29 = smov 0  }
   0x6 LB: > { %s4585_s6 = sadd.s32 4294967295, %s4516_s29   ;;  %s3826_s30 = sadd.s32 4294967294, %s4516_s29   ;;  %s4516_s29 = sphi %s4570_s29, %s6866_s29   ;;  %s4512_s28 = sphi %s4568_s28, %s6865_s28   ;;  %s4508_s27 = sphi %s4566_s27, %s6864_s27   ;;  %s4504_s26 = sphi %s4564_s26, %s6863_s26  }
   0x7   : > { %s4589_s8 = sadd.s32 1, %s4516_s29   ;;  %s181_s9 = sadd.s32 1, %s4512_s28 }
   0x8   : > { %s178_s10 = ssub.s32 %s4516_s29, %s4589_s8  ;;  %p191_p0 = scmp.ne.s32.totalorder %s4512_s28, %s4508_s27 }
   0x9   : > { %p179_p1 = scmp.eq.s32.totalorder %s178_s10, 0  ;;  %p192_p2 = scmp.eq.s32.totalorder %s4585_s6, 3 }
   0xa   : > { %p197_p3 = scmp.ne.s32.totalorder %s4508_s27, %s4504_s26  ;;  %p198_p4 = scmp.eq.s32.totalorder %s3826_s30, 3 }
   0xb   : > { %s4600_s11 = scalar_select %p179_p1, %s4512_s28, %s181_s9  }
   0xc   : > { %p4602_p5 = por %p192_p2, %p191_p0  ;;  %p4606_p6 = por %p198_p4, %p197_p3 }
   0xd   : > { %p3829_p7 = scmp.ge.s32.totalorder %s4516_s29, 1  ;;  %p243_p8 = scmp.lt.s32.totalorder %s4516_s29, 5 }
   0xf   : > { %p244_p9 = pnand %p3829_p7, %p243_p8 }
  0x11   : > { %247 = sbr.rel (%p244_p9) target bundleno = 2031 (0x7ef), region = 48 }
  0x16   : > { %v330_v1 = vld [vmem:[%s6639_s2 + $0x70] sm:$0xff]  ;;  %v328_v2 = vld [vmem:[%s6639_s2 + $0x60] sm:$0xff]  ;;  %s3831_s18 = sshll.u32 %s4585_s6, 1  ;;  %v4518_v3 = vmov 0   ;;  %v331_v4 = vld [vmem:[%s6639_s2 + $0x78] sm:$0xff]  ;;  %vm642_vm0 = vcmask 1043456  }
  0x17   : > { %4241 = vset.pattern.permute.xlu1 %v4518_v3  ;;  %4240 = vset.pattern.permute.xlu0 %v4518_v3  ;;  %p276_p10 = scmp.lt.s32.totalorder %s3831_s18, 7  ;;  %v329_v5 = vld [vmem:[%s6639_s2 + $0x68] sm:$0xff]  ;;  %v327_v6 = vld [vmem:[%s6639_s2 + $0x58] sm:$0xff]  ;;  %v326_v7 = vld [vmem:[%s6639_s2 + $0x50] sm:$0xff]  ;;  %vm593_vm1 = vcmask 64512   ;;  %s272_s14 = sand.u32 1, %s4508_s27  }
  0x18   : > { %420 = vperm.xlu0 %4240, %v330_v1   ;;  %410 = vperm.xlu1 %4241, %v328_v2   ;;  %v325_v11 = vld [vmem:[%s6639_s2 + $0x48] sm:$0xff]  ;;  %v324_v13 = vld [vmem:[%s6639_s2 + $0x40] sm:$0xff]  ;;  %v323_v16 = vld [vmem:[%s6639_s2 + $0x38] sm:$0xff]  ;;  %s4196_s16 = sshll.u32 %s4585_s6, 5  ;;  %s3753_s22 = scalar_lea.sflag [#allocation4], %s272_s14 }
  0x19   : > { %s6868_s18 = smov (!%p276_p10, %s3831_s18), 7  ;;  %681 = vmatprep.mubr.bf16.mxu0 %v4518_v3  ;;  %761 = vmatprep.mubr.bf16.mxu1 %v4518_v3  ;;  %v4244_v14 = vld [vmem:[%s6638_s1] sm:$0xff]   ;;  %v322_v17 = vld [vmem:[%s6639_s2 + $0x30] sm:$0xff]  ;;  %v321_v18 = vld [vmem:[%s6639_s2 + $0x28] sm:$0xff]  ;;  %s3765_s21 = scalar_lea.hbm %s6644_s7, %s4196_s16 }
  0x1a   : > { %s3832_s25 = sshll.u32 %s6868_s18, 2  ;;  %v4245_v15 = vld [vmem:[%s6638_s1 + $0x40] sm:$0xff]   ;;  %v4246_v20 = vld [vmem:[%s6638_s1 + $0x8] sm:$0xff]   ;;  %v319_v22 = vld [vmem:[%s6639_s2 + $0x18] sm:$0xff]  ;;  %s4520_s6 = smov [#allocation3]  }
  0x1b   : > { %s279_s15 = scalar_lea.vmem %s6637_s0, %s3832_s25  ;;  %v320_v19 = vld [vmem:[%s6639_s2 + $0x20] sm:$0xff]  ;;  %v4247_v21 = vld [vmem:[%s6638_s1 + $0x48] sm:$0xff]   ;;  %v318_v23 = vld [vmem:[%s6639_s2 + $0x10] sm:$0xff]  ;;  %s4460_s24 = sshll.u32 %s4520_s6, 4  ;;  %s4461_s24 = int_to_ptr.vmem [resolvable:$false] %s4460_s24 }
  0x1c   : > { %425 = vperm.xlu0 %4240, %v331_v4   ;;  %415 = vperm.xlu1 %4241, %v329_v5   ;;  %v283_v8 = vld [vmem:[%s279_s15] sm:$0xff]  ;;  %v317_v24 = vld [vmem:[%s6639_s2 + $0x8] sm:$0xff]  ;;  %v4248_v26 = vld [vmem:[%s6638_s1 + $0x10] sm:$0xff]   ;;  %s3830_s15 = sshll.u32 %s272_s14, 1  ;;  %s4462_s25 = scalar_lea.vmem %s4461_s24, 64 }
  0x1d   : > { %v3850_v9 = vcombine.high %v283_v8, %v283_v8  ;;  %v3849_v10 = vcombine.low %v283_v8, %v283_v8  ;;  %v316_v25 = vld [vmem:[%s6639_s2] sm:$0xff]  ;;  %v4249_v27 = vld [vmem:[%s6638_s1 + $0x50] sm:$0xff]   ;;  %v347_v28 = vld [vmem:[%s6639_s2 + $0xf8] sm:$0xff]  ;;  %s274_s17 = scalar_lea.vmem [#allocation3], %s3830_s15 }
  0x1e   : > { %v346_v29 = vld [vmem:[%s6639_s2 + $0xf0] sm:$0xff]  ;;  %v345_v30 = vld [vmem:[%s6639_s2 + $0xe8] sm:$0xff]  ;;  %v344_v31 = vld [vmem:[%s6639_s2 + $0xe0] sm:$0xff]  ;;  %s3767_s18 = sshll.u32 %s274_s17, 4  ;;  %s3768_s18 = int_to_ptr.vmem [resolvable:$true] %s3767_s18 }
  0x1f   : > { %v644_v12 = vsel %vm642_vm0, %v3849_v10, 0  ;;  %3851 = vmatprep.subr.msk.bf16.mxu0 %vm642_vm0, %v3850_v9  ;;  %4197 = vmatprep.subr.msk.bf16.mxu1 %vm642_vm0, %v3850_v9  ;;  %v4250_v32 = vld [vmem:[%s6638_s1 + $0x18] sm:$0xff]   ;;  %v342_v35 = vld [vmem:[%s6639_s2 + $0xd0] sm:$0xff]  ;;  %v341_v36 = vld [vmem:[%s6639_s2 + $0xc8] sm:$0xff]  ;;  %s4456_s23 = scalar_lea.vmem %s3768_s18, 32  ;;  %p4463_p0 = scmp.lt.s32.totalorder %s3768_s18, %s4461_s24 }
  0x20   : > { %405 = vperm.xlu1 %4241, %v327_v6   ;;  %400 = vperm.xlu0 %4240, %v326_v7   ;;  %v4251_v33 = vld [vmem:[%s6638_s1 + $0x58] sm:$0xff]   ;;  %v340_v37 = vld [vmem:[%s6639_s2 + $0xc0] sm:$0xff]  ;;  %v338_v41 = vld [vmem:[%s6639_s2 + $0xb0] sm:$0xff]  ;;  %p4457_p11 = scmp.ne.s32.totalorder %s3768_s18, %s4456_s23  ;;  %p4464_p1 = scmp.lt.s32.totalorder %s4462_s25, %s4456_s23 }
  0x21   : > { %664 = vmatpush1.bf16.msra.mxu0 %v644_v12  ;;  %4198 = vmatpush1.bf16.msra.mxu1 %v644_v12  ;;  %v343_v34 = vld [vmem:[%s6639_s2 + $0xd8] sm:$0xff]  ;;  %v4252_v38 = vld [vmem:[%s6638_s1 + $0x20] sm:$0xff]   ;;  %v337_v42 = vld [vmem:[%s6639_s2 + $0xa8] sm:$0xff] }
  0x22   : > { %v4253_v39 = vld [vmem:[%s6638_s1 + $0x60] sm:$0xff]   ;;  %v339_v40 = vld [vmem:[%s6639_s2 + $0xb8] sm:$0xff]  ;;  %v4254_v44 = vld [vmem:[%s6638_s1 + $0x28] sm:$0xff]   ;;  %p4458_p12 = pnand %p4457_p11, %p4602_p5  ;;  %p4465_p2 = por %p4464_p1, %p4463_p0 }
  0x23   : > { %v336_v43 = vld [vmem:[%s6639_s2 + $0xa0] sm:$0xff]  ;;  %v4255_v45 = vld [vmem:[%s6638_s1 + $0x68] sm:$0xff]   ;;  %v335_v46 = vld [vmem:[%s6639_s2 + $0x98] sm:$0xff] }
  0x24   : > { %395 = vperm.xlu1 %4241, %v325_v11   ;;  %390 = vperm.xlu0 %4240, %v324_v13   ;;  %v334_v47 = vld [vmem:[%s6639_s2 + $0x90] sm:$0xff]  ;;  %v333_v48 = vld [vmem:[%s6639_s2 + $0x88] sm:$0xff]  ;;  %v332_v49 = vld [vmem:[%s6639_s2 + $0x80] sm:$0xff]  ;;  %p4459_p13 = pneg %p4458_p12 }
  0x25   : > { %3852 = vmatmul.mubr.msk.bf16.vlgmr.msra.gmra.mxu0 %vm593_vm1, %v4244_v14  ;;  %3860 = vmatmul.mubr.msk.bf16.vlgmr.msra.gmra.mxu1 %vm593_vm1, %v4245_v15  ;;  %v4256_v50 = vld [vmem:[%s6638_s1 + $0x30] sm:$0xff]   ;;  %v985_v52 = vld [vmem:[%s6641_s4 + $0x78] sm:$0xff]  ;;  %v983_v54 = vld [vmem:[%s6641_s4 + $0x68] sm:$0xff] }
  0x26   : > { %691 = vmatprep.mubr.bf16.mxu0 %v4518_v3  ;;  %771 = vmatprep.mubr.bf16.mxu1 %v4518_v3  ;;  %v4257_v51 = vld [vmem:[%s6638_s1 + $0x70] sm:$0xff]   ;;  %v982_v55 = vld [vmem:[%s6641_s4 + $0x60] sm:$0xff]  ;;  %v4258_v56 = vld [vmem:[%s6638_s1 + $0x38] sm:$0xff]   ;;  %p4466_p3 = pnand %p4465_p2, %p4459_p13 }
  0x27   : > { %v984_v53 = vld [vmem:[%s6641_s4 + $0x70] sm:$0xff]  ;;  %v4259_v57 = vld [vmem:[%s6638_s1 + $0x78] sm:$0xff]   ;;  %v979_v60 = vld [vmem:[%s6641_s4 + $0x48] sm:$0xff] }
  0x28   : > { %385 = vperm.xlu1 %4241, %v323_v16   ;;  %380 = vperm.xlu0 %4240, %v322_v17   ;;  %v981_v58 = vld [vmem:[%s6641_s4 + $0x58] sm:$0xff]  ;;  %v980_v59 = vld [vmem:[%s6641_s4 + $0x50] sm:$0xff]  ;;  %v978_v61 = vld [vmem:[%s6641_s4 + $0x40] sm:$0xff] }
  0x29   : > { %v977_v62 = vld [vmem:[%s6641_s4 + $0x38] sm:$0xff]  ;;  %v976_v63 = vld [vmem:[%s6641_s4 + $0x30] sm:$0xff]  ;;  %v975_v0 = vld [vmem:[%s6641_s4 + $0x28] sm:$0xff] }
  0x2a   : > { %v974_v1 = vld [vmem:[%s6641_s4 + $0x20] sm:$0xff]  ;;  %v973_v2 = vld [vmem:[%s6641_s4 + $0x18] sm:$0xff]  ;;  %v971_v4 = vld [vmem:[%s6641_s4 + $0x8] sm:$0xff] }
  0x2b   : > { %v970_v5 = vld [vmem:[%s6641_s4] sm:$0xff]  ;;  %v1001_v6 = vld [vmem:[%s6641_s4 + $0xf8] sm:$0xff]  ;;  %v1000_v7 = vld [vmem:[%s6641_s4 + $0xf0] sm:$0xff] }
  0x2c   : > { %375 = vperm.xlu1 %4241, %v321_v18   ;;  %370 = vperm.xlu0 %4240, %v320_v19   ;;  %v999_v8 = vld [vmem:[%s6641_s4 + $0xe8] sm:$0xff]  ;;  %v998_v9 = vld [vmem:[%s6641_s4 + $0xe0] sm:$0xff]  ;;  %v997_v10 = vld [vmem:[%s6641_s4 + $0xd8] sm:$0xff] }
  0x2d   : > { %3853 = vmatmul.mubr.msk.bf16.gmra.mxu0 %vm593_vm1, %v4246_v20  ;;  %3861 = vmatmul.mubr.msk.bf16.gmra.mxu1 %vm593_vm1, %v4247_v21  ;;  %v996_v11 = vld [vmem:[%s6641_s4 + $0xd0] sm:$0xff]  ;;  %v995_v12 = vld [vmem:[%s6641_s4 + $0xc8] sm:$0xff]  ;;  %v994_v13 = vld [vmem:[%s6641_s4 + $0xc0] sm:$0xff] }
  0x2e   : > { %701 = vmatprep.mubr.bf16.mxu0 %v4518_v3  ;;  %781 = vmatprep.mubr.bf16.mxu1 %v4518_v3  ;;  %v993_v14 = vld [vmem:[%s6641_s4 + $0xb8] sm:$0xff]  ;;  %v992_v15 = vld [vmem:[%s6641_s4 + $0xb0] sm:$0xff]  ;;  %v991_v16 = vld [vmem:[%s6641_s4 + $0xa8] sm:$0xff] }
  0x2f   : > { %v990_v17 = vld [vmem:[%s6641_s4 + $0xa0] sm:$0xff]  ;;  %v989_v18 = vld [vmem:[%s6641_s4 + $0x98] sm:$0xff]  ;;  %v988_v19 = vld [vmem:[%s6641_s4 + $0x90] sm:$0xff] }
  0x30   : > { %365 = vperm.xlu1 %4241, %v319_v22   ;;  %360 = vperm.xlu0 %4240, %v318_v23   ;;  %v987_v20 = vld [vmem:[%s6641_s4 + $0x88] sm:$0xff]  ;;  %v986_v21 = vld [vmem:[%s6641_s4 + $0x80] sm:$0xff] }
  0x34   : > { %355 = vperm.xlu1 %4241, %v317_v24   ;;  %350 = vperm.xlu0 %4240, %v316_v25   ;;  %v3947_v24 = vld [vmem:[%s6641_s4 + $0x178] sm:$0xff]  ;;  %v3946_v25 = vld [vmem:[%s6641_s4 + $0x170] sm:$0xff] }
  0x35   : > { %3854 = vmatmul.mubr.msk.bf16.gmra.mxu0 %vm593_vm1, %v4248_v26  ;;  %3862 = vmatmul.mubr.msk.bf16.gmra.mxu1 %vm593_vm1, %v4249_v27 }
  0x36   : > { %711 = vmatprep.mubr.bf16.mxu0 %v4518_v3  ;;  %791 = vmatprep.mubr.bf16.mxu1 %v4518_v3 }
  0x38   : > { %505 = vperm.xlu1 %4241, %v347_v28   ;;  %500 = vperm.xlu0 %4240, %v346_v29   ;;  %v3945_v28 = vld [vmem:[%s6641_s4 + $0x168] sm:$0xff]  ;;  %v3944_v29 = vld [vmem:[%s6641_s4 + $0x160] sm:$0xff] }
  0x3c   : > { %495 = vperm.xlu1 %4241, %v345_v30   ;;  %490 = vperm.xlu0 %4240, %v344_v31  }
  0x3d   : > { %3855 = vmatmul.mubr.msk.bf16.gmra.mxu0 %vm593_vm1, %v4250_v32  ;;  %3863 = vmatmul.mubr.msk.bf16.gmra.mxu1 %vm593_vm1, %v4251_v33  ;;  %v3943_v32 = vld [vmem:[%s6641_s4 + $0x158] sm:$0xff]  ;;  %v3942_v33 = vld [vmem:[%s6641_s4 + $0x150] sm:$0xff] }
  0x3e   : > { %721 = vmatprep.mubr.bf16.mxu0 %v4518_v3  ;;  %801 = vmatprep.mubr.bf16.mxu1 %v4518_v3 }
  0x40   : > { %485 = vperm.xlu1 %4241, %v343_v34   ;;  %480 = vperm.xlu0 %4240, %v342_v35  }
  0x44   : > { %475 = vperm.xlu1 %4241, %v341_v36   ;;  %470 = vperm.xlu0 %4240, %v340_v37   ;;  %v3941_v36 = vld [vmem:[%s6641_s4 + $0x148] sm:$0xff]  ;;  %v3940_v37 = vld [vmem:[%s6641_s4 + $0x140] sm:$0xff] }
  0x45   : > { %3856 = vmatmul.mubr.msk.bf16.gmra.mxu0 %vm593_vm1, %v4252_v38  ;;  %3864 = vmatmul.mubr.msk.bf16.gmra.mxu1 %vm593_vm1, %v4253_v39  ;;  %v3939_v39 = vld [vmem:[%s6641_s4 + $0x138] sm:$0xff] }
  0x46   : > { %731 = vmatprep.mubr.bf16.mxu0 %v4518_v3  ;;  %811 = vmatprep.mubr.bf16.mxu1 %v4518_v3 }
  0x48   : > { %465 = vperm.xlu1 %4241, %v339_v40   ;;  %460 = vperm.xlu0 %4240, %v338_v41   ;;  %v3938_v40 = vld [vmem:[%s6641_s4 + $0x130] sm:$0xff] }
  0x4c   : > { %455 = vperm.xlu1 %4241, %v337_v42   ;;  %450 = vperm.xlu0 %4240, %v336_v43   ;;  %v3937_v43 = vld [vmem:[%s6641_s4 + $0x128] sm:$0xff] }
  0x4d   : > { %3857 = vmatmul.mubr.msk.bf16.gmra.mxu0 %vm593_vm1, %v4254_v44  ;;  %3865 = vmatmul.mubr.msk.bf16.gmra.mxu1 %vm593_vm1, %v4255_v45  ;;  %v3936_v44 = vld [vmem:[%s6641_s4 + $0x120] sm:$0xff] }
  0x4e   : > { %741 = vmatprep.mubr.bf16.mxu0 %v4518_v3  ;;  %821 = vmatprep.mubr.bf16.mxu1 %v4518_v3 }
  0x50   : > { %445 = vperm.xlu1 %4241, %v335_v46   ;;  %440 = vperm.xlu0 %4240, %v334_v47   ;;  %v3935_v46 = vld [vmem:[%s6641_s4 + $0x118] sm:$0xff]  ;;  %v3934_v47 = vld [vmem:[%s6641_s4 + $0x110] sm:$0xff] }
  0x54   : > { %435 = vperm.xlu1 %4241, %v333_v48   ;;  %430 = vperm.xlu0 %4240, %v332_v49   ;;  %v3933_v49 = vld [vmem:[%s6641_s4 + $0x108] sm:$0xff] }
  0x55   : > { %3858 = vmatmul.mubr.msk.bf16.gmra.mxu0 %vm593_vm1, %v4256_v50  ;;  %3866 = vmatmul.mubr.msk.bf16.gmra.mxu1 %vm593_vm1, %v4257_v51  ;;  %v3932_v50 = vld [vmem:[%s6641_s4 + $0x100] sm:$0xff] }
  0x56   : > { %751 = vmatprep.mubr.bf16.mxu0 %v4518_v3  ;;  %831 = vmatprep.mubr.bf16.mxu1 %v4518_v3  ;;  %v972_v3 = vld [vmem:[%s6641_s4 + $0x10] sm:$0xff] }
  0x58   : > { %1079 = vperm.xlu1 %4241, %v985_v52   ;;  %1074 = vperm.xlu0 %4240, %v984_v53   ;;  %v3963_v53 = vld [vmem:[%s6641_s4 + $0x1f8] sm:$0xff] }
  0x5c   : > { %1069 = vperm.xlu1 %4241, %v983_v54   ;;  %1064 = vperm.xlu0 %4240, %v982_v55   ;;  %v3962_v54 = vld [vmem:[%s6641_s4 + $0x1f0] sm:$0xff] }
  0x5d   : > { %3859 = vmatmul.mubr.msk.bf16.gmra.mxu0 %vm593_vm1, %v4258_v56  ;;  %3867 = vmatmul.mubr.msk.bf16.gmra.mxu1 %vm593_vm1, %v4259_v57  ;;  %v3961_v56 = vld [vmem:[%s6641_s4 + $0x1e8] sm:$0xff]  ;;  %v3960_v57 = vld [vmem:[%s6641_s4 + $0x1e0] sm:$0xff] }
  0x60   : > { %1059 = vperm.xlu1 %4241, %v981_v58   ;;  %1054 = vperm.xlu0 %4240, %v980_v59   ;;  %v3959_v59 = vld [vmem:[%s6641_s4 + $0x1d8] sm:$0xff] }
  0x64   : > { %1049 = vperm.xlu1 %4241, %v979_v60   ;;  %1044 = vperm.xlu0 %4240, %v978_v61   ;;  %v3958_v60 = vld [vmem:[%s6641_s4 + $0x1d0] sm:$0xff] }
  0x68   : > { %1039 = vperm.xlu1 %4241, %v977_v62   ;;  %1034 = vperm.xlu0 %4240, %v976_v63   ;;  %v3957_v63 = vld [vmem:[%s6641_s4 + $0x1c8] sm:$0xff] }
  0x6c   : > { %1029 = vperm.xlu1 %4241, %v975_v0   ;;  %1024 = vperm.xlu0 %4240, %v974_v1   ;;  %v3956_v0 = vld [vmem:[%s6641_s4 + $0x1c0] sm:$0xff] }
  0x70   : > { %1019 = vperm.xlu1 %4241, %v973_v2   ;;  %1014 = vperm.xlu0 %4240, %v972_v3   ;;  %v3955_v2 = vld [vmem:[%s6641_s4 + $0x1b8] sm:$0xff]  ;;  %v3954_v3 = vld [vmem:[%s6641_s4 + $0x1b0] sm:$0xff] }
  0x74   : > { %1009 = vperm.xlu1 %4241, %v971_v4   ;;  %1004 = vperm.xlu0 %4240, %v970_v5   ;;  %v3953_v5 = vld [vmem:[%s6641_s4 + $0x1a8] sm:$0xff] }
  0x78   : > { %1159 = vperm.xlu1 %4241, %v1001_v6   ;;  %1154 = vperm.xlu0 %4240, %v1000_v7   ;;  %v3952_v6 = vld [vmem:[%s6641_s4 + $0x1a0] sm:$0xff] }
  0x7c   : > { %1149 = vperm.xlu1 %4241, %v999_v8   ;;  %1144 = vperm.xlu0 %4240, %v998_v9   ;;  %v3951_v9 = vld [vmem:[%s6641_s4 + $0x198] sm:$0xff] }
  0x80   : > { %1139 = vperm.xlu1 %4241, %v997_v10   ;;  %1134 = vperm.xlu0 %4240, %v996_v11   ;;  %v3950_v10 = vld [vmem:[%s6641_s4 + $0x190] sm:$0xff] }
  0x84   : > { %1129 = vperm.xlu1 %4241, %v995_v12   ;;  %1124 = vperm.xlu0 %4240, %v994_v13   ;;  %v3949_v12 = vld [vmem:[%s6641_s4 + $0x188] sm:$0xff]  ;;  %v3948_v13 = vld [vmem:[%s6641_s4 + $0x180] sm:$0xff] }
  0x88   : > { %1119 = vperm.xlu1 %4241, %v993_v14   ;;  %1114 = vperm.xlu0 %4240, %v992_v15   ;;  %v4043_v15 = vld [vmem:[%s6641_s4 + $0x278] sm:$0xff] }
  0x8c   : > { %1109 = vperm.xlu1 %4241, %v991_v16   ;;  %1104 = vperm.xlu0 %4240, %v990_v17   ;;  %v4042_v16 = vld [vmem:[%s6641_s4 + $0x270] sm:$0xff] }
  0x90   : > { %1099 = vperm.xlu1 %4241, %v989_v18   ;;  %1094 = vperm.xlu0 %4240, %v988_v19   ;;  %v4041_v19 = vld [vmem:[%s6641_s4 + $0x268] sm:$0xff] }
  0x93   : > { %v4890_v22 = vpop.permute.xlu0 %420  ;;  %v4892_v23 = vpop.permute.xlu1 %410 }
  0x94   : > { %1089 = vperm.xlu1 %4241, %v987_v20   ;;  %1084 = vperm.xlu0 %4240, %v986_v21   ;;  %v4040_v20 = vld [vmem:[%s6641_s4 + $0x260] sm:$0xff] }
  0x97   : > { %v4900_v26 = vpop.permute.xlu0 %425  ;;  %v4902_v27 = vpop.permute.xlu1 %415 }
  0x98   : > { %1754 = vperm.xlu1 %4241, %v3947_v24   ;;  %1749 = vperm.xlu0 %4240, %v3946_v25   ;;  %v4039_v24 = vld [vmem:[%s6641_s4 + $0x258] sm:$0xff]  ;;  %v4038_v25 = vld [vmem:[%s6641_s4 + $0x250] sm:$0xff] }
  0x9b   : > { %v4910_v30 = vpop.permute.xlu1 %405  ;;  %v4912_v31 = vpop.permute.xlu0 %400 }
  0x9c   : > { %1744 = vperm.xlu1 %4241, %v3945_v28   ;;  %1739 = vperm.xlu0 %4240, %v3944_v29   ;;  %v4037_v29 = vld [vmem:[%s6641_s4 + $0x248] sm:$0xff] }
  0x9f   : > { %v4920_v34 = vpop.permute.xlu0 %390  ;;  %v4922_v35 = vpop.permute.xlu1 %395 }
  0xa0   : > { %1734 = vperm.xlu1 %4241, %v3943_v32   ;;  %1729 = vperm.xlu0 %4240, %v3942_v33   ;;  %v4036_v32 = vld [vmem:[%s6641_s4 + $0x240] sm:$0xff] }
  0xa3   : > { %v4930_v38 = vpop.permute.xlu0 %380  ;;  %v4938_v41 = vpop.permute.xlu1 %385 }
  0xa4   : > { %1724 = vperm.xlu1 %4241, %v3941_v36   ;;  %1719 = vperm.xlu0 %4240, %v3940_v37  }
  0xa7   : > { %v4940_v42 = vpop.permute.xlu0 %370  ;;  %v4948_v45 = vpop.permute.xlu1 %375 }
  0xa8   : > { %1714 = vperm.xlu1 %4241, %v3939_v39   ;;  %1709 = vperm.xlu0 %4240, %v3938_v40   ;;  %v4035_v40 = vld [vmem:[%s6641_s4 + $0x238] sm:$0xff] }
  0xab   : > { %v4956_v48 = vpop.permute.xlu0 %360  ;;  %v4964_v51 = vpop.permute.xlu1 %365 }
  0xac   : > { %1704 = vperm.xlu1 %4241, %v3937_v43   ;;  %1699 = vperm.xlu0 %4240, %v3936_v44   ;;  %v4034_v43 = vld [vmem:[%s6641_s4 + $0x230] sm:$0xff] }
  0xaf   : > { %v4966_v52 = vpop.permute.xlu0 %350  ;;  %v4974_v55 = vpop.permute.xlu1 %355 }
  0xb0   : > { %1694 = vperm.xlu1 %4241, %v3935_v46   ;;  %1689 = vperm.xlu0 %4240, %v3934_v47  }
  0xb3   : > { %v4982_v58 = vpop.permute.xlu0 %500  ;;  %v4990_v61 = vpop.permute.xlu1 %505 }
  0xb4   : > { %1684 = vperm.xlu1 %4241, %v3933_v49   ;;  %1679 = vperm.xlu0 %4240, %v3932_v50  }
  0xb7   : > { %v4992_v62 = vpop.permute.xlu0 %490  ;;  %v5000_v1 = vpop.permute.xlu1 %495 }
  0xb8   : > { %1834 = vperm.xlu1 %4241, %v3963_v53   ;;  %1829 = vperm.xlu0 %4240, %v3962_v54   ;;  %v4262_v53 = vld [vmem:[%s6640_s3 + $0x4] ss:$8 sps:$4 sm:$0xff]  }
  0xb9   : > { %1354 = vmatprep.mubr.bf16.mxu1 %v4262_v53 }
  0xbb   : > { %v5008_v4 = vpop.permute.xlu0 %480  ;;  %v5016_v7 = vpop.permute.xlu1 %485 }
  0xbc   : > { %1824 = vperm.xlu1 %4241, %v3961_v56   ;;  %1819 = vperm.xlu0 %4240, %v3960_v57   ;;  %v4033_v57 = vld [vmem:[%s6641_s4 + $0x228] sm:$0xff] }
  0xbf   : > { %v5018_v8 = vpop.permute.xlu0 %470  ;;  %v5026_v11 = vpop.permute.xlu1 %475 }
  0xc0   : > { %1814 = vperm.xlu1 %4241, %v3959_v59   ;;  %1809 = vperm.xlu0 %4240, %v3958_v60   ;;  %6706 = vst [vmem:[#allocation6_spill] sm:$0xff] %v5018_v8  ;;  %6707 = vst [vmem:[#allocation7_spill] sm:$0xff] %v5026_v11  ;;  %v4032_v59 = vld [vmem:[%s6641_s4 + $0x220] sm:$0xff] }
  0xc3   : > { %v5034_v14 = vpop.permute.xlu0 %460  ;;  %v5042_v17 = vpop.permute.xlu1 %465 }
  0xc4   : > { %1804 = vperm.xlu1 %4241, %v3957_v63   ;;  %1799 = vperm.xlu0 %4240, %v3956_v0   ;;  %6708 = vst [vmem:[#allocation8_spill] sm:$0xff] %v5034_v14  ;;  %6709 = vst [vmem:[#allocation9_spill] sm:$0xff] %v5042_v17  ;;  %v4136_v17 = vld [vmem:[%s6641_s4 + $0x360] sm:$0xff] }
  0xc7   : > { %v5044_v18 = vpop.permute.xlu0 %450  ;;  %v5052_v21 = vpop.permute.xlu1 %455 }
  0xc8   : > { %1794 = vperm.xlu1 %4241, %v3955_v2   ;;  %1789 = vperm.xlu0 %4240, %v3954_v3   ;;  %6710 = vst [vmem:[#allocation10_spill] sm:$0xff] %v5044_v18  ;;  %6711 = vst [vmem:[#allocation11_spill] sm:$0xff] %v5052_v21 }
  0xcb   : > { %v5060_v28 = vpop.permute.xlu0 %440  ;;  %v5068_v33 = vpop.permute.xlu1 %445 }
  0xcc   : > { %1784 = vperm.xlu1 %4241, %v3953_v5   ;;  %1779 = vperm.xlu0 %4240, %v3952_v6   ;;  %6712 = vst [vmem:[#allocation12_spill] sm:$0xff] %v5060_v28  ;;  %6713 = vst [vmem:[#allocation13_spill] sm:$0xff] %v5068_v33 }
  0xcf   : > { %v5070_v36 = vpop.permute.xlu0 %430  ;;  %v5083_v49 = vpop.permute.xlu1 %435 }
  0xd0   : > { %1774 = vperm.xlu1 %4241, %v3951_v9   ;;  %1769 = vperm.xlu0 %4240, %v3950_v10   ;;  %6714 = vst [vmem:[#allocation14_spill] sm:$0xff] %v5070_v36  ;;  %6716 = vst [vmem:[#allocation16_spill] sm:$0xff] %v5083_v49 }
  0xd4   : > { %1764 = vperm.xlu1 %4241, %v3949_v12   ;;  %1759 = vperm.xlu0 %4240, %v3948_v13   ;;  %v4031_v13 = vld [vmem:[%s6641_s4 + $0x218] sm:$0xff] }
  0xd8   : > { %2429 = vperm.xlu1 %4241, %v4043_v15   ;;  %2424 = vperm.xlu0 %4240, %v4042_v16   ;;  %v4030_v15 = vld [vmem:[%s6641_s4 + $0x210] sm:$0xff] }
  0xdc   : > { %2419 = vperm.xlu1 %4241, %v4041_v19   ;;  %2414 = vperm.xlu0 %4240, %v4040_v20  }
  0xe0   : > { %2409 = vperm.xlu1 %4241, %v4039_v24   ;;  %2404 = vperm.xlu0 %4240, %v4038_v25  }
  0xe4   : > { %2399 = vperm.xlu1 %4241, %v4037_v29   ;;  %2394 = vperm.xlu0 %4240, %v4036_v32  }
  0xe5   : > { %v683_v37 = vpop.f32.mrf.mxu0  ;;  %v763_v39 = vpop.f32.mrf.mxu1 }
  0xe6   : > { %v764_v44 = vadd.f32 %v763_v39, %v5070_v36  ;;  %v684_v50 = vadd.f32 %v683_v37, %v4966_v52  ;;  %v4029_v39 = vld [vmem:[%s6641_s4 + $0x208] sm:$0xff] }
  0xe7   : > { %v5079_v46 = vpop.f32.mrf.mxu0  ;;  %v5081_v47 = vpop.f32.mrf.mxu1 }
  0xe8   : > { %6715 = vst [vmem:[#allocation15_spill] sm:$0xff] %v5081_v47  ;;  %2389 = vperm.xlu1 %4241, %v4035_v40   ;;  %2384 = vperm.xlu0 %4240, %v4034_v43   ;;  %v874_v60 = vmax.f32 %v764_v44, 0.0  ;;  %v842_v5 = vmax.f32 %v684_v50, 0.0  ;;  %v4028_v40 = vld [vmem:[%s6641_s4 + $0x200] sm:$0xff] }
  0xe9   : > { %v687_v54 = vpop.f32.mrf.mxu0  ;;  %v767_v56 = vpop.f32.mrf.mxu1  ;;  %v4048_v47 = vld [vmem:[%s6641_s4 + $0x2a0] sm:$0xff] }
  0xea   : > { %v688_v63 = vadd.f32 %v687_v54, %v4974_v55  ;;  %v768_v0 = vadd.f32 %v767_v56, %v5083_v49 }
  0xeb   : > { %v5097_v2 = vpop.f32.mrf.mxu0  ;;  %v5099_v3 = vpop.f32.mrf.mxu1 }
  0xec   : > { %6717 = vst [vmem:[#allocation17_spill] sm:$0xff] %v5099_v3  ;;  %v844_v6 = vmax.f32 %v688_v63, 0.0  ;;  %v876_v9 = vmax.f32 %v768_v0, 0.0  ;;  %2379 = vperm.xlu1 %4241, %v4033_v57   ;;  %2374 = vperm.xlu0 %4240, %v4032_v59   ;;  %v4059_v0 = vld [vmem:[%s6641_s4 + $0x2f8] sm:$0xff] }
  0xed   : > { %v693_v10 = vpop.f32.mrf.mxu0  ;;  %v773_v12 = vpop.f32.mrf.mxu1 }
  0xee   : > { %v5107_v16 = vpack.c.bf16 %v844_v6, %v842_v5  ;;  %v5109_v19 = vpack.c.bf16 %v876_v9, %v874_v60  ;;  %v774_v20 = vadd.f32 %v773_v12, %v5060_v28  ;;  %v694_v29 = vadd.f32 %v693_v10, %v4956_v48  ;;  %v4058_v5 = vld [vmem:[%s6641_s4 + $0x2f0] sm:$0xff] }
  0xef   : > { %v5112_v24 = vpop.f32.mrf.mxu0  ;;  %v5114_v25 = vpop.f32.mrf.mxu1 }
  0xf0   : > { %6718 = vst [vmem:[#allocation18_spill] sm:$0xff] %v5107_v16  ;;  %6719 = vst [vmem:[#allocation19_spill] sm:$0xff] %v5109_v19  ;;  %2369 = vperm.xlu1 %4241, %v4031_v13   ;;  %2364 = vperm.xlu0 %4240, %v4030_v15   ;;  %v878_v43 = vmax.f32 %v774_v20, 0.0  ;;  %v846_v56 = vmax.f32 %v694_v29, 0.0  ;;  %v4057_v29 = vld [vmem:[%s6641_s4 + $0x2e8] sm:$0xff] }
  0xf1   : > { %6720 = vst [vmem:[#allocation20_spill] sm:$0xff] %v5114_v25  ;;  %v697_v32 = vpop.f32.mrf.mxu0  ;;  %v777_v37 = vpop.f32.mrf.mxu1  ;;  %v4046_v25 = vld [vmem:[%s6641_s4 + $0x290] sm:$0xff] }
  0xf2   : > { %v698_v44 = vadd.f32 %v697_v32, %v4964_v51  ;;  %v778_v50 = vadd.f32 %v777_v37, %v5068_v33  ;;  %v4056_v32 = vld [vmem:[%s6641_s4 + $0x2e0] sm:$0xff]  ;;  %v4047_v33 = vld [vmem:[%s6641_s4 + $0x298] sm:$0xff] }
  0xf3   : > { %v5125_v53 = vpop.f32.mrf.mxu0  ;;  %v5127_v54 = vpop.f32.mrf.mxu1 }
  0xf4   : > { %6721 = vst [vmem:[#allocation21_spill] sm:$0xff] %v5127_v54  ;;  %v848_v57 = vmax.f32 %v698_v44, 0.0  ;;  %v880_v59 = vmax.f32 %v778_v50, 0.0  ;;  %2359 = vperm.xlu1 %4241, %v4029_v39   ;;  %2354 = vperm.xlu0 %4240, %v4028_v40  }
  0xf5   : > { %v5129_v60 = vpop.f32.mrf.mxu0  ;;  %v783_v63 = vpop.f32.mrf.mxu1 }
  0xf6   : > { %v5137_v6 = vpack.c.bf16 %v848_v57, %v846_v56  ;;  %v5139_v9 = vpack.c.bf16 %v880_v59, %v878_v43  ;;  %v784_v10 = vadd.f32 %v783_v63, %v5044_v18  ;;  %v4055_v57 = vld [vmem:[%s6641_s4 + $0x2d8] sm:$0xff]  ;;  %v4054_v59 = vld [vmem:[%s6641_s4 + $0x2d0] sm:$0xff]  ;;  %v5169_v63 = vpop.permute.xlu0 %1074 }
  0xf7   : > { %v5142_v12 = vpop.f32.mrf.mxu0  ;;  %v5144_v13 = vpop.f32.mrf.mxu1  ;;  %6726 = vst [vmem:[#allocation26_spill] sm:$0xff] %v5169_v63 }
  0xf8   : > { %6722 = vst [vmem:[#allocation22_spill] sm:$0xff] %v5139_v9  ;;  %6723 = vst [vmem:[#allocation23_spill] sm:$0xff] %v5144_v13  ;;  %2509 = vperm.xlu1 %4241, %v4059_v0   ;;  %2504 = vperm.xlu0 %4240, %v4058_v5   ;;  %v882_v37 = vmax.f32 %v784_v10, 0.0  ;;  %v4050_v9 = vld [vmem:[%s6641_s4 + $0x2b0] sm:$0xff] }
  0xf9   : > { %v5146_v15 = vpop.f32.mrf.mxu0  ;;  %v787_v20 = vpop.f32.mrf.mxu1 }
  0xfa   : > { %v788_v39 = vadd.f32 %v787_v20, %v5052_v21  ;;  %v5177_v20 = vpop.permute.xlu1 %1079  ;;  %v5193_v19 = vpop.permute.xlu0 %1064 }
  0xfb   : > { %v5155_v40 = vpop.f32.mrf.mxu0  ;;  %v5157_v43 = vpop.f32.mrf.mxu1  ;;  %6729 = vst [vmem:[#allocation29_spill] sm:$0xff] %v5177_v20  ;;  %6732 = vst [vmem:[#allocation32_spill] sm:$0xff] %v5193_v19  ;;  %v4051_v20 = vld [vmem:[%s6641_s4 + $0x2b8] sm:$0xff]  ;;  %v4049_v19 = vld [vmem:[%s6641_s4 + $0x2a8] sm:$0xff] }
  0xfc   : > { %6724 = vst [vmem:[#allocation24_spill] sm:$0xff] %v5157_v43  ;;  %v884_v44 = vmax.f32 %v788_v39, 0.0  ;;  %2499 = vperm.xlu1 %4241, %v4057_v29   ;;  %2494 = vperm.xlu0 %4240, %v4056_v32   ;;  %v4053_v39 = vld [vmem:[%s6641_s4 + $0x2c8] sm:$0xff] }
  0xfd   : > { %v5159_v50 = vpop.f32.mrf.mxu0  ;;  %v5161_v56 = vpop.f32.mrf.mxu1 }
  0xfe   : > { %6725 = vst [vmem:[#allocation25_spill] sm:$0xff] %v5161_v56  ;;  %v5171_v0 = vpack.c.bf16 %v884_v44, %v882_v37  ;;  %v4052_v37 = vld [vmem:[%s6641_s4 + $0x2c0] sm:$0xff]  ;;  %v5221_v36 = vpop.permute.xlu0 %1054 }
  0xff   : > { %v5173_v5 = vpop.f32.mrf.mxu0  ;;  %v5175_v10 = vpop.f32.mrf.mxu1  ;;  %6737 = vst [vmem:[#allocation37_spill] sm:$0xff] %v5221_v36 }
 0x100   : > { %6727 = vst [vmem:[#allocation27_spill] sm:$0xff] %v5171_v0  ;;  %6728 = vst [vmem:[#allocation28_spill] sm:$0xff] %v5175_v10  ;;  %2489 = vperm.xlu1 %4241, %v4055_v57   ;;  %2484 = vperm.xlu0 %4240, %v4054_v59   ;;  %v5205_v0 = vpop.permute.xlu1 %1069 }
 0x101   : > { %v5179_v29 = vpop.f32.mrf.mxu0  ;;  %v5181_v32 = vpop.f32.mrf.mxu1  ;;  %6734 = vst [vmem:[#allocation34_spill] sm:$0xff] %v5205_v0 }
 0x102   : > { %6730 = vst [vmem:[#allocation30_spill] sm:$0xff] %v5181_v32  ;;  %v5241_v43 = vpop.permute.xlu0 %1044 }
 0x103   : > { %v5189_v44 = vpop.f32.mrf.mxu0  ;;  %v5191_v63 = vpop.f32.mrf.mxu1  ;;  %6741 = vst [vmem:[#allocation41_spill] sm:$0xff] %v5241_v43 }
 0x104   : > { %6731 = vst [vmem:[#allocation31_spill] sm:$0xff] %v5191_v63  ;;  %2479 = vperm.xlu1 %4241, %v4053_v39   ;;  %2474 = vperm.xlu0 %4240, %v4052_v37  }
 0x105   : > { %v5195_v57 = vpop.f32.mrf.mxu0  ;;  %v5197_v59 = vpop.f32.mrf.mxu1 }
 0x106   : > { %6733 = vst [vmem:[#allocation33_spill] sm:$0xff] %v5197_v59  ;;  %v5261_v13 = vpop.permute.xlu0 %1034 }
 0x107   : > { %v5207_v3 = vpop.f32.mrf.mxu0  ;;  %v5209_v49 = vpop.f32.mrf.mxu1  ;;  %6743 = vst [vmem:[#allocation43_spill] sm:$0xff] %v5261_v13 }
 0x108   : > { %6735 = vst [vmem:[#allocation35_spill] sm:$0xff] %v5209_v49  ;;  %2469 = vperm.xlu1 %4241, %v4051_v20   ;;  %2464 = vperm.xlu0 %4240, %v4050_v9   ;;  %v5227_v20 = vpop.permute.xlu1 %1059 }
 0x109   : > { %v5211_v39 = vpop.f32.mrf.mxu0  ;;  %v5213_v37 = vpop.f32.mrf.mxu1  ;;  %6739 = vst [vmem:[#allocation39_spill] sm:$0xff] %v5227_v20  ;;  %v4044_v20 = vld [vmem:[%s6641_s4 + $0x280] sm:$0xff] }
 0x10a   : > { %6736 = vst [vmem:[#allocation36_spill] sm:$0xff] %v5213_v37  ;;  %v5275_v13 = vpop.permute.xlu0 %1024 }
 0x10b   : > { %v5223_v0 = vpop.f32.mrf.mxu0  ;;  %v5225_v54 = vpop.f32.mrf.mxu1  ;;  %6747 = vst [vmem:[#allocation47_spill] sm:$0xff] %v5275_v13 }
 0x10c   : > { %6738 = vst [vmem:[#allocation38_spill] sm:$0xff] %v5225_v54  ;;  %2459 = vperm.xlu1 %4241, %v4049_v19   ;;  %2454 = vperm.xlu0 %4240, %v4048_v47   ;;  %v4045_v47 = vld [vmem:[%s6641_s4 + $0x288] sm:$0xff]  ;;  %v5251_v21 = vpop.permute.xlu1 %1049 }
 0x10d   : > { %v5229_v9 = vpop.f32.mrf.mxu0  ;;  %v5237_v28 = vpop.f32.mrf.mxu1  ;;  %6742 = vst [vmem:[#allocation42_spill] sm:$0xff] %v5251_v21 }
 0x10e   : > { %6740 = vst [vmem:[#allocation40_spill] sm:$0xff] %v5237_v28  ;;  %v5293_v13 = vpop.permute.xlu0 %1014 }
 0x10f   : > { %v5239_v36 = vpop.f32.mrf.mxu0  ;;  %v5253_v32 = vpop.f32.mrf.mxu1  ;;  %6749 = vst [vmem:[#allocation49_spill] sm:$0xff] %v5293_v13 }
 0x110   : > { %2449 = vperm.xlu1 %4241, %v4047_v33   ;;  %2444 = vperm.xlu0 %4240, %v4046_v25   ;;  %v4139_v33 = vld [vmem:[%s6641_s4 + $0x378] sm:$0xff]  ;;  %v4138_v25 = vld [vmem:[%s6641_s4 + $0x370] sm:$0xff]  ;;  %v5265_v21 = vpop.permute.xlu1 %1039 }
 0x111   : > { %v5243_v19 = vpop.f32.mrf.mxu0  ;;  %v5263_v18 = vpop.f32.mrf.mxu1  ;;  %6745 = vst [vmem:[#allocation45_spill] sm:$0xff] %v5265_v21 }
 0x112   : > { %6744 = vst [vmem:[#allocation44_spill] sm:$0xff] %v5263_v18 }
 0x113   : > { %v739_v56 = vpop.f32.mrf.mxu0  ;;  %v5273_v37 = vpop.f32.mrf.mxu1 }
 0x114   : > { %2439 = vperm.xlu1 %4241, %v4045_v47   ;;  %2434 = vperm.xlu0 %4240, %v4044_v20   ;;  %v4137_v20 = vld [vmem:[%s6641_s4 + $0x368] sm:$0xff]  ;;  %6746 = vst [vmem:[#allocation46_spill] sm:$0xff] %v5273_v37  ;;  %v5283_v21 = vpop.permute.xlu1 %1029 }
 0x115   : > { %v743_v43 = vpop.f32.mrf.mxu0  ;;  %6748 = vst [vmem:[#allocation48_spill] sm:$0xff] %v5283_v21  ;;  %v5285_v14 = vpop.f32.mrf.mxu1 }
 0x117   : > { %v745_v63 = vpop.f32.mrf.mxu0  ;;  %v5298_v49 = vpop.f32.mrf.mxu1 }
 0x118   : > { %3104 = vperm.xlu1 %4241, %v4139_v33   ;;  %3099 = vperm.xlu0 %4240, %v4138_v25   ;;  %v4135_v33 = vld [vmem:[%s6641_s4 + $0x358] sm:$0xff]  ;;  %v4134_v25 = vld [vmem:[%s6641_s4 + $0x350] sm:$0xff]  ;;  %v5301_v8 = vpop.permute.xlu1 %1019  ;;  %v746_v16 = vadd.f32 %v745_v63, %v4892_v23 }
 0x119   : > { %v747_v47 = vpop.f32.mrf.mxu0  ;;  %6750 = vst [vmem:[#allocation50_spill] sm:$0xff] %v5301_v8 }
 0x11a   : > { %v748_v13 = vadd.f32 %v747_v47, %v4902_v27 }
 0x11b   : > { %v749_v59 = vpop.f32.mrf.mxu0 }
 0x11c   : > { %3094 = vperm.xlu1 %4241, %v4137_v20   ;;  %3089 = vperm.xlu0 %4240, %v4136_v17   ;;  %v4133_v17 = vld [vmem:[%s6641_s4 + $0x348] sm:$0xff]  ;;  %v4132_v20 = vld [vmem:[%s6641_s4 + $0x340] sm:$0xff]  ;;  %v750_v18 = vadd.f32 %v749_v59, %v4902_v27  ;;  %v736_v27 = vadd.f32 %v5239_v36, %v4912_v31  ;;  %v730_v36 = vadd.f32 %v5223_v0, %v4922_v35 }
 0x11d   : > { %v753_v10 = vpop.f32.mrf.mxu0  ;;  %v728_v0 = vadd.f32 %v5211_v39, %v4922_v35  ;;  %v724_v35 = vadd.f32 %v5195_v57, %v4920_v34  ;;  %v710_v57 = vadd.f32 %v5155_v40, %v4948_v45  ;;  %v708_v40 = vadd.f32 %v5146_v15, %v4948_v45 }
 0x11e   : > { %v704_v45 = vadd.f32 %v5129_v60, %v4940_v42 }
 0x11f   : > { %v755_v54 = vpop.f32.mrf.mxu0 }
 0x120   : > { %3084 = vperm.xlu1 %4241, %v4135_v33   ;;  %3079 = vperm.xlu0 %4240, %v4134_v25   ;;  %v756_v21 = vadd.f32 %v755_v54, %v4890_v22  ;;  %v754_v33 = vadd.f32 %v753_v10, %v4890_v22  ;;  %v4130_v22 = vld [vmem:[%s6641_s4 + $0x330] sm:$0xff]  ;;  %v740_v54 = vadd.f32 %v739_v56, %v4910_v30  ;;  %v869_v10 = vmax.f32 %v750_v18, 0.0 }
 0x121   : > { %v757_v11 = vpop.f32.mrf.mxu0  ;;  %v738_v56 = vadd.f32 %v5243_v19, %v4910_v30  ;;  %v868_v18 = vmax.f32 %v748_v13, 0.0  ;;  %v734_v30 = vadd.f32 %v5229_v9, %v4912_v31  ;;  %v4127_v31 = vld [vmem:[%s6641_s4 + $0x318] sm:$0xff]  ;;  %v720_v9 = vadd.f32 %v5189_v44, %v4938_v41 }
 0x122   : > { %v758_v28 = vadd.f32 %v757_v11, %v4900_v26  ;;  %v4131_v11 = vld [vmem:[%s6641_s4 + $0x338] sm:$0xff]  ;;  %v871_v8 = vmax.f32 %v756_v21, 0.0  ;;  %v716_v44 = vadd.f32 %v5173_v5, %v4930_v38  ;;  %v4124_v5 = vld [vmem:[%s6641_s4 + $0x300] sm:$0xff] }
 0x123   : > { %v759_v25 = vpop.f32.mrf.mxu0  ;;  %v862_v39 = vmax.f32 %v734_v30, 0.0 }
 0x124   : > { %v760_v37 = vadd.f32 %v759_v25, %v4900_v26  ;;  %3074 = vperm.xlu1 %4241, %v4133_v17   ;;  %3069 = vperm.xlu0 %4240, %v4132_v20   ;;  %v872_v59 = vmax.f32 %v758_v28, 0.0  ;;  %v744_v26 = vadd.f32 %v743_v43, %v4892_v23  ;;  %v5314_v17 = vpop.f32.mrf.mxu1  ;;  %v870_v20 = vmax.f32 %v754_v33, 0.0  ;;  %v5318_v25 = vpop.permute.xlu0 %1004  ;;  %v4129_v23 = vld [vmem:[%s6641_s4 + $0x328] sm:$0xff] }
 0x125   : > { %v867_v28 = vmax.f32 %v746_v16, 0.0  ;;  %v5325_v43 = vpop.permute.xlu1 %1009  ;;  %v865_v16 = vmax.f32 %v740_v54, 0.0  ;;  %v726_v33 = vadd.f32 %v5207_v3, %v4920_v34  ;;  %v861_v54 = vmax.f32 %v730_v36, 0.0  ;;  %v4126_v3 = vld [vmem:[%s6641_s4 + $0x310] sm:$0xff]  ;;  %v4125_v34 = vld [vmem:[%s6641_s4 + $0x308] sm:$0xff] }
 0x126   : > { %v873_v63 = vmax.f32 %v760_v37, 0.0  ;;  %v920_v21 = vpack.c.bf16 %v872_v59, %v870_v20  ;;  %v866_v13 = vmax.f32 %v744_v26, 0.0  ;;  %v5334_v19 = vpop.f32.mrf.mxu1  ;;  %v863_v59 = vmax.f32 %v736_v27, 0.0 }
 0x127   : > { %v919_v37 = vpack.c.bf16 %v869_v10, %v867_v28  ;;  %v859_v27 = vmax.f32 %v726_v33, 0.0  ;;  %v718_v28 = vadd.f32 %v5179_v29, %v4938_v41  ;;  %v858_v41 = vmax.f32 %v724_v35, 0.0 }
 0x128   : > { %3064 = vperm.xlu1 %4241, %v4131_v11   ;;  %3059 = vperm.xlu0 %4240, %v4130_v22   ;;  %v921_v47 = vpack.c.bf16 %v873_v63, %v871_v8  ;;  %v4128_v8 = vld [vmem:[%s6641_s4 + $0x320] sm:$0xff]  ;;  %v864_v11 = vmax.f32 %v738_v56, 0.0  ;;  %v918_v22 = vpack.c.bf16 %v868_v18, %v866_v13  ;;  %v917_v10 = vpack.c.bf16 %v865_v16, %v863_v59  ;;  %v5348_v63 = vpop.permute.xlu0 %1154  ;;  %v5352_v26 = vpop.f32.mrf.mxu1  ;;  %v4154_v59 = vld [vmem:[%s6641_s4 + $0x3f0] sm:$0xff] }
 0x129   : > { %v5354_v20 = vpop.permute.xlu1 %1159  ;;  %v857_v18 = vmax.f32 %v720_v9, 0.0  ;;  %v706_v36 = vadd.f32 %v5142_v12, %v4940_v42  ;;  %v855_v16 = vmax.f32 %v716_v44, 0.0  ;;  %v853_v12 = vmax.f32 %v710_v57, 0.0  ;;  %v4149_v57 = vld [vmem:[%s6641_s4 + $0x3c8] sm:$0xff] }
 0x12a   : > { %1322 = vmatprep.subr.bf16.mxu1 %v921_v47  ;;  %v860_v47 = vmax.f32 %v728_v0, 0.0  ;;  %v916_v56 = vpack.c.bf16 %v864_v11, %v862_v39  ;;  %v835_v29 = vpop.f32.mrf.mxu1  ;;  %v696_v11 = vadd.f32 %v5112_v24, %v4956_v48  ;;  %v690_v9 = vadd.f32 %v5097_v2, %v4974_v55  ;;  %v4151_v2 = vld [vmem:[%s6641_s4 + $0x3d8] sm:$0xff] }
 0x12b   : > { %1323 = vmatpush1.bf16.msra.mxu1 %v920_v21  ;;  %v915_v21 = vpack.c.bf16 %v861_v54, %v859_v27  ;;  %v913_v33 = vpack.c.bf16 %v857_v18, %v855_v16  ;;  %v4152_v54 = vld [vmem:[%s6641_s4 + $0x3e0] sm:$0xff]  ;;  %v850_v48 = vmax.f32 %v704_v45, 0.0  ;;  %v828_v16 = vadd.f32 %v5314_v17, %v5000_v1 }
 0x12c   : > { %1324 = vmatprep.subr.bf16.mxu1 %v919_v37  ;;  %3054 = vperm.xlu1 %4241, %v4129_v23   ;;  %v714_v23 = vadd.f32 %v5159_v50, %v4930_v38  ;;  %v5372_v37 = vpop.permute.xlu0 %1144  ;;  %v914_v30 = vpack.c.bf16 %v860_v47, %v858_v41  ;;  %v4155_v38 = vld [vmem:[%s6641_s4 + $0x3f8] sm:$0xff]  ;;  %v700_v50 = vadd.f32 %v5125_v53, %v4964_v51  ;;  %v837_v0 = vpop.f32.mrf.mxu1  ;;  %v852_v51 = vmax.f32 %v708_v40, 0.0  ;;  %v4150_v47 = vld [vmem:[%s6641_s4 + $0x3d0] sm:$0xff] }
 0x12d   : > { %3049 = vperm.xlu0 %4240, %v4128_v8   ;;  %v856_v8 = vmax.f32 %v718_v28, 0.0  ;;  %v5381_v13 = vpop.permute.xlu1 %1149  ;;  %v847_v35 = vmax.f32 %v696_v11, 0.0  ;;  %v845_v44 = vmax.f32 %v690_v9, 0.0  ;;  %v6762_v9 = vld [vmem:[#allocation38_spill] sm:$0xff] }
 0x12e   : > { %v854_v15 = vmax.f32 %v714_v23, 0.0  ;;  %v849_v42 = vmax.f32 %v700_v50, 0.0  ;;  %v910_v55 = vpack.c.bf16 %v852_v51, %v850_v48  ;;  %v6757_v50 = vld [vmem:[#allocation6_spill] sm:$0xff] }
 0x12f   : > { %1325 = vmatpush1.bf16.msra.mxu1 %v918_v22  ;;  %v851_v22 = vmax.f32 %v706_v36, 0.0 }
 0x130   : > { %1326 = vmatprep.subr.bf16.mxu1 %v917_v10  ;;  %3044 = vperm.xlu1 %4241, %v4127_v31   ;;  %v912_v53 = vpack.c.bf16 %v856_v8, %v854_v15  ;;  %v4153_v31 = vld [vmem:[%s6641_s4 + $0x3e8] sm:$0xff]  ;;  %v5398_v24 = vpop.permute.xlu0 %1134  ;;  %v839_v10 = vpop.f32.mrf.mxu1  ;;  %v909_v28 = vpack.c.bf16 %v849_v42, %v847_v35  ;;  %v6760_v15 = vld [vmem:[#allocation44_spill] sm:$0xff]  ;;  %v6765_v35 = vld [vmem:[#allocation33_spill] sm:$0xff] }
 0x131   : > { %3039 = vperm.xlu0 %4240, %v4126_v3   ;;  %v911_v60 = vpack.c.bf16 %v853_v12, %v851_v22  ;;  %v686_v3 = vadd.f32 %v5079_v46, %v4966_v52  ;;  %v5402_v39 = vpop.permute.xlu1 %1139  ;;  %v840_v27 = vadd.f32 %v839_v10, %v4990_v61  ;;  %v836_v46 = vadd.f32 %v835_v29, %v4982_v58  ;;  %v4148_v29 = vld [vmem:[%s6641_s4 + $0x3c0] sm:$0xff]  ;;  %v6758_v12 = vld [vmem:[#allocation35_spill] sm:$0xff]  ;;  %v6764_v10 = vld [vmem:[#allocation28_spill] sm:$0xff] }
 0x132   : > { %v900_v22 = vmax.f32 %v828_v16, 0.0  ;;  %v6773_v16 = vld [vmem:[#allocation25_spill] sm:$0xff] }
 0x133   : > { %1327 = vmatpush1.bf16.msra.mxu1 %v916_v56  ;;  %v843_v52 = vmax.f32 %v686_v3, 0.0  ;;  %v905_v23 = vmax.f32 %v840_v27, 0.0  ;;  %v903_v36 = vmax.f32 %v836_v46, 0.0  ;;  %v4143_v46 = vld [vmem:[%s6641_s4 + $0x398] sm:$0xff] }
 0x134   : > { %1328 = vmatprep.subr.bf16.mxu1 %v915_v21  ;;  %3034 = vperm.xlu1 %4241, %v4125_v34   ;;  %v5412_v56 = vpop.permute.xlu0 %1124  ;;  %v838_v34 = vadd.f32 %v837_v0, %v4990_v61  ;;  %v826_v21 = vadd.f32 %v5298_v49, %v4992_v62  ;;  %v834_v61 = vadd.f32 %v5352_v26, %v4982_v58  ;;  %v4147_v58 = vld [vmem:[%s6641_s4 + $0x3b8] sm:$0xff] }
 0x135   : > { %3029 = vperm.xlu0 %4240, %v4124_v5   ;;  %6751 = vst [vmem:[#allocation51_spill] sm:$0xff] %v5412_v56  ;;  %v5418_v18 = vpop.permute.xlu1 %1129  ;;  %v830_v5 = vadd.f32 %v5334_v19, %v5000_v1  ;;  %v907_v41 = vpack.c.bf16 %v845_v44, %v843_v52  ;;  %v816_v49 = vadd.f32 %v5253_v32, %v5008_v4  ;;  %v4146_v32 = vld [vmem:[%s6641_s4 + $0x3b0] sm:$0xff]  ;;  %v6755_v1 = vld [vmem:[#allocation18_spill] sm:$0xff] }
 0x136   : > { %6752 = vst [vmem:[#allocation52_spill] sm:$0xff] %v5418_v18  ;;  %v824_v19 = vadd.f32 %v5285_v14, %v4992_v62  ;;  %v904_v40 = vmax.f32 %v838_v34, 0.0  ;;  %v899_v8 = vmax.f32 %v826_v21, 0.0  ;;  %v902_v14 = vmax.f32 %v834_v61, 0.0  ;;  %v6767_v44 = vld [vmem:[#allocation36_spill] sm:$0xff]  ;;  %v6768_v34 = vld [vmem:[#allocation9_spill] sm:$0xff] }
 0x137   : > { %1329 = vmatpush1.bf16.msra.mxu1 %v914_v30  ;;  %v901_v30 = vmax.f32 %v830_v5, 0.0  ;;  %v818_v0 = vadd.f32 %v6760_v15, %v5016_v7  ;;  %v4142_v61 = vld [vmem:[%s6641_s4 + $0x390] sm:$0xff] }
 0x138   : > { %1330 = vmatprep.subr.bf16.mxu1 %v913_v33  ;;  %3184 = vperm.xlu1 %4241, %v4155_v38   ;;  %v937_v38 = vpack.c.bf16 %v905_v23, %v903_v36  ;;  %v5444_v62 = vpop.permute.xlu0 %1114  ;;  %v806_v33 = vadd.f32 %v6758_v12, %v6757_v50  ;;  %v898_v11 = vmax.f32 %v824_v19, 0.0  ;;  %v936_v51 = vpack.c.bf16 %v904_v40, %v902_v14  ;;  %v6771_v36 = vld [vmem:[#allocation10_spill] sm:$0xff]  ;;  %v6776_v14 = vld [vmem:[#allocation24_spill] sm:$0xff] }
 0x139   : > { %3179 = vperm.xlu0 %4240, %v4154_v59   ;;  %v5447_v17 = vpop.permute.xlu1 %1119  ;;  %v6759_v59 = vld [vmem:[#allocation40_spill] sm:$0xff]  ;;  %v935_v48 = vpack.c.bf16 %v901_v30, %v899_v8 }
 0x13a   : > { %6756 = vst [vmem:[#allocation18_spill] sm:$0xff] %v5447_v17  ;;  %v814_v45 = vadd.f32 %v6759_v59, %v5008_v4  ;;  %v4144_v4 = vld [vmem:[%s6641_s4 + $0x3a0] sm:$0xff]  ;;  %v934_v52 = vpack.c.bf16 %v900_v22, %v898_v11  ;;  %v891_v5 = vmax.f32 %v806_v33, 0.0  ;;  %v6778_v11 = vld [vmem:[#allocation20_spill] sm:$0xff] }
 0x13b   : > { %1331 = vmatpush1.bf16.msra.mxu1 %v912_v53  ;;  %v4145_v53 = vld [vmem:[%s6641_s4 + $0x3a8] sm:$0xff]  ;;  %v4140_v59 = vld [vmem:[%s6641_s4 + $0x380] sm:$0xff] }
 0x13c   : > { %1332 = vmatprep.subr.bf16.mxu1 %v911_v60  ;;  %3174 = vperm.xlu1 %4241, %v4153_v31   ;;  %v6761_v31 = vld [vmem:[#allocation7_spill] sm:$0xff]  ;;  %v895_v60 = vmax.f32 %v816_v49, 0.0  ;;  %v6795_v17 = vld [vmem:[#allocation37_spill] sm:$0xff] }
 0x13d   : > { %3169 = vperm.xlu0 %4240, %v4152_v54   ;;  %v810_v42 = vadd.f32 %v6762_v9, %v6761_v31  ;;  %v808_v27 = vadd.f32 %v6767_v44, %v6761_v31  ;;  %v5476_v23 = vpop.permute.xlu1 %1109  ;;  %v6772_v49 = vld [vmem:[#allocation23_spill] sm:$0xff]  ;;  %v6779_v9 = vld [vmem:[#allocation13_spill] sm:$0xff] }
 0x13e   : > { %6770 = vst [vmem:[#allocation35_spill] sm:$0xff] %v5476_v23  ;;  %v786_v19 = vadd.f32 %v6772_v49, %v6771_v36  ;;  %v4260_v36 = vld [vmem:[%s6640_s3] ss:$8 sps:$4 sm:$0xff]   ;;  %v6787_v49 = vld [vmem:[#allocation19_spill] sm:$0xff] }
 0x13f   : > { %1333 = vmatpush1.bf16.msra.mxu1 %v910_v55  ;;  %v804_v55 = vadd.f32 %v6765_v35, %v6757_v50  ;;  %v892_v8 = vmax.f32 %v808_v27, 0.0  ;;  %v6783_v27 = vld [vmem:[#allocation16_spill] sm:$0xff] }
 0x140   : > { %1334 = vmatprep.subr.bf16.mxu1 %v909_v28  ;;  %3164 = vperm.xlu1 %4241, %v4151_v2   ;;  %v5467_v2 = vpop.permute.xlu0 %1104  ;;  %v894_v28 = vmax.f32 %v814_v45, 0.0 }
 0x141   : > { %3159 = vperm.xlu0 %4240, %v4150_v47   ;;  %6766 = vst [vmem:[#allocation6_spill] sm:$0xff] %v5467_v2  ;;  %v896_v47 = vmax.f32 %v818_v0, 0.0  ;;  %v5497_v15 = vpop.permute.xlu1 %1099  ;;  %v6777_v0 = vld [vmem:[#allocation12_spill] sm:$0xff] }
 0x142   : > { %v776_v22 = vadd.f32 %v6778_v11, %v6777_v0  ;;  %v4287_v0 = vld [vmem:[%s6640_s3 + $0x94] ss:$8 sps:$4 sm:$0xff]   ;;  %v4289_v11 = vld [vmem:[%s6640_s3 + $0x90] ss:$8 sps:$4 sm:$0xff]  }
 0x143   : > { %1335 = vmatpush1.bf16.msra.mxu1 %v5137_v6  ;;  %v6753_v6 = vld [vmem:[#allocation46_spill] sm:$0xff]  ;;  %v932_v30 = vpack.c.bf16 %v896_v47, %v894_v28  ;;  %v6784_v28 = vld [vmem:[#allocation17_spill] sm:$0xff] }
 0x144   : > { %1336 = vmatprep.subr.bf16.mxu1 %v907_v41  ;;  %3154 = vperm.xlu1 %4241, %v4149_v57   ;;  %v820_v26 = vadd.f32 %v6753_v6, %v5016_v7  ;;  %6754 = vst [vmem:[#allocation46_spill] sm:$0xff] %v5444_v62  ;;  %v6763_v7 = vld [vmem:[#allocation8_spill] sm:$0xff]  ;;  %v6769_v57 = vld [vmem:[#allocation31_spill] sm:$0xff]  ;;  %v893_v41 = vmax.f32 %v810_v42, 0.0  ;;  %v5495_v45 = vpop.permute.xlu0 %1094  ;;  %v6780_v42 = vld [vmem:[#allocation21_spill] sm:$0xff]  ;;  %v770_v47 = vadd.f32 %v6784_v28, %v6783_v27 }
 0x145   : > { %3149 = vperm.xlu0 %4240, %v4148_v29   ;;  %v796_v3 = vadd.f32 %v6764_v10, %v6763_v7  ;;  %v800_v21 = vadd.f32 %v6769_v57, %v6768_v34  ;;  %v794_v40 = vadd.f32 %v6773_v16, %v6763_v7  ;;  %v3637_v7 = vld [vmem:[#allocation2] sm:$0x1]  ;;  %v6781_v10 = vld [vmem:[#allocation14_spill] sm:$0xff]  ;;  %v4265_v16 = vld [vmem:[%s6640_s3 + $0x10] ss:$8 sps:$4 sm:$0xff]  }
 0x146   : > { %v897_v54 = vmax.f32 %v820_v26, 0.0  ;;  %v890_v26 = vmax.f32 %v804_v55, 0.0  ;;  %v931_v33 = vpack.c.bf16 %v893_v41, %v891_v5  ;;  %v6785_v41 = vld [vmem:[#allocation27_spill] sm:$0xff] }
 0x147   : > { %1337 = vmatpush1.bf16.msra.mxu1 %v6755_v1  ;;  %v887_v50 = vmax.f32 %v796_v3, 0.0  ;;  %v889_v12 = vmax.f32 %v800_v21, 0.0  ;;  %v6782_v3 = vld [vmem:[#allocation15_spill] sm:$0xff]  ;;  %v877_v21 = vmax.f32 %v770_v47, 0.0 }
 0x148   : > { %1338 = vmatprep.subr.bf16.mxu1 %v937_v38  ;;  %3144 = vperm.xlu1 %4241, %v4147_v58   ;;  %v933_v29 = vpack.c.bf16 %v897_v54, %v895_v60  ;;  %v6774_v58 = vld [vmem:[#allocation30_spill] sm:$0xff]  ;;  %v930_v31 = vpack.c.bf16 %v892_v8, %v890_v26  ;;  %v780_v60 = vadd.f32 %v6780_v42, %v6779_v9  ;;  %v883_v54 = vmax.f32 %v786_v19, 0.0  ;;  %v5505_v44 = vpop.permute.xlu0 %1084  ;;  %v4263_v19 = vld [vmem:[%s6640_s3 + $0x14] ss:$8 sps:$4 sm:$0xff]   ;;  %v4271_v26 = vld [vmem:[%s6640_s3 + $0x30] ss:$8 sps:$4 sm:$0xff]  }
 0x149   : > { %3139 = vperm.xlu0 %4240, %v4146_v32   ;;  %v798_v6 = vadd.f32 %v6774_v58, %v6768_v34  ;;  %v4141_v38 = vld [vmem:[%s6641_s4 + $0x388] sm:$0xff]  ;;  %v766_v35 = vadd.f32 %v6782_v3, %v6781_v10  ;;  %v4307_v10 = vld [vmem:[%s6640_s3 + $0xf0] ss:$8 sps:$4 sm:$0xff]  }
 0x14a   : > { %v6775_v32 = vld [vmem:[#allocation11_spill] sm:$0xff]  ;;  %v4268_v58 = vld [vmem:[%s6640_s3 + $0x20] ss:$8 sps:$4 sm:$0xff]  }
 0x14b   : > { %1339 = vmatpush2.bf16.msra.mxu1 %v936_v51  ;;  %v790_v1 = vadd.f32 %v6776_v14, %v6775_v32  ;;  %v886_v51 = vmax.f32 %v794_v40, 0.0  ;;  %v875_v57 = vmax.f32 %v766_v35, 0.0  ;;  %v4266_v40 = vld [vmem:[%s6640_s3 + $0x24] ss:$8 sps:$4 sm:$0xff]   ;;  %v4277_v32 = vld [vmem:[%s6640_s3 + $0x50] ss:$8 sps:$4 sm:$0xff]  }
 0x14c   : > { %1340 = vmatprep.subr.bf16.mxu1 %v935_v48  ;;  %3134 = vperm.xlu1 %4241, %v4145_v53   ;;  %v888_v53 = vmax.f32 %v798_v6, 0.0  ;;  %v4269_v6 = vld [vmem:[%s6640_s3 + $0x34] ss:$8 sps:$4 sm:$0xff]   ;;  %v4272_v8 = vld [vmem:[%s6640_s3 + $0x44] ss:$8 sps:$4 sm:$0xff]  }
 0x14d   : > { %3129 = vperm.xlu0 %4240, %v4144_v4   ;;  %v885_v48 = vmax.f32 %v790_v1, 0.0  ;;  %v929_v4 = vpack.c.bf16 %v889_v12, %v887_v50  ;;  %v4278_v14 = vld [vmem:[%s6640_s3 + $0x64] ss:$8 sps:$4 sm:$0xff]   ;;  %v4280_v1 = vld [vmem:[%s6640_s3 + $0x60] ss:$8 sps:$4 sm:$0xff]  }
 0x14e   : > { %v928_v55 = vpack.c.bf16 %v888_v53, %v886_v51  ;;  %v4281_v50 = vld [vmem:[%s6640_s3 + $0x74] ss:$8 sps:$4 sm:$0xff]   ;;  %v4283_v12 = vld [vmem:[%s6640_s3 + $0x70] ss:$8 sps:$4 sm:$0xff]   ;;  %v4292_v51 = vld [vmem:[%s6640_s3 + $0xa0] ss:$8 sps:$4 sm:$0xff]  }
 0x14f   : > { %1341 = vmatpush2.bf16.msra.mxu1 %v934_v52  ;;  %v879_v52 = vmax.f32 %v776_v22, 0.0  ;;  %v927_v34 = vpack.c.bf16 %v885_v48, %v883_v54  ;;  %v4290_v22 = vld [vmem:[%s6640_s3 + $0xa4] ss:$8 sps:$4 sm:$0xff]   ;;  %v4293_v53 = vld [vmem:[%s6640_s3 + $0xb4] ss:$8 sps:$4 sm:$0xff]  }
 0x150   : > { %1342 = vmatprep.subr.bf16.mxu1 %v933_v29  ;;  %3124 = vperm.xlu1 %4241, %v4143_v46   ;;  %v881_v46 = vmax.f32 %v780_v60, 0.0  ;;  %v923_v29 = vpack.c.bf16 %v877_v21, %v875_v57  ;;  %v4296_v9 = vld [vmem:[%s6640_s3 + $0xc4] ss:$8 sps:$4 sm:$0xff]   ;;  %v4298_v42 = vld [vmem:[%s6640_s3 + $0xc0] ss:$8 sps:$4 sm:$0xff]  }
 0x151   : > { %3119 = vperm.xlu0 %4240, %v4142_v61   ;;  %v6786_v61 = vld [vmem:[#allocation22_spill] sm:$0xff]  ;;  %v4299_v60 = vld [vmem:[%s6640_s3 + $0xd4] ss:$8 sps:$4 sm:$0xff]   ;;  %v4301_v54 = vld [vmem:[%s6640_s3 + $0xd0] ss:$8 sps:$4 sm:$0xff]  }
 0x152   : > { %v925_v5 = vpack.c.bf16 %v881_v46, %v879_v52  ;;  %v4302_v48 = vld [vmem:[%s6640_s3 + $0xe4] ss:$8 sps:$4 sm:$0xff]  }
 0x153   : > { %1343 = vmatpush2.bf16.msra.mxu1 %v932_v30  ;;  %v4274_v30 = vld [vmem:[%s6640_s3 + $0x40] ss:$8 sps:$4 sm:$0xff]  }
 0x154   : > { %1344 = vmatprep.subr.bf16.mxu1 %v931_v33  ;;  %3114 = vperm.xlu1 %4241, %v4141_v38   ;;  %v4275_v38 = vld [vmem:[%s6640_s3 + $0x54] ss:$8 sps:$4 sm:$0xff]   ;;  %v4284_v33 = vld [vmem:[%s6640_s3 + $0x84] ss:$8 sps:$4 sm:$0xff]  }
 0x155   : > { %3109 = vperm.xlu0 %4240, %v4140_v59   ;;  %v4286_v59 = vld [vmem:[%s6640_s3 + $0x80] ss:$8 sps:$4 sm:$0xff]  }
 0x157   : > { %1345 = vmatpush2.bf16.msra.mxu1 %v930_v31  ;;  %v4295_v31 = vld [vmem:[%s6640_s3 + $0xb0] ss:$8 sps:$4 sm:$0xff]  }
 0x158   : > { %1346 = vmatprep.subr.bf16.mxu1 %v929_v4  ;;  %v4304_v4 = vld [vmem:[%s6640_s3 + $0xe0] ss:$8 sps:$4 sm:$0xff]  }
 0x159   : > { %3640 = vperm.xlu0 %4240, %v3637_v7   ;;  %v4305_v7 = vld [vmem:[%s6640_s3 + $0xf4] ss:$8 sps:$4 sm:$0xff]  }
 0x15b   : > { %1347 = vmatpush2.bf16.msra.mxu1 %v928_v55 }
 0x15c   : > { %1348 = vmatprep.subr.bf16.mxu1 %v927_v34 }
 0x15f   : > { %1349 = vmatpush2.bf16.msra.mxu1 %v6785_v41 }
 0x160   : > { %1350 = vmatprep.subr.bf16.mxu1 %v925_v5  ;;  %v6788_v5 = vld [vmem:[#allocation49_spill] sm:$0xff] }
 0x163   : > { %1351 = vmatpush2.bf16.msra.mxu1 %v6786_v61  ;;  %v6789_v61 = vld [vmem:[#allocation50_spill] sm:$0xff] }
 0x164   : > { %1352 = vmatprep.subr.bf16.mxu1 %v923_v29 }
 0x167   : > { %1353 = vmatpush2.bf16.msra.mxu1 %v6787_v49 }
 0x16a   : > { %1355 = vmatmul.mubr.bf16.vlgmr.msra.gmra.mxu1 %v4260_v36 }
 0x16b   : > { %1364 = vmatprep.mubr.bf16.mxu1 %v4263_v19 }
 0x172   : > { %1365 = vmatmul.mubr.bf16.gmra.mxu1 %v4265_v16 }
 0x173   : > { %1374 = vmatprep.mubr.bf16.mxu1 %v4266_v40 }
 0x17a   : > { %1375 = vmatmul.mubr.bf16.gmra.mxu1 %v4268_v58 }
 0x17b   : > { %1384 = vmatprep.mubr.bf16.mxu1 %v4269_v6 }
 0x182   : > { %1385 = vmatmul.mubr.bf16.gmra.mxu1 %v4271_v26 }
 0x183   : > { %1394 = vmatprep.mubr.bf16.mxu1 %v4272_v8 }
 0x18a   : > { %1395 = vmatmul.mubr.bf16.gmra.mxu1 %v4274_v30 }
 0x18b   : > { %1404 = vmatprep.mubr.bf16.mxu1 %v4275_v38 }
 0x192   : > { %1405 = vmatmul.mubr.bf16.gmra.mxu1 %v4277_v32 }
 0x193   : > { %1414 = vmatprep.mubr.bf16.mxu1 %v4278_v14 }
 0x19a   : > { %1415 = vmatmul.mubr.bf16.gmra.mxu1 %v4280_v1 }
 0x19b   : > { %1424 = vmatprep.mubr.bf16.mxu1 %v4281_v50 }
 0x1a2   : > { %1425 = vmatmul.mubr.bf16.gmra.mxu1 %v4283_v12  ;;  %v4310_v12 = vld [vmem:[%s6640_s3 + $0x104] ss:$8 sps:$4 sm:$0xff]  }
 0x1a3   : > { %1434 = vmatprep.mubr.bf16.mxu1 %v4284_v33  ;;  %2029 = vmatprep.mubr.bf16.mxu0 %v4310_v12 }
 0x1aa   : > { %1435 = vmatmul.mubr.bf16.gmra.mxu1 %v4286_v59 }
 0x1ab   : > { %1444 = vmatprep.mubr.bf16.mxu1 %v4287_v0 }
 0x1b2   : > { %1445 = vmatmul.mubr.bf16.gmra.mxu1 %v4289_v11 }
 0x1b3   : > { %1454 = vmatprep.mubr.bf16.mxu1 %v4290_v22 }
 0x1ba   : > { %1455 = vmatmul.mubr.bf16.gmra.mxu1 %v4292_v51 }
 0x1bb   : > { %1464 = vmatprep.mubr.bf16.mxu1 %v4293_v53 }
 0x1c2   : > { %1465 = vmatmul.mubr.bf16.gmra.mxu1 %v4295_v31 }
 0x1c3   : > { %1474 = vmatprep.mubr.bf16.mxu1 %v4296_v9 }
 0x1ca   : > { %1475 = vmatmul.mubr.bf16.gmra.mxu1 %v4298_v42 }
 0x1cb   : > { %1484 = vmatprep.mubr.bf16.mxu1 %v4299_v60 }
 0x1d2   : > { %1485 = vmatmul.mubr.bf16.gmra.mxu1 %v4301_v54 }
 0x1d3   : > { %1494 = vmatprep.mubr.bf16.mxu1 %v4302_v48 }
 0x1da   : > { %1495 = vmatmul.mubr.bf16.gmra.mxu1 %v4304_v4  ;;  %v6790_v4 = vld [vmem:[#allocation34_spill] sm:$0xff] }
 0x1db   : > { %1504 = vmatprep.mubr.bf16.mxu1 %v4305_v7 }
 0x1e2   : > { %1505 = vmatmul.mubr.bf16.gmra.mxu1 %v4307_v10  ;;  %v6791_v10 = vld [vmem:[#allocation26_spill] sm:$0xff] }
 0x22a   : > { %v1356_v3 = vpop.f32.mrf.mxu1 }
 0x22b   : > { %v1357_v55 = vadd.f32 %v1356_v3, %v5318_v25 }
 0x22c   : > { %v5605_v35 = vpop.f32.mrf.mxu1 }
 0x22d   : > { %v1515_v52 = vmax.f32 %v1357_v55, 0.0  ;;  %v6792_v55 = vld [vmem:[#allocation29_spill] sm:$0xff] }
 0x22e   : > { %v1360_v27 = vpop.f32.mrf.mxu1 }
 0x22f   : > { %v1361_v28 = vadd.f32 %v1360_v27, %v5325_v43 }
 0x230   : > { %v5609_v47 = vpop.f32.mrf.mxu1 }
 0x231   : > { %v1517_v46 = vmax.f32 %v1361_v28, 0.0 }
 0x232   : > { %v1366_v34 = vpop.f32.mrf.mxu1 }
 0x233   : > { %v5611_v57 = vpack.c.bf16 %v1517_v46, %v1515_v52  ;;  %v1367_v41 = vadd.f32 %v1366_v34, %v6788_v5  ;;  %v6793_v46 = vld [vmem:[#allocation32_spill] sm:$0xff] }
 0x234   : > { %v5613_v21 = vpop.f32.mrf.mxu1 }
 0x235   : > { %v1519_v19 = vmax.f32 %v1367_v41, 0.0 }
 0x236   : > { %v1370_v29 = vpop.f32.mrf.mxu1 }
 0x237   : > { %v1371_v36 = vadd.f32 %v1370_v29, %v6789_v61 }
 0x238   : > { %v5617_v49 = vpop.f32.mrf.mxu1 }
 0x239   : > { %v1521_v16 = vmax.f32 %v1371_v36, 0.0 }
 0x23a   : > { %v5619_v40 = vpop.f32.mrf.mxu1 }
 0x23b   : > { %v5621_v58 = vpack.c.bf16 %v1521_v16, %v1519_v19  ;;  %v6794_v16 = vld [vmem:[#allocation39_spill] sm:$0xff] }
 0x23c   : > { %v5623_v6 = vpop.f32.mrf.mxu1 }
 0x23e   : > { %v5625_v26 = vpop.f32.mrf.mxu1 }
 0x240   : > { %v5627_v8 = vpop.f32.mrf.mxu1 }
 0x242   : > { %v5629_v30 = vpop.f32.mrf.mxu1 }
 0x244   : > { %v5631_v38 = vpop.f32.mrf.mxu1 }
 0x246   : > { %v5633_v32 = vpop.f32.mrf.mxu1 }
 0x248   : > { %v1392_v14 = vpop.f32.mrf.mxu1 }
 0x24a   : > { %v5635_v1 = vpop.f32.mrf.mxu1 }
 0x24c   : > { %v1398_v50 = vpop.f32.mrf.mxu1 }
 0x24e   : > { %v1400_v33 = vpop.f32.mrf.mxu1 }
 0x250   : > { %v1402_v59 = vpop.f32.mrf.mxu1 }
 0x252   : > { %v1406_v0 = vpop.f32.mrf.mxu1 }
 0x254   : > { %v1408_v11 = vpop.f32.mrf.mxu1 }
 0x256   : > { %v1410_v22 = vpop.f32.mrf.mxu1 }
 0x258   : > { %v1412_v51 = vpop.f32.mrf.mxu1 }
 0x259   : > { %v1413_v12 = vadd.f32 %v1412_v51, %v6794_v16 }
 0x25a   : > { %v1416_v53 = vpop.f32.mrf.mxu1 }
 0x25c   : > { %v1418_v31 = vpop.f32.mrf.mxu1 }
 0x25d   : > { %v1419_v34 = vadd.f32 %v1418_v31, %v6793_v46 }
 0x25e   : > { %v1420_v9 = vpop.f32.mrf.mxu1 }
 0x25f   : > { %v1421_v29 = vadd.f32 %v1420_v9, %v6790_v4 }
 0x260   : > { %v1422_v42 = vpop.f32.mrf.mxu1 }
 0x261   : > { %v1423_v7 = vadd.f32 %v1422_v42, %v6790_v4  ;;  %v1411_v4 = vadd.f32 %v1410_v22, %v6794_v16 }
 0x262   : > { %v1426_v60 = vpop.f32.mrf.mxu1 }
 0x263   : > { %v1427_v28 = vadd.f32 %v1426_v60, %v6791_v10  ;;  %v1542_v2 = vmax.f32 %v1423_v7, 0.0  ;;  %v1409_v60 = vadd.f32 %v1408_v11, %v6795_v17 }
 0x264   : > { %v1428_v54 = vpop.f32.mrf.mxu1 }
 0x265   : > { %v1429_v3 = vadd.f32 %v1428_v54, %v6791_v10  ;;  %v1417_v54 = vadd.f32 %v1416_v53, %v6793_v46  ;;  %v1543_v62 = vmax.f32 %v1427_v28, 0.0  ;;  %v1540_v10 = vmax.f32 %v1419_v34, 0.0  ;;  %v6797_v46 = vld [vmem:[#allocation45_spill] sm:$0xff] }
 0x266   : > { %v1430_v48 = vpop.f32.mrf.mxu1  ;;  %v1393_v11 = vadd.f32 %v1392_v14, %v6797_v46  ;;  %v6798_v34 = vld [vmem:[#allocation41_spill] sm:$0xff] }
 0x267   : > { %v1431_v27 = vadd.f32 %v1430_v48, %v6792_v55  ;;  %v1544_v23 = vmax.f32 %v1429_v3, 0.0  ;;  %v1538_v3 = vmax.f32 %v1413_v12, 0.0 }
 0x268   : > { %v1432_v52 = vpop.f32.mrf.mxu1 }
 0x269   : > { %v1433_v41 = vadd.f32 %v1432_v52, %v6792_v55  ;;  %v1545_v36 = vmax.f32 %v1431_v27, 0.0  ;;  %v1090_v55 = vpop.permute.xlu1 %1089  ;;  %v6796_v52 = vld [vmem:[#allocation42_spill] sm:$0xff]  ;;  %v1541_v27 = vmax.f32 %v1421_v29, 0.0 }
 0x26a   : > { %v1436_v19 = vpop.f32.mrf.mxu1  ;;  %v1403_v9 = vadd.f32 %v1402_v59, %v6796_v52  ;;  %v1536_v59 = vmax.f32 %v1409_v60, 0.0  ;;  %v6799_v60 = vld [vmem:[#allocation43_spill] sm:$0xff] }
 0x26b   : > { %v1546_v42 = vmax.f32 %v1433_v41, 0.0  ;;  %v1437_v31 = vadd.f32 %v1436_v19, %v5505_v44  ;;  %v1593_v51 = vpack.c.bf16 %v1545_v36, %v1543_v62  ;;  %v1592_v41 = vpack.c.bf16 %v1542_v2, %v1540_v10 }
 0x26c   : > { %v1438_v48 = vpop.f32.mrf.mxu1  ;;  %v1407_v19 = vadd.f32 %v1406_v0, %v6795_v17  ;;  %v1401_v2 = vadd.f32 %v1400_v33, %v6796_v52  ;;  %v1534_v36 = vmax.f32 %v1403_v9, 0.0  ;;  %v1590_v12 = vpack.c.bf16 %v1538_v3, %v1536_v59 }
 0x26d   : > { %v1594_v56 = vpack.c.bf16 %v1546_v42, %v1544_v23  ;;  %v1439_v53 = vadd.f32 %v1438_v48, %v5505_v44  ;;  %v1399_v23 = vadd.f32 %v1398_v50, %v6798_v34  ;;  %v1539_v42 = vmax.f32 %v1417_v54, 0.0 }
 0x26e   : > { %v1440_v7 = vpop.f32.mrf.mxu1  ;;  %v1547_v22 = vmax.f32 %v1437_v31, 0.0  ;;  %v1537_v44 = vmax.f32 %v1411_v4, 0.0  ;;  %v1397_v17 = vadd.f32 %v5635_v1, %v6798_v34  ;;  %v1535_v0 = vmax.f32 %v1407_v19, 0.0 }
 0x26f   : > { %v1441_v28 = vadd.f32 %v1440_v7, %v1090_v55  ;;  %1997 = vmatprep.subr.bf16.mxu0 %v1594_v56  ;;  %v1591_v16 = vpack.c.bf16 %v1541_v27, %v1539_v42  ;;  %v1548_v14 = vmax.f32 %v1439_v53, 0.0  ;;  %v1532_v10 = vmax.f32 %v1399_v23, 0.0  ;;  %v6801_v53 = vld [vmem:[#allocation47_spill] sm:$0xff] }
 0x270   : > { %v1442_v18 = vpop.f32.mrf.mxu1  ;;  %1998 = vmatpush1.bf16.msra.mxu0 %v1593_v51  ;;  %v1391_v9 = vadd.f32 %v5633_v32, %v6797_v46  ;;  %v1533_v4 = vmax.f32 %v1401_v2, 0.0  ;;  %v1589_v1 = vpack.c.bf16 %v1537_v44, %v1535_v0  ;;  %v1530_v51 = vmax.f32 %v1393_v11, 0.0 }
 0x271   : > { %v1549_v29 = vmax.f32 %v1441_v28, 0.0  ;;  %v1443_v62 = vadd.f32 %v1442_v18, %v1090_v55  ;;  %1999 = vmatprep.subr.bf16.mxu0 %v1592_v41  ;;  %v1389_v18 = vadd.f32 %v5631_v38, %v6799_v60  ;;  %v6800_v55 = vld [vmem:[#allocation48_spill] sm:$0xff]  ;;  %v1588_v3 = vpack.c.bf16 %v1534_v36, %v1532_v10 }
 0x272   : > { %v1446_v56 = vpop.f32.mrf.mxu1  ;;  %v1383_v52 = vadd.f32 %v5627_v8, %v6800_v55  ;;  %v1373_v41 = vadd.f32 %v5617_v49, %v6789_v61  ;;  %v1379_v28 = vadd.f32 %v5623_v6, %v6801_v53  ;;  %v1387_v8 = vadd.f32 %v5629_v30, %v6799_v60 }
 0x273   : > { %v5658_v48 = vpack.c.bf16 %v1549_v29, %v1547_v22  ;;  %v1550_v50 = vmax.f32 %v1443_v62, 0.0  ;;  %v1447_v31 = vadd.f32 %v1446_v56, %v5495_v45  ;;  %v1531_v34 = vmax.f32 %v1397_v17, 0.0 }
 0x274   : > { %v1448_v54 = vpop.f32.mrf.mxu1  ;;  %2000 = vmatpush1.bf16.msra.mxu0 %v1591_v16  ;;  %v1528_v46 = vmax.f32 %v1389_v18, 0.0  ;;  %v1381_v19 = vadd.f32 %v5625_v26, %v6800_v55  ;;  %v1526_v42 = vmax.f32 %v1383_v52, 0.0  ;;  %v1529_v61 = vmax.f32 %v1391_v9, 0.0 }
 0x275   : > { %v5664_v33 = vpack.c.bf16 %v1550_v50, %v1548_v14  ;;  %2001 = vmatprep.subr.bf16.mxu0 %v1590_v12  ;;  %v1449_v7 = vadd.f32 %v1448_v54, %v5495_v45  ;;  %v1551_v23 = vmax.f32 %v1447_v31, 0.0  ;;  %v1587_v49 = vpack.c.bf16 %v1533_v4, %v1531_v34 }
 0x276   : > { %v1450_v27 = vpop.f32.mrf.mxu1  ;;  %v1586_v29 = vpack.c.bf16 %v1530_v51, %v1528_v46  ;;  %v1377_v62 = vadd.f32 %v5619_v40, %v6801_v53  ;;  %v1527_v2 = vmax.f32 %v1387_v8, 0.0  ;;  %v1524_v26 = vmax.f32 %v1379_v28, 0.0 }
 0x277   : > { %v1451_v38 = vadd.f32 %v1450_v27, %v5497_v15  ;;  %v1552_v6 = vmax.f32 %v1449_v7, 0.0  ;;  %v1525_v16 = vmax.f32 %v1381_v19, 0.0  ;;  %v1363_v14 = vadd.f32 %v5609_v47, %v5325_v43 }
 0x278   : > { %v1452_v32 = vpop.f32.mrf.mxu1  ;;  %2002 = vmatpush1.bf16.msra.mxu0 %v1589_v1  ;;  %v1585_v56 = vpack.c.bf16 %v1529_v61, %v1527_v2  ;;  %v1522_v50 = vmax.f32 %v1373_v41, 0.0  ;;  %v1584_v40 = vpack.c.bf16 %v1526_v42, %v1524_v26  ;;  %v1523_v17 = vmax.f32 %v1377_v62, 0.0 }
 0x279   : > { %v1553_v11 = vmax.f32 %v1451_v38, 0.0  ;;  %v1453_v45 = vadd.f32 %v1452_v32, %v5497_v15  ;;  %2003 = vmatprep.subr.bf16.mxu0 %v1588_v3  ;;  %v1369_v15 = vadd.f32 %v5613_v21, %v6788_v5  ;;  %v1359_v21 = vadd.f32 %v5605_v35, %v5318_v25 }
 0x27a   : > { %v5682_v59 = vpop.f32.mrf.mxu1  ;;  %v1583_v54 = vpack.c.bf16 %v1525_v16, %v1523_v17  ;;  %v1518_v18 = vmax.f32 %v1363_v14, 0.0 }
 0x27b   : > { %v5684_v22 = vpack.c.bf16 %v1553_v11, %v1551_v23  ;;  %v1554_v30 = vmax.f32 %v1453_v45, 0.0  ;;  %v1520_v5 = vmax.f32 %v1369_v15, 0.0  ;;  %v1516_v43 = vmax.f32 %v1359_v21, 0.0  ;;  %v6803_v21 = vld [vmem:[#allocation51_spill] sm:$0xff] }
 0x27c   : > { %v5688_v36 = vpop.f32.mrf.mxu1  ;;  %2004 = vmatpush1.bf16.msra.mxu0 %v1587_v49 }
 0x27d   : > { %v5692_v44 = vpack.c.bf16 %v1554_v30, %v1552_v6  ;;  %2005 = vmatprep.subr.bf16.mxu0 %v1586_v29  ;;  %v1582_v10 = vpack.c.bf16 %v1522_v50, %v1520_v5  ;;  %v1580_v55 = vpack.c.bf16 %v1518_v18, %v1516_v43 }
 0x27e   : > { %v5694_v12 = vpop.f32.mrf.mxu1 }
 0x280   : > { %v5698_v0 = vpop.f32.mrf.mxu1  ;;  %2006 = vmatpush1.bf16.msra.mxu0 %v1585_v56 }
 0x281   : > { %2007 = vmatprep.subr.bf16.mxu0 %v1584_v40 }
 0x282   : > { %v5702_v60 = vpop.f32.mrf.mxu1 }
 0x284   : > { %v5704_v31 = vpop.f32.mrf.mxu1  ;;  %2008 = vmatpush1.bf16.msra.mxu0 %v1583_v54 }
 0x285   : > { %2009 = vmatprep.subr.bf16.mxu0 %v1582_v10 }
 0x286   : > { %v5706_v47 = vpop.f32.mrf.mxu1 }
 0x288   : > { %v1472_v52 = vpop.f32.mrf.mxu1  ;;  %2010 = vmatpush1.bf16.msra.mxu0 %v5621_v58 }
 0x289   : > { %2011 = vmatprep.subr.bf16.mxu0 %v1580_v55 }
 0x28a   : > { %v1476_v25 = vpop.f32.mrf.mxu1 }
 0x28c   : > { %v1478_v35 = vpop.f32.mrf.mxu1  ;;  %2012 = vmatpush1.bf16.msra.mxu0 %v5611_v57 }
 0x28e   : > { %v1480_v9 = vpop.f32.mrf.mxu1 }
 0x290   : > { %v1482_v4 = vpop.f32.mrf.mxu1 }
 0x292   : > { %v1486_v1 = vpop.f32.mrf.mxu1 }
 0x293   : > { %v1487_v40 = vadd.f32 %v1486_v1, %v5398_v24 }
 0x294   : > { %v1488_v27 = vpop.f32.mrf.mxu1 }
 0x295   : > { %v1489_v2 = vadd.f32 %v1488_v27, %v5398_v24 }
 0x296   : > { %v1490_v51 = vpop.f32.mrf.mxu1 }
 0x297   : > { %v1491_v26 = vadd.f32 %v1490_v51, %v5402_v39  ;;  %v1568_v5 = vmax.f32 %v1489_v2, 0.0  ;;  %v1567_v51 = vmax.f32 %v1487_v40, 0.0  ;;  %v4328_v2 = vld [vmem:[%s6640_s3 + $0x160] ss:$8 sps:$4 sm:$0xff]   ;;  %v4343_v40 = vld [vmem:[%s6640_s3 + $0x1b0] ss:$8 sps:$4 sm:$0xff]  }
 0x298   : > { %v1492_v7 = vpop.f32.mrf.mxu1 }
 0x299   : > { %v1493_v61 = vadd.f32 %v1492_v7, %v5402_v39  ;;  %v1569_v18 = vmax.f32 %v1491_v26, 0.0  ;;  %v6804_v39 = vld [vmem:[#allocation18_spill] sm:$0xff] }
 0x29a   : > { %v1496_v38 = vpop.f32.mrf.mxu1  ;;  %v1473_v43 = vadd.f32 %v1472_v52, %v6804_v39  ;;  %v6805_v7 = vld [vmem:[#allocation46_spill] sm:$0xff] }
 0x29b   : > { %v1497_v29 = vadd.f32 %v1496_v38, %v5372_v37  ;;  %v1469_v24 = vadd.f32 %v5704_v31, %v6805_v7  ;;  %v4332_v26 = vld [vmem:[%s6640_s3 + $0x184] ss:$8 sps:$4 sm:$0xff]  }
 0x29c   : > { %v1498_v3 = vpop.f32.mrf.mxu1  ;;  %v1562_v52 = vmax.f32 %v1473_v43, 0.0  ;;  %v5838_v43 = vpop.permute.xlu0 %1749 }
 0x29d   : > { %v1499_v11 = vadd.f32 %v1498_v3, %v5372_v37  ;;  %v1571_v17 = vmax.f32 %v1497_v29, 0.0  ;;  %v1479_v37 = vadd.f32 %v1478_v35, %v6803_v21  ;;  %v1471_v35 = vadd.f32 %v5706_v47, %v6804_v39  ;;  %v6806_v3 = vld [vmem:[#allocation35_spill] sm:$0xff] }
 0x29e   : > { %v1500_v41 = vpop.f32.mrf.mxu1  ;;  %v1461_v47 = vadd.f32 %v5694_v12, %v6806_v3  ;;  %v4311_v12 = vld [vmem:[%s6640_s3 + $0x114] ss:$8 sps:$4 sm:$0xff]   ;;  %v4325_v29 = vld [vmem:[%s6640_s3 + $0x150] ss:$8 sps:$4 sm:$0xff]  }
 0x29f   : > { %v1501_v19 = vadd.f32 %v1500_v41, %v5381_v13  ;;  %v1572_v15 = vmax.f32 %v1499_v11, 0.0  ;;  %v1564_v1 = vmax.f32 %v1479_v37, 0.0  ;;  %v1463_v41 = vadd.f32 %v5698_v0, %v6806_v3  ;;  %v4347_v37 = vld [vmem:[%s6640_s3 + $0x1d4] ss:$8 sps:$4 sm:$0xff]   ;;  %v4355_v39 = vld [vmem:[%s6640_s3 + $0x1f0] ss:$8 sps:$4 sm:$0xff]  }
 0x2a0   : > { %v1502_v53 = vpop.f32.mrf.mxu1  ;;  %v1557_v11 = vmax.f32 %v1461_v47, 0.0 }
 0x2a1   : > { %v1503_v58 = vadd.f32 %v1502_v53, %v5381_v13  ;;  %v1573_v16 = vmax.f32 %v1501_v19, 0.0  ;;  %v1570_v13 = vmax.f32 %v1493_v61, 0.0  ;;  %v4319_v61 = vld [vmem:[%s6640_s3 + $0x130] ss:$8 sps:$4 sm:$0xff]  }
 0x2a2   : > { %v1506_v28 = vpop.f32.mrf.mxu1 }
 0x2a3   : > { %v1507_v57 = vadd.f32 %v1506_v28, %v5348_v63  ;;  %v1574_v49 = vmax.f32 %v1503_v58, 0.0  ;;  %v1607_v10 = vpack.c.bf16 %v1573_v16, %v1571_v17  ;;  %v1606_v27 = vpack.c.bf16 %v1570_v13, %v1568_v5  ;;  %v4334_v16 = vld [vmem:[%s6640_s3 + $0x180] ss:$8 sps:$4 sm:$0xff]   ;;  %v4344_v17 = vld [vmem:[%s6640_s3 + $0x1c4] ss:$8 sps:$4 sm:$0xff]  }
 0x2a4   : > { %v1508_v8 = vpop.f32.mrf.mxu1  ;;  %v1561_v58 = vmax.f32 %v1471_v35, 0.0  ;;  %v4340_v13 = vld [vmem:[%s6640_s3 + $0x1a0] ss:$8 sps:$4 sm:$0xff]   ;;  %v4349_v5 = vld [vmem:[%s6640_s3 + $0x1d0] ss:$8 sps:$4 sm:$0xff]  }
 0x2a5   : > { %v1509_v32 = vadd.f32 %v1508_v8, %v5348_v63  ;;  %v1575_v62 = vmax.f32 %v1507_v57, 0.0  ;;  %v1608_v50 = vpack.c.bf16 %v1574_v49, %v1572_v15  ;;  %v6807_v8 = vld [vmem:[#allocation6_spill] sm:$0xff]  ;;  %v4329_v15 = vld [vmem:[%s6640_s3 + $0x174] ss:$8 sps:$4 sm:$0xff]  }
 0x2a6   : > { %v1510_v34 = vpop.f32.mrf.mxu1  ;;  %v1459_v31 = vadd.f32 %v5688_v36, %v6807_v8  ;;  %v1457_v0 = vadd.f32 %v5682_v59, %v6807_v8  ;;  %v4308_v59 = vld [vmem:[%s6640_s3 + $0x100] ss:$8 sps:$4 sm:$0xff]   ;;  %v4320_v49 = vld [vmem:[%s6640_s3 + $0x144] ss:$8 sps:$4 sm:$0xff]  }
 0x2a7   : > { %v1511_v46 = vadd.f32 %v1510_v34, %v5354_v20  ;;  %v1576_v6 = vmax.f32 %v1509_v32, 0.0  ;;  %v1560_v34 = vmax.f32 %v1469_v24, 0.0 }
 0x2a8   : > { %v1512_v23 = vpop.f32.mrf.mxu1  ;;  %v1555_v36 = vmax.f32 %v1457_v0, 0.0 }
 0x2a9   : > { %v1513_v45 = vadd.f32 %v1512_v23, %v5354_v20  ;;  %v1577_v42 = vmax.f32 %v1511_v46, 0.0  ;;  %v6802_v20 = vld [vmem:[#allocation52_spill] sm:$0xff]  ;;  %v1558_v46 = vmax.f32 %v1463_v41, 0.0  ;;  %v1602_v57 = vpack.c.bf16 %v1562_v52, %v1560_v34 }
 0x2aa   : > { %v1483_v14 = vadd.f32 %v1482_v4, %v6802_v20  ;;  %v1481_v54 = vadd.f32 %v1480_v9, %v6802_v20  ;;  %v1477_v4 = vadd.f32 %v1476_v25, %v6803_v21  ;;  %v1605_v9 = vpack.c.bf16 %v1569_v18, %v1567_v51  ;;  %v4337_v20 = vld [vmem:[%s6640_s3 + $0x190] ss:$8 sps:$4 sm:$0xff]   ;;  %v4346_v21 = vld [vmem:[%s6640_s3 + $0x1c0] ss:$8 sps:$4 sm:$0xff]  }
 0x2ab   : > { %v1578_v30 = vmax.f32 %v1513_v45, 0.0  ;;  %v1609_v56 = vpack.c.bf16 %v1577_v42, %v1575_v62  ;;  %v1467_v25 = vadd.f32 %v5702_v60, %v6805_v7  ;;  %v1556_v60 = vmax.f32 %v1459_v31, 0.0  ;;  %v4326_v62 = vld [vmem:[%s6640_s3 + $0x164] ss:$8 sps:$4 sm:$0xff]   ;;  %v4352_v18 = vld [vmem:[%s6640_s3 + $0x1e0] ss:$8 sps:$4 sm:$0xff]  }
 0x2ac   : > { %v1566_v55 = vmax.f32 %v1483_v14, 0.0  ;;  %v1565_v38 = vmax.f32 %v1481_v54, 0.0  ;;  %v1563_v28 = vmax.f32 %v1477_v4, 0.0  ;;  %v1599_v42 = vpack.c.bf16 %v1557_v11, %v1555_v36  ;;  %v4338_v14 = vld [vmem:[%s6640_s3 + $0x1a4] ss:$8 sps:$4 sm:$0xff]  }
 0x2ad   : > { %v1610_v63 = vpack.c.bf16 %v1578_v30, %v1576_v6  ;;  %v1559_v23 = vmax.f32 %v1467_v25, 0.0  ;;  %v1600_v19 = vpack.c.bf16 %v1558_v46, %v1556_v60  ;;  %v4322_v6 = vld [vmem:[%s6640_s3 + $0x140] ss:$8 sps:$4 sm:$0xff]   ;;  %v4323_v30 = vld [vmem:[%s6640_s3 + $0x154] ss:$8 sps:$4 sm:$0xff]  }
 0x2ae   : > { %v1604_v53 = vpack.c.bf16 %v1566_v55, %v1564_v1  ;;  %v1603_v32 = vpack.c.bf16 %v1565_v38, %v1563_v28  ;;  %v4350_v54 = vld [vmem:[%s6640_s3 + $0x1e4] ss:$8 sps:$4 sm:$0xff]   ;;  %v5840_v55 = vpop.permute.xlu1 %1754 }
 0x2af   : > { %2013 = vmatprep.subr.bf16.mxu0 %v1610_v63  ;;  %v1601_v45 = vpack.c.bf16 %v1561_v58, %v1559_v23  ;;  %v4331_v63 = vld [vmem:[%s6640_s3 + $0x170] ss:$8 sps:$4 sm:$0xff]  }
 0x2b0   : > { %2014 = vmatpush2.bf16.msra.mxu0 %v1609_v56  ;;  %v4335_v56 = vld [vmem:[%s6640_s3 + $0x194] ss:$8 sps:$4 sm:$0xff]  }
 0x2b1   : > { %2015 = vmatprep.subr.bf16.mxu0 %v1608_v50  ;;  %v4341_v50 = vld [vmem:[%s6640_s3 + $0x1b4] ss:$8 sps:$4 sm:$0xff]  }
 0x2b2   : > { %v5844_v4 = vpop.permute.xlu1 %1744 }
 0x2b4   : > { %2016 = vmatpush2.bf16.msra.mxu0 %v1607_v10  ;;  %v4353_v10 = vld [vmem:[%s6640_s3 + $0x1f4] ss:$8 sps:$4 sm:$0xff]  }
 0x2b5   : > { %2017 = vmatprep.subr.bf16.mxu0 %v1606_v27  ;;  %v5842_v27 = vpop.permute.xlu0 %1739 }
 0x2b6   : > { %v5848_v7 = vpop.permute.xlu1 %1734 }
 0x2b8   : > { %2018 = vmatpush2.bf16.msra.mxu0 %v1605_v9 }
 0x2b9   : > { %2019 = vmatprep.subr.bf16.mxu0 %v1604_v53  ;;  %v5846_v51 = vpop.permute.xlu0 %1729 }
 0x2ba   : > { %v5852_v1 = vpop.permute.xlu1 %1724 }
 0x2bc   : > { %2020 = vmatpush2.bf16.msra.mxu0 %v1603_v32 }
 0x2bd   : > { %2021 = vmatprep.subr.bf16.mxu0 %v1602_v57  ;;  %v5850_v24 = vpop.permute.xlu0 %1719 }
 0x2be   : > { %v5856_v38 = vpop.permute.xlu1 %1714 }
 0x2c0   : > { %2022 = vmatpush2.bf16.msra.mxu0 %v1601_v45 }
 0x2c1   : > { %2023 = vmatprep.subr.bf16.mxu0 %v1600_v19  ;;  %v5854_v35 = vpop.permute.xlu0 %1709 }
 0x2c2   : > { %v5860_v3 = vpop.permute.xlu1 %1704 }
 0x2c4   : > { %2024 = vmatpush2.bf16.msra.mxu0 %v1599_v42 }
 0x2c5   : > { %2025 = vmatprep.subr.bf16.mxu0 %v5692_v44  ;;  %v4313_v44 = vld [vmem:[%s6640_s3 + $0x110] ss:$8 sps:$4 sm:$0xff]   ;;  %v5858_v9 = vpop.permute.xlu0 %1699 }
 0x2c6   : > { %v5864_v52 = vpop.permute.xlu1 %1694 }
 0x2c8   : > { %2026 = vmatpush2.bf16.msra.mxu0 %v5684_v22  ;;  %v4317_v22 = vld [vmem:[%s6640_s3 + $0x134] ss:$8 sps:$4 sm:$0xff]  }
 0x2c9   : > { %2027 = vmatprep.subr.bf16.mxu0 %v5664_v33  ;;  %v4314_v33 = vld [vmem:[%s6640_s3 + $0x124] ss:$8 sps:$4 sm:$0xff]   ;;  %v5862_v41 = vpop.permute.xlu0 %1689 }
 0x2ca   : > { %v5871_v31 = vpop.permute.xlu1 %1684 }
 0x2cc   : > { %2028 = vmatpush2.bf16.msra.mxu0 %v5658_v48  ;;  %v4316_v48 = vld [vmem:[%s6640_s3 + $0x120] ss:$8 sps:$4 sm:$0xff]  }
 0x2cd   : > { %v5866_v25 = vpop.permute.xlu0 %1679 }
 0x2cf   : > { %2030 = vmatmul.mubr.bf16.vlgmr.msra.gmra.mxu0 %v4308_v59 }
 0x2d0   : > { %2039 = vmatprep.mubr.bf16.mxu0 %v4311_v12 }
 0x2d7   : > { %2040 = vmatmul.mubr.bf16.gmra.mxu0 %v4313_v44 }
 0x2d8   : > { %2049 = vmatprep.mubr.bf16.mxu0 %v4314_v33 }
 0x2df   : > { %2050 = vmatmul.mubr.bf16.gmra.mxu0 %v4316_v48 }
 0x2e0   : > { %2059 = vmatprep.mubr.bf16.mxu0 %v4317_v22  ;;  %v5894_v22 = vpop.permute.xlu0 %1829 }
 0x2e1   : > { %6808 = vst [vmem:[#allocation40_spill] sm:$0xff] %v5894_v22 }
 0x2e7   : > { %2060 = vmatmul.mubr.bf16.gmra.mxu0 %v4319_v61 }
 0x2e8   : > { %2069 = vmatprep.mubr.bf16.mxu0 %v4320_v49  ;;  %v5898_v49 = vpop.permute.xlu1 %1834 }
 0x2e9   : > { %6809 = vst [vmem:[#allocation44_spill] sm:$0xff] %v5898_v49 }
 0x2ef   : > { %2070 = vmatmul.mubr.bf16.gmra.mxu0 %v4322_v6 }
 0x2f0   : > { %2079 = vmatprep.mubr.bf16.mxu0 %v4323_v30 }
 0x2f7   : > { %2080 = vmatmul.mubr.bf16.gmra.mxu0 %v4325_v29  ;;  %v5904_v29 = vpop.permute.xlu0 %1819 }
 0x2f8   : > { %2089 = vmatprep.mubr.bf16.mxu0 %v4326_v62  ;;  %6810 = vst [vmem:[#allocation7_spill] sm:$0xff] %v5904_v29 }
 0x2ff   : > { %2090 = vmatmul.mubr.bf16.gmra.mxu0 %v4328_v2  ;;  %v5906_v2 = vpop.permute.xlu1 %1824 }
 0x300   : > { %2099 = vmatprep.mubr.bf16.mxu0 %v4329_v15  ;;  %6811 = vst [vmem:[#allocation38_spill] sm:$0xff] %v5906_v2 }
 0x307   : > { %2100 = vmatmul.mubr.bf16.gmra.mxu0 %v4331_v63 }
 0x308   : > { %2109 = vmatprep.mubr.bf16.mxu0 %v4332_v26  ;;  %v4358_v26 = vld [vmem:[%s6640_s3 + $0x204] ss:$8 sps:$4 sm:$0xff]  }
 0x309   : > { %2704 = vmatprep.mubr.bf16.mxu1 %v4358_v26 }
 0x30f   : > { %2110 = vmatmul.mubr.bf16.gmra.mxu0 %v4334_v16  ;;  %v5913_v16 = vpop.permute.xlu0 %1809 }
 0x310   : > { %2119 = vmatprep.mubr.bf16.mxu0 %v4335_v56  ;;  %6812 = vst [vmem:[#allocation8_spill] sm:$0xff] %v5913_v16 }
 0x317   : > { %2120 = vmatmul.mubr.bf16.gmra.mxu0 %v4337_v20  ;;  %v5917_v20 = vpop.permute.xlu1 %1814 }
 0x318   : > { %2129 = vmatprep.mubr.bf16.mxu0 %v4338_v14  ;;  %6813 = vst [vmem:[#allocation28_spill] sm:$0xff] %v5917_v20 }
 0x31f   : > { %2130 = vmatmul.mubr.bf16.gmra.mxu0 %v4340_v13 }
 0x320   : > { %2139 = vmatprep.mubr.bf16.mxu0 %v4341_v50  ;;  %v5919_v50 = vpop.permute.xlu0 %1799 }
 0x321   : > { %6814 = vst [vmem:[#allocation33_spill] sm:$0xff] %v5919_v50 }
 0x327   : > { %2140 = vmatmul.mubr.bf16.gmra.mxu0 %v4343_v40 }
 0x328   : > { %2149 = vmatprep.mubr.bf16.mxu0 %v4344_v17  ;;  %v5921_v17 = vpop.permute.xlu1 %1804 }
 0x329   : > { %6815 = vst [vmem:[#allocation36_spill] sm:$0xff] %v5921_v17 }
 0x32f   : > { %2150 = vmatmul.mubr.bf16.gmra.mxu0 %v4346_v21 }
 0x330   : > { %2159 = vmatprep.mubr.bf16.mxu0 %v4347_v37 }
 0x337   : > { %2160 = vmatmul.mubr.bf16.gmra.mxu0 %v4349_v5  ;;  %v5923_v5 = vpop.permute.xlu0 %1789 }
 0x338   : > { %2169 = vmatprep.mubr.bf16.mxu0 %v4350_v54  ;;  %6816 = vst [vmem:[#allocation9_spill] sm:$0xff] %v5923_v5 }
 0x33f   : > { %2170 = vmatmul.mubr.bf16.gmra.mxu0 %v4352_v18  ;;  %v5925_v18 = vpop.permute.xlu1 %1794 }
 0x340   : > { %2179 = vmatprep.mubr.bf16.mxu0 %v4353_v10  ;;  %6817 = vst [vmem:[#allocation31_spill] sm:$0xff] %v5925_v18 }
 0x347   : > { %2180 = vmatmul.mubr.bf16.gmra.mxu0 %v4355_v39 }
 0x38f   : > { %v2031_v53 = vpop.f32.mrf.mxu0 }
 0x390   : > { %v2032_v8 = vadd.f32 %v2031_v53, %v5866_v25  ;;  %v5927_v53 = vpop.permute.xlu0 %1779 }
 0x391   : > { %v5868_v28 = vpop.f32.mrf.mxu0  ;;  %6818 = vst [vmem:[#allocation10_spill] sm:$0xff] %v5927_v53 }
 0x392   : > { %v2190_v32 = vmax.f32 %v2032_v8, 0.0 }
 0x393   : > { %v2035_v34 = vpop.f32.mrf.mxu0 }
 0x394   : > { %v2036_v47 = vadd.f32 %v2035_v34, %v5871_v31  ;;  %v5929_v34 = vpop.permute.xlu1 %1784 }
 0x395   : > { %v5874_v58 = vpop.f32.mrf.mxu0  ;;  %6819 = vst [vmem:[#allocation23_spill] sm:$0xff] %v5929_v34 }
 0x396   : > { %v2192_v46 = vmax.f32 %v2036_v47, 0.0 }
 0x397   : > { %v2041_v57 = vpop.f32.mrf.mxu0 }
 0x398   : > { %v5876_v0 = vpack.c.bf16 %v2192_v46, %v2190_v32  ;;  %v2042_v60 = vadd.f32 %v2041_v57, %v5862_v41  ;;  %v5931_v46 = vpop.permute.xlu0 %1769 }
 0x399   : > { %v5878_v23 = vpop.f32.mrf.mxu0 }
 0x39a   : > { %v2194_v36 = vmax.f32 %v2042_v60, 0.0 }
 0x39b   : > { %v2045_v11 = vpop.f32.mrf.mxu0 }
 0x39c   : > { %v2046_v45 = vadd.f32 %v2045_v11, %v5864_v52  ;;  %v1760_v20 = vpop.permute.xlu0 %1759 }
 0x39d   : > { %v5882_v19 = vpop.f32.mrf.mxu0 }
 0x39e   : > { %v2196_v42 = vmax.f32 %v2046_v45, 0.0 }
 0x39f   : > { %v5884_v59 = vpop.f32.mrf.mxu0 }
 0x3a0   : > { %v5886_v12 = vpack.c.bf16 %v2196_v42, %v2194_v36  ;;  %v5936_v36 = vpop.permute.xlu1 %1774 }
 0x3a1   : > { %v5888_v44 = vpop.f32.mrf.mxu0 }
 0x3a3   : > { %v5890_v33 = vpop.f32.mrf.mxu0 }
 0x3a5   : > { %v5892_v48 = vpop.f32.mrf.mxu0 }
 0x3a7   : > { %v5896_v61 = vpop.f32.mrf.mxu0 }
 0x3a9   : > { %v5900_v6 = vpop.f32.mrf.mxu0 }
 0x3ab   : > { %v5902_v30 = vpop.f32.mrf.mxu0 }
 0x3ad   : > { %v2067_v62 = vpop.f32.mrf.mxu0 }
 0x3af   : > { %v5908_v15 = vpop.f32.mrf.mxu0 }
 0x3b1   : > { %v2073_v63 = vpop.f32.mrf.mxu0 }
 0x3b3   : > { %v5915_v56 = vpop.f32.mrf.mxu0 }
 0x3b5   : > { %v2077_v14 = vpop.f32.mrf.mxu0 }
 0x3b7   : > { %v2081_v13 = vpop.f32.mrf.mxu0 }
 0x3b9   : > { %v2083_v40 = vpop.f32.mrf.mxu0 }
 0x3bb   : > { %v2085_v21 = vpop.f32.mrf.mxu0 }
 0x3bd   : > { %v2087_v37 = vpop.f32.mrf.mxu0 }
 0x3be   : > { %v2088_v17 = vadd.f32 %v2087_v37, %v5848_v7 }
 0x3bf   : > { %v2091_v54 = vpop.f32.mrf.mxu0 }
 0x3c1   : > { %v2093_v10 = vpop.f32.mrf.mxu0 }
 0x3c2   : > { %v2094_v53 = vadd.f32 %v2093_v10, %v5842_v27 }
 0x3c3   : > { %v2095_v39 = vpop.f32.mrf.mxu0 }
 0x3c4   : > { %v2096_v5 = vadd.f32 %v2095_v39, %v5844_v4  ;;  %v2086_v39 = vadd.f32 %v2085_v21, %v5848_v7 }
 0x3c5   : > { %v2097_v8 = vpop.f32.mrf.mxu0 }
 0x3c6   : > { %v2098_v60 = vadd.f32 %v2097_v8, %v5844_v4  ;;  %v2078_v4 = vadd.f32 %v2077_v14, %v5852_v1 }
 0x3c7   : > { %v2101_v47 = vpop.f32.mrf.mxu0 }
 0x3c8   : > { %v2102_v42 = vadd.f32 %v2101_v47, %v5838_v43  ;;  %v2217_v8 = vmax.f32 %v2098_v60, 0.0  ;;  %v2215_v47 = vmax.f32 %v2094_v53, 0.0 }
 0x3c9   : > { %v2103_v32 = vpop.f32.mrf.mxu0 }
 0x3ca   : > { %v2104_v11 = vadd.f32 %v2103_v32, %v5838_v43  ;;  %v2218_v29 = vmax.f32 %v2102_v42, 0.0  ;;  %v2084_v43 = vadd.f32 %v2083_v40, %v5846_v51  ;;  %v2074_v40 = vadd.f32 %v2073_v63, %v5850_v24 }
 0x3cb   : > { %v2105_v57 = vpop.f32.mrf.mxu0 }
 0x3cc   : > { %v2106_v45 = vadd.f32 %v2105_v57, %v5840_v55  ;;  %v2219_v16 = vmax.f32 %v2104_v11, 0.0  ;;  %v2092_v57 = vadd.f32 %v2091_v54, %v5842_v27  ;;  %v2213_v11 = vmax.f32 %v2088_v17, 0.0 }
 0x3cd   : > { %v2107_v26 = vpop.f32.mrf.mxu0  ;;  %v2068_v27 = vadd.f32 %v2067_v62, %v5856_v38  ;;  %v2211_v14 = vmax.f32 %v2084_v43, 0.0 }
 0x3ce   : > { %v2108_v34 = vadd.f32 %v2107_v26, %v5840_v55  ;;  %v2220_v18 = vmax.f32 %v2106_v45, 0.0  ;;  %v1765_v55 = vpop.permute.xlu1 %1764  ;;  %v2216_v45 = vmax.f32 %v2096_v5, 0.0 }
 0x3cf   : > { %v2111_v50 = vpop.f32.mrf.mxu0  ;;  %v2265_v62 = vpack.c.bf16 %v2213_v11, %v2211_v14 }
 0x3d0   : > { %v2221_v32 = vmax.f32 %v2108_v34, 0.0  ;;  %v2112_v22 = vadd.f32 %v2111_v50, %v1760_v20  ;;  %v2268_v37 = vpack.c.bf16 %v2220_v18, %v2218_v29  ;;  %v2267_v34 = vpack.c.bf16 %v2217_v8, %v2215_v47 }
 0x3d1   : > { %v2113_v49 = vpop.f32.mrf.mxu0  ;;  %v2214_v50 = vmax.f32 %v2092_v57, 0.0  ;;  %v2076_v29 = vadd.f32 %v5915_v56, %v5852_v1  ;;  %v2207_v8 = vmax.f32 %v2074_v40, 0.0  ;;  %v2066_v57 = vadd.f32 %v5902_v30, %v5856_v38 }
 0x3d2   : > { %v2269_v10 = vpack.c.bf16 %v2221_v32, %v2219_v16  ;;  %v2114_v26 = vadd.f32 %v2113_v49, %v1760_v20  ;;  %v2082_v16 = vadd.f32 %v2081_v13, %v5846_v51  ;;  %v2222_v53 = vmax.f32 %v2112_v22, 0.0 }
 0x3d3   : > { %v2115_v60 = vpop.f32.mrf.mxu0  ;;  %v2209_v49 = vmax.f32 %v2078_v4, 0.0  ;;  %v2212_v20 = vmax.f32 %v2086_v39, 0.0  ;;  %v2266_v17 = vpack.c.bf16 %v2216_v45, %v2214_v50  ;;  %v2072_v13 = vadd.f32 %v5908_v15, %v5850_v24 }
 0x3d4   : > { %v2116_v2 = vadd.f32 %v2115_v60, %v1765_v55  ;;  %2672 = vmatprep.subr.bf16.mxu1 %v2269_v10  ;;  %v2223_v18 = vmax.f32 %v2114_v26, 0.0  ;;  %v2210_v42 = vmax.f32 %v2082_v16, 0.0  ;;  %v2058_v32 = vadd.f32 %v5892_v48, %v5860_v3 }
 0x3d5   : > { %v2117_v54 = vpop.f32.mrf.mxu0  ;;  %2673 = vmatpush1.bf16.msra.mxu1 %v2268_v37  ;;  %v2208_v43 = vmax.f32 %v2076_v29, 0.0  ;;  %v2205_v47 = vmax.f32 %v2068_v27, 0.0  ;;  %v2263_v10 = vpack.c.bf16 %v2209_v49, %v2207_v8  ;;  %v2048_v4 = vadd.f32 %v5882_v19, %v5864_v52 }
 0x3d6   : > { %v2224_v7 = vmax.f32 %v2116_v2, 0.0  ;;  %v2118_v21 = vadd.f32 %v2117_v54, %v1765_v55  ;;  %2674 = vmatprep.subr.bf16.mxu1 %v2267_v34  ;;  %v2064_v2 = vadd.f32 %v5900_v6, %v5854_v35  ;;  %v2264_v24 = vpack.c.bf16 %v2212_v20, %v2210_v42 }
 0x3d7   : > { %v2121_v5 = vpop.f32.mrf.mxu0  ;;  %v2054_v39 = vadd.f32 %v5888_v44, %v5858_v9  ;;  %v2062_v48 = vadd.f32 %v5896_v61, %v5854_v35  ;;  %v2206_v45 = vmax.f32 %v2072_v13, 0.0  ;;  %v2201_v34 = vmax.f32 %v2058_v32, 0.0 }
 0x3d8   : > { %v5952_v63 = vpack.c.bf16 %v2224_v7, %v2222_v53  ;;  %v2225_v51 = vmax.f32 %v2118_v21, 0.0  ;;  %v2122_v56 = vadd.f32 %v2121_v5, %v5931_v46  ;;  %v2203_v30 = vmax.f32 %v2064_v2, 0.0 }
 0x3d9   : > { %v2123_v22 = vpop.f32.mrf.mxu0  ;;  %2675 = vmatpush1.bf16.msra.mxu1 %v2266_v17  ;;  %v2204_v52 = vmax.f32 %v2066_v57, 0.0  ;;  %v2262_v19 = vpack.c.bf16 %v2208_v43, %v2206_v45  ;;  %v2052_v40 = vadd.f32 %v5884_v59, %v5858_v9  ;;  %v2202_v16 = vmax.f32 %v2062_v48, 0.0 }
 0x3da   : > { %v5958_v1 = vpack.c.bf16 %v2225_v51, %v2223_v18  ;;  %2676 = vmatprep.subr.bf16.mxu1 %v2265_v62  ;;  %v2124_v55 = vadd.f32 %v2123_v22, %v5931_v46  ;;  %v2226_v37 = vmax.f32 %v2122_v56, 0.0  ;;  %v2056_v46 = vadd.f32 %v5890_v33, %v5860_v3 }
 0x3db   : > { %v2125_v15 = vpop.f32.mrf.mxu0  ;;  %v2261_v61 = vpack.c.bf16 %v2205_v47, %v2203_v30  ;;  %v2044_v3 = vadd.f32 %v5878_v23, %v5862_v41  ;;  %v2199_v33 = vmax.f32 %v2054_v39, 0.0  ;;  %v2260_v14 = vpack.c.bf16 %v2204_v52, %v2202_v16  ;;  %v6822_v39 = vld [vmem:[#allocation44_spill] sm:$0xff] }
 0x3dc   : > { %v2126_v6 = vadd.f32 %v2125_v15, %v5936_v36  ;;  %v2227_v44 = vmax.f32 %v2124_v55, 0.0  ;;  %v2200_v54 = vmax.f32 %v2056_v46, 0.0  ;;  %v2038_v7 = vadd.f32 %v5874_v58, %v5871_v31  ;;  %v6820_v55 = vld [vmem:[#allocation38_spill] sm:$0xff]  ;;  %v6824_v46 = vld [vmem:[#allocation28_spill] sm:$0xff] }
 0x3dd   : > { %v2127_v38 = vpop.f32.mrf.mxu0  ;;  %2677 = vmatpush1.bf16.msra.mxu1 %v2264_v24  ;;  %v2197_v21 = vmax.f32 %v2048_v4, 0.0  ;;  %v2259_v9 = vpack.c.bf16 %v2201_v34, %v2199_v33  ;;  %v2198_v59 = vmax.f32 %v2052_v40, 0.0  ;;  %v2034_v41 = vadd.f32 %v5868_v28, %v5866_v25  ;;  %v6825_v40 = vld [vmem:[#allocation8_spill] sm:$0xff] }
 0x3de   : > { %v2228_v60 = vmax.f32 %v2126_v6, 0.0  ;;  %v2128_v11 = vadd.f32 %v2127_v38, %v5936_v36  ;;  %2678 = vmatprep.subr.bf16.mxu1 %v2263_v10  ;;  %v2195_v23 = vmax.f32 %v2044_v3, 0.0  ;;  %v2193_v17 = vmax.f32 %v2038_v7, 0.0  ;;  %v6821_v6 = vld [vmem:[#allocation40_spill] sm:$0xff]  ;;  %v6823_v38 = vld [vmem:[#allocation7_spill] sm:$0xff] }
 0x3df   : > { %v5976_v26 = vpop.f32.mrf.mxu0  ;;  %v2258_v49 = vpack.c.bf16 %v2200_v54, %v2198_v59  ;;  %v2191_v31 = vmax.f32 %v2034_v41, 0.0 }
 0x3e0   : > { %v5978_v27 = vpack.c.bf16 %v2228_v60, %v2226_v37  ;;  %v2229_v35 = vmax.f32 %v2128_v11, 0.0  ;;  %v2257_v5 = vpack.c.bf16 %v2197_v21, %v2195_v23  ;;  %v6826_v21 = vld [vmem:[#allocation36_spill] sm:$0xff] }
 0x3e1   : > { %v5982_v50 = vpop.f32.mrf.mxu0  ;;  %2679 = vmatpush1.bf16.msra.mxu1 %v2262_v19  ;;  %v2255_v18 = vpack.c.bf16 %v2193_v17, %v2191_v31  ;;  %v6827_v17 = vld [vmem:[#allocation33_spill] sm:$0xff] }
 0x3e2   : > { %v5986_v36 = vpack.c.bf16 %v2229_v35, %v2227_v44  ;;  %2680 = vmatprep.subr.bf16.mxu1 %v2261_v61 }
 0x3e3   : > { %v5988_v53 = vpop.f32.mrf.mxu0 }
 0x3e5   : > { %v5992_v29 = vpop.f32.mrf.mxu0  ;;  %2681 = vmatpush1.bf16.msra.mxu1 %v2260_v14 }
 0x3e6   : > { %2682 = vmatprep.subr.bf16.mxu1 %v2259_v9 }
 0x3e7   : > { %v5996_v20 = vpop.f32.mrf.mxu0 }
 0x3e9   : > { %v5998_v62 = vpop.f32.mrf.mxu0  ;;  %2683 = vmatpush1.bf16.msra.mxu1 %v2258_v49 }
 0x3ea   : > { %2684 = vmatprep.subr.bf16.mxu1 %v2257_v5 }
 0x3eb   : > { %v6000_v58 = vpop.f32.mrf.mxu0 }
 0x3ed   : > { %v2147_v51 = vpop.f32.mrf.mxu0  ;;  %2685 = vmatpush1.bf16.msra.mxu1 %v5886_v12 }
 0x3ee   : > { %2686 = vmatprep.subr.bf16.mxu1 %v2255_v18 }
 0x3ef   : > { %v2151_v25 = vpop.f32.mrf.mxu0 }
 0x3f1   : > { %v2153_v28 = vpop.f32.mrf.mxu0  ;;  %2687 = vmatpush1.bf16.msra.mxu1 %v5876_v0 }
 0x3f2   : > { %v2154_v5 = vadd.f32 %v2153_v28, %v6827_v17 }
 0x3f3   : > { %v2155_v13 = vpop.f32.mrf.mxu0 }
 0x3f4   : > { %v2156_v18 = vadd.f32 %v2155_v13, %v6826_v21 }
 0x3f5   : > { %v2157_v42 = vpop.f32.mrf.mxu0 }
 0x3f6   : > { %v2158_v9 = vadd.f32 %v2157_v42, %v6826_v21  ;;  %v2152_v42 = vadd.f32 %v2151_v25, %v6827_v17  ;;  %v4383_v21 = vld [vmem:[%s6640_s3 + $0x290] ss:$8 sps:$4 sm:$0xff]   ;;  %v4392_v17 = vld [vmem:[%s6640_s3 + $0x2c0] ss:$8 sps:$4 sm:$0xff]  }
 0x3f7   : > { %v2161_v22 = vpop.f32.mrf.mxu0 }
 0x3f8   : > { %v2162_v23 = vadd.f32 %v2161_v22, %v6825_v40 }
 0x3f9   : > { %v2163_v2 = vpop.f32.mrf.mxu0 }
 0x3fa   : > { %v2164_v16 = vadd.f32 %v2163_v2, %v6825_v40  ;;  %v4376_v40 = vld [vmem:[%s6640_s3 + $0x264] ss:$8 sps:$4 sm:$0xff]  }
 0x3fb   : > { %v2165_v8 = vpop.f32.mrf.mxu0 }
 0x3fc   : > { %v2166_v54 = vadd.f32 %v2165_v8, %v6824_v46  ;;  %v2243_v31 = vmax.f32 %v2164_v16, 0.0  ;;  %v6828_v8 = vld [vmem:[#allocation31_spill] sm:$0xff]  ;;  %v4374_v16 = vld [vmem:[%s6640_s3 + $0x260] ss:$8 sps:$4 sm:$0xff]  }
 0x3fd   : > { %v2167_v56 = vpop.f32.mrf.mxu0  ;;  %v2146_v28 = vadd.f32 %v6000_v58, %v6828_v8 }
 0x3fe   : > { %v2168_v34 = vadd.f32 %v2167_v56, %v6824_v46  ;;  %v2244_v2 = vmax.f32 %v2166_v54, 0.0  ;;  %v4382_v54 = vld [vmem:[%s6640_s3 + $0x284] ss:$8 sps:$4 sm:$0xff]  }
 0x3ff   : > { %v2171_v32 = vpop.f32.mrf.mxu0 }
 0x400   : > { %v2172_v35 = vadd.f32 %v2171_v32, %v6823_v38  ;;  %v2245_v59 = vmax.f32 %v2168_v34, 0.0  ;;  %v2148_v32 = vadd.f32 %v2147_v51, %v6828_v8  ;;  %v4401_v8 = vld [vmem:[%s6640_s3 + $0x2f0] ss:$8 sps:$4 sm:$0xff]  }
 0x401   : > { %v2173_v57 = vpop.f32.mrf.mxu0 }
 0x402   : > { %v2174_v30 = vadd.f32 %v2173_v57, %v6823_v38  ;;  %v2246_v49 = vmax.f32 %v2172_v35, 0.0  ;;  %v2241_v57 = vmax.f32 %v2158_v9, 0.0  ;;  %v2237_v51 = vmax.f32 %v2148_v32, 0.0  ;;  %v4373_v35 = vld [vmem:[%s6640_s3 + $0x254] ss:$8 sps:$4 sm:$0xff]   ;;  %v6132_v32 = vpop.permute.xlu0 %2424 }
 0x403   : > { %v2175_v43 = vpop.f32.mrf.mxu0  ;;  %v4388_v9 = vld [vmem:[%s6640_s3 + $0x2a4] ss:$8 sps:$4 sm:$0xff]  }
 0x404   : > { %v2176_v60 = vadd.f32 %v2175_v43, %v6820_v55  ;;  %v2247_v3 = vmax.f32 %v2174_v30, 0.0  ;;  %v2281_v43 = vpack.c.bf16 %v2245_v59, %v2243_v31  ;;  %v4386_v59 = vld [vmem:[%s6640_s3 + $0x2a0] ss:$8 sps:$4 sm:$0xff]   ;;  %v4395_v31 = vld [vmem:[%s6640_s3 + $0x2d0] ss:$8 sps:$4 sm:$0xff]  }
 0x405   : > { %v2177_v24 = vpop.f32.mrf.mxu0 }
 0x406   : > { %v2178_v12 = vadd.f32 %v2177_v24, %v6820_v55  ;;  %v2248_v14 = vmax.f32 %v2176_v60, 0.0  ;;  %v2242_v24 = vmax.f32 %v2162_v23, 0.0  ;;  %v6830_v55 = vld [vmem:[#allocation23_spill] sm:$0xff] }
 0x407   : > { %v2181_v15 = vpop.f32.mrf.mxu0  ;;  %v2136_v58 = vadd.f32 %v5988_v53, %v6830_v55  ;;  %v4359_v53 = vld [vmem:[%s6640_s3 + $0x214] ss:$8 sps:$4 sm:$0xff]   ;;  %v4389_v23 = vld [vmem:[%s6640_s3 + $0x2b0] ss:$8 sps:$4 sm:$0xff]  }
 0x408   : > { %v2182_v0 = vadd.f32 %v2181_v15, %v6821_v6  ;;  %v2249_v52 = vmax.f32 %v2178_v12, 0.0  ;;  %v2282_v56 = vpack.c.bf16 %v2248_v14, %v2246_v49  ;;  %v6829_v15 = vld [vmem:[#allocation9_spill] sm:$0xff]  ;;  %v2280_v13 = vpack.c.bf16 %v2244_v2, %v2242_v24 }
 0x409   : > { %v2183_v47 = vpop.f32.mrf.mxu0  ;;  %v2144_v22 = vadd.f32 %v5998_v62, %v6829_v15  ;;  %v2138_v12 = vadd.f32 %v5992_v29, %v6830_v55  ;;  %v2142_v25 = vadd.f32 %v5996_v20, %v6829_v15  ;;  %v2232_v60 = vmax.f32 %v2136_v58, 0.0  ;;  %v4380_v14 = vld [vmem:[%s6640_s3 + $0x280] ss:$8 sps:$4 sm:$0xff]   ;;  %v4394_v49 = vld [vmem:[%s6640_s3 + $0x2c4] ss:$8 sps:$4 sm:$0xff]  }
 0x40a   : > { %v2184_v4 = vadd.f32 %v2183_v47, %v6821_v6  ;;  %v2250_v61 = vmax.f32 %v2182_v0, 0.0  ;;  %v2283_v41 = vpack.c.bf16 %v2249_v52, %v2247_v3  ;;  %v2239_v47 = vmax.f32 %v2154_v5, 0.0  ;;  %v4367_v52 = vld [vmem:[%s6640_s3 + $0x230] ss:$8 sps:$4 sm:$0xff]   ;;  %v4379_v3 = vld [vmem:[%s6640_s3 + $0x274] ss:$8 sps:$4 sm:$0xff]  }
 0x40b   : > { %v2185_v10 = vpop.f32.mrf.mxu0  ;;  %v2236_v0 = vmax.f32 %v2146_v28, 0.0  ;;  %v2233_v38 = vmax.f32 %v2138_v12, 0.0  ;;  %v4397_v5 = vld [vmem:[%s6640_s3 + $0x2d4] ss:$8 sps:$4 sm:$0xff]   ;;  %v4398_v2 = vld [vmem:[%s6640_s3 + $0x2e0] ss:$8 sps:$4 sm:$0xff]  }
 0x40c   : > { %v2186_v48 = vadd.f32 %v2185_v10, %v6822_v39  ;;  %v2251_v19 = vmax.f32 %v2184_v4, 0.0  ;;  %v2240_v10 = vmax.f32 %v2156_v18, 0.0  ;;  %v2279_v6 = vpack.c.bf16 %v2241_v57, %v2239_v47  ;;  %v4400_v18 = vld [vmem:[%s6640_s3 + $0x2e4] ss:$8 sps:$4 sm:$0xff]   ;;  %v6134_v57 = vpop.permute.xlu1 %2429 }
 0x40d   : > { %v2187_v45 = vpop.f32.mrf.mxu0  ;;  %v2238_v4 = vmax.f32 %v2152_v42, 0.0 }
 0x40e   : > { %v2188_v37 = vadd.f32 %v2187_v45, %v6822_v39  ;;  %v2252_v11 = vmax.f32 %v2186_v48, 0.0  ;;  %v6831_v39 = vld [vmem:[#allocation10_spill] sm:$0xff]  ;;  %v2235_v48 = vmax.f32 %v2144_v22, 0.0 }
 0x40f   : > { %v2134_v62 = vadd.f32 %v5982_v50, %v6831_v39  ;;  %v2278_v45 = vpack.c.bf16 %v2240_v10, %v2238_v4  ;;  %v2132_v29 = vadd.f32 %v5976_v26, %v6831_v39  ;;  %v4356_v26 = vld [vmem:[%s6640_s3 + $0x200] ss:$8 sps:$4 sm:$0xff]  }
 0x410   : > { %v2253_v44 = vmax.f32 %v2188_v37, 0.0  ;;  %v2284_v7 = vpack.c.bf16 %v2252_v11, %v2250_v61  ;;  %v2277_v30 = vpack.c.bf16 %v2237_v51, %v2235_v48  ;;  %v2234_v37 = vmax.f32 %v2142_v25, 0.0  ;;  %v4371_v61 = vld [vmem:[%s6640_s3 + $0x250] ss:$8 sps:$4 sm:$0xff]   ;;  %v6138_v42 = vpop.permute.xlu1 %2419 }
 0x411   : > { %v2231_v20 = vmax.f32 %v2134_v62, 0.0  ;;  %v2230_v50 = vmax.f32 %v2132_v29, 0.0 }
 0x412   : > { %v2285_v33 = vpack.c.bf16 %v2253_v44, %v2251_v19  ;;  %v2276_v11 = vpack.c.bf16 %v2236_v0, %v2234_v37  ;;  %v4370_v19 = vld [vmem:[%s6640_s3 + $0x244] ss:$8 sps:$4 sm:$0xff]   ;;  %v4368_v44 = vld [vmem:[%s6640_s3 + $0x240] ss:$8 sps:$4 sm:$0xff]  }
 0x413   : > { %v2275_v46 = vpack.c.bf16 %v2233_v38, %v2231_v20  ;;  %v2274_v34 = vpack.c.bf16 %v2232_v60, %v2230_v50 }
 0x414   : > { %2688 = vmatprep.subr.bf16.mxu1 %v2285_v33  ;;  %v4377_v33 = vld [vmem:[%s6640_s3 + $0x270] ss:$8 sps:$4 sm:$0xff]   ;;  %v6142_v15 = vpop.permute.xlu1 %2409 }
 0x415   : > { %2689 = vmatpush2.bf16.msra.mxu1 %v2284_v7  ;;  %v4385_v7 = vld [vmem:[%s6640_s3 + $0x294] ss:$8 sps:$4 sm:$0xff]  }
 0x416   : > { %2690 = vmatprep.subr.bf16.mxu1 %v2283_v41  ;;  %v4391_v41 = vld [vmem:[%s6640_s3 + $0x2b4] ss:$8 sps:$4 sm:$0xff]  }
 0x418   : > { %v6146_v47 = vpop.permute.xlu1 %2399 }
 0x419   : > { %2691 = vmatpush2.bf16.msra.mxu1 %v2282_v56  ;;  %v4403_v56 = vld [vmem:[%s6640_s3 + $0x2f4] ss:$8 sps:$4 sm:$0xff]  }
 0x41a   : > { %2692 = vmatprep.subr.bf16.mxu1 %v2281_v43  ;;  %v6136_v43 = vpop.permute.xlu0 %2414 }
 0x41c   : > { %v6150_v10 = vpop.permute.xlu1 %2389 }
 0x41d   : > { %2693 = vmatpush2.bf16.msra.mxu1 %v2280_v13 }
 0x41e   : > { %2694 = vmatprep.subr.bf16.mxu1 %v2279_v6  ;;  %v6140_v24 = vpop.permute.xlu0 %2404 }
 0x420   : > { %v6154_v55 = vpop.permute.xlu1 %2379 }
 0x421   : > { %2695 = vmatpush2.bf16.msra.mxu1 %v2278_v45 }
 0x422   : > { %2696 = vmatprep.subr.bf16.mxu1 %v2277_v30  ;;  %v6144_v22 = vpop.permute.xlu0 %2394 }
 0x424   : > { %v2370_v51 = vpop.permute.xlu1 %2369 }
 0x425   : > { %2697 = vmatpush2.bf16.msra.mxu1 %v2276_v11 }
 0x426   : > { %2698 = vmatprep.subr.bf16.mxu1 %v2275_v46  ;;  %v6148_v28 = vpop.permute.xlu0 %2384 }
 0x428   : > { %v2360_v62 = vpop.permute.xlu1 %2359 }
 0x429   : > { %2699 = vmatpush2.bf16.msra.mxu1 %v2274_v34 }
 0x42a   : > { %2700 = vmatprep.subr.bf16.mxu1 %v5986_v36  ;;  %v4361_v36 = vld [vmem:[%s6640_s3 + $0x210] ss:$8 sps:$4 sm:$0xff]   ;;  %v6152_v13 = vpop.permute.xlu0 %2374 }
 0x42d   : > { %2701 = vmatpush2.bf16.msra.mxu1 %v5978_v27  ;;  %v4365_v27 = vld [vmem:[%s6640_s3 + $0x234] ss:$8 sps:$4 sm:$0xff]  }
 0x42e   : > { %2702 = vmatprep.subr.bf16.mxu1 %v5958_v1  ;;  %v4362_v1 = vld [vmem:[%s6640_s3 + $0x224] ss:$8 sps:$4 sm:$0xff]   ;;  %v2365_v12 = vpop.permute.xlu0 %2364 }
 0x431   : > { %2703 = vmatpush2.bf16.msra.mxu1 %v5952_v63  ;;  %v4364_v63 = vld [vmem:[%s6640_s3 + $0x220] ss:$8 sps:$4 sm:$0xff]  }
 0x432   : > { %v2355_v25 = vpop.permute.xlu0 %2354 }
 0x434   : > { %2705 = vmatmul.mubr.bf16.vlgmr.msra.gmra.mxu1 %v4356_v26 }
 0x435   : > { %2714 = vmatprep.mubr.bf16.mxu1 %v4359_v53 }
 0x43c   : > { %2715 = vmatmul.mubr.bf16.gmra.mxu1 %v4361_v36 }
 0x43d   : > { %2724 = vmatprep.mubr.bf16.mxu1 %v4362_v1 }
 0x444   : > { %2725 = vmatmul.mubr.bf16.gmra.mxu1 %v4364_v63 }
 0x445   : > { %2734 = vmatprep.mubr.bf16.mxu1 %v4365_v27 }
 0x44c   : > { %2735 = vmatmul.mubr.bf16.gmra.mxu1 %v4367_v52 }
 0x44d   : > { %2744 = vmatprep.mubr.bf16.mxu1 %v4370_v19 }
 0x454   : > { %2745 = vmatmul.mubr.bf16.gmra.mxu1 %v4368_v44 }
 0x455   : > { %2754 = vmatprep.mubr.bf16.mxu1 %v4373_v35 }
 0x45c   : > { %2755 = vmatmul.mubr.bf16.gmra.mxu1 %v4371_v61 }
 0x45d   : > { %2764 = vmatprep.mubr.bf16.mxu1 %v4376_v40 }
 0x464   : > { %2765 = vmatmul.mubr.bf16.gmra.mxu1 %v4374_v16 }
 0x465   : > { %2774 = vmatprep.mubr.bf16.mxu1 %v4379_v3 }
 0x46c   : > { %2775 = vmatmul.mubr.bf16.gmra.mxu1 %v4377_v33 }
 0x46d   : > { %2784 = vmatprep.mubr.bf16.mxu1 %v4382_v54  ;;  %v6172_v54 = vpop.permute.xlu0 %2504 }
 0x474   : > { %2785 = vmatmul.mubr.bf16.gmra.mxu1 %v4380_v14 }
 0x475   : > { %2794 = vmatprep.mubr.bf16.mxu1 %v4385_v7  ;;  %v6176_v7 = vpop.permute.xlu1 %2509 }
 0x47c   : > { %2795 = vmatmul.mubr.bf16.gmra.mxu1 %v4383_v21 }
 0x47d   : > { %2804 = vmatprep.mubr.bf16.mxu1 %v4388_v9 }
 0x484   : > { %2805 = vmatmul.mubr.bf16.gmra.mxu1 %v4386_v59  ;;  %v6182_v59 = vpop.permute.xlu0 %2494 }
 0x485   : > { %2814 = vmatprep.mubr.bf16.mxu1 %v4391_v41 }
 0x48c   : > { %2815 = vmatmul.mubr.bf16.gmra.mxu1 %v4389_v23  ;;  %v6184_v23 = vpop.permute.xlu1 %2499 }
 0x48d   : > { %2824 = vmatprep.mubr.bf16.mxu1 %v4394_v49 }
 0x494   : > { %2825 = vmatmul.mubr.bf16.gmra.mxu1 %v4392_v17 }
 0x495   : > { %2834 = vmatprep.mubr.bf16.mxu1 %v4397_v5  ;;  %v4406_v5 = vld [vmem:[%s6640_s3 + $0x304] ss:$8 sps:$4 sm:$0xff]  }
 0x496   : > { %3379 = vmatprep.mubr.bf16.mxu0 %v4406_v5 }
 0x49c   : > { %2835 = vmatmul.mubr.bf16.gmra.mxu1 %v4395_v31  ;;  %v6191_v31 = vpop.permute.xlu0 %2484 }
 0x49d   : > { %2844 = vmatprep.mubr.bf16.mxu1 %v4400_v18 }
 0x4a4   : > { %2845 = vmatmul.mubr.bf16.gmra.mxu1 %v4398_v2  ;;  %v6195_v2 = vpop.permute.xlu1 %2489 }
 0x4a5   : > { %2854 = vmatprep.mubr.bf16.mxu1 %v4403_v56 }
 0x4ac   : > { %2855 = vmatmul.mubr.bf16.gmra.mxu1 %v4401_v8 }
 0x4f4   : > { %v2706_v6 = vpop.f32.mrf.mxu1 }
 0x4f5   : > { %v2707_v39 = vadd.f32 %v2706_v6, %v2355_v25  ;;  %v6199_v6 = vpop.permute.xlu1 %2479 }
 0x4f6   : > { %v2708_v4 = vpop.f32.mrf.mxu1  ;;  %6833 = vst [vmem:[#allocation30_spill] sm:$0xff] %v6199_v6 }
 0x4f7   : > { %v2709_v58 = vadd.f32 %v2708_v4, %v2355_v25  ;;  %v2865_v38 = vmax.f32 %v2707_v39, 0.0 }
 0x4f8   : > { %v2710_v48 = vpop.f32.mrf.mxu1 }
 0x4f9   : > { %v2711_v0 = vadd.f32 %v2710_v48, %v2360_v62  ;;  %v2866_v20 = vmax.f32 %v2709_v58, 0.0  ;;  %v6203_v48 = vpop.permute.xlu1 %2469 }
 0x4fa   : > { %v2712_v45 = vpop.f32.mrf.mxu1  ;;  %6835 = vst [vmem:[#allocation24_spill] sm:$0xff] %v6203_v48 }
 0x4fb   : > { %v2867_v30 = vmax.f32 %v2711_v0, 0.0  ;;  %v2713_v29 = vadd.f32 %v2712_v45, %v2360_v62 }
 0x4fc   : > { %v2716_v37 = vpop.f32.mrf.mxu1 }
 0x4fd   : > { %v6156_v60 = vpack.c.bf16 %v2867_v30, %v2865_v38  ;;  %v2868_v11 = vmax.f32 %v2713_v29, 0.0  ;;  %v2717_v34 = vadd.f32 %v2716_v37, %v2365_v12  ;;  %v6207_v30 = vpop.permute.xlu1 %2459 }
 0x4fe   : > { %v2718_v46 = vpop.f32.mrf.mxu1  ;;  %6837 = vst [vmem:[#allocation20_spill] sm:$0xff] %v6207_v30 }
 0x4ff   : > { %v6158_v50 = vpack.c.bf16 %v2868_v11, %v2866_v20  ;;  %v2719_v53 = vadd.f32 %v2718_v46, %v2365_v12  ;;  %v2869_v63 = vmax.f32 %v2717_v34, 0.0  ;;  %v6197_v12 = vpop.permute.xlu0 %2474 }
 0x500   : > { %v2720_v26 = vpop.f32.mrf.mxu1  ;;  %6832 = vst [vmem:[#allocation25_spill] sm:$0xff] %v6197_v12 }
 0x501   : > { %v2721_v36 = vadd.f32 %v2720_v26, %v2370_v51  ;;  %v2870_v44 = vmax.f32 %v2719_v53, 0.0  ;;  %v6214_v53 = vpop.permute.xlu1 %2449 }
 0x502   : > { %v2722_v1 = vpop.f32.mrf.mxu1 }
 0x503   : > { %v2871_v27 = vmax.f32 %v2721_v36, 0.0  ;;  %v2723_v52 = vadd.f32 %v2722_v1, %v2370_v51  ;;  %v6201_v39 = vpop.permute.xlu0 %2464 }
 0x504   : > { %v6160_v19 = vpop.f32.mrf.mxu1  ;;  %6834 = vst [vmem:[#allocation11_spill] sm:$0xff] %v6201_v39 }
 0x505   : > { %v6162_v35 = vpack.c.bf16 %v2871_v27, %v2869_v63  ;;  %v2872_v61 = vmax.f32 %v2723_v52, 0.0 }
 0x506   : > { %v6164_v40 = vpop.f32.mrf.mxu1 }
 0x507   : > { %v6166_v16 = vpack.c.bf16 %v2872_v61, %v2870_v44  ;;  %v6205_v45 = vpop.permute.xlu0 %2454 }
 0x508   : > { %v6168_v3 = vpop.f32.mrf.mxu1  ;;  %6836 = vst [vmem:[#allocation12_spill] sm:$0xff] %v6205_v45 }
 0x50a   : > { %v6170_v33 = vpop.f32.mrf.mxu1 }
 0x50b   : > { %v6209_v20 = vpop.permute.xlu0 %2444 }
 0x50c   : > { %v6174_v14 = vpop.f32.mrf.mxu1 }
 0x50e   : > { %v6178_v21 = vpop.f32.mrf.mxu1 }
 0x50f   : > { %v2435_v30 = vpop.permute.xlu0 %2434 }
 0x510   : > { %v6180_v9 = vpop.f32.mrf.mxu1 }
 0x512   : > { %v2742_v41 = vpop.f32.mrf.mxu1 }
 0x514   : > { %v6186_v49 = vpop.f32.mrf.mxu1 }
 0x516   : > { %v2748_v17 = vpop.f32.mrf.mxu1 }
 0x518   : > { %v6193_v18 = vpop.f32.mrf.mxu1 }
 0x51a   : > { %v2752_v56 = vpop.f32.mrf.mxu1 }
 0x51c   : > { %v2756_v8 = vpop.f32.mrf.mxu1 }
 0x51e   : > { %v2758_v51 = vpop.f32.mrf.mxu1 }
 0x520   : > { %v2760_v25 = vpop.f32.mrf.mxu1 }
 0x522   : > { %v2762_v4 = vpop.f32.mrf.mxu1 }
 0x523   : > { %v2763_v5 = vadd.f32 %v2762_v4, %v6142_v15 }
 0x524   : > { %v2766_v62 = vpop.f32.mrf.mxu1 }
 0x526   : > { %v2768_v58 = vpop.f32.mrf.mxu1 }
 0x527   : > { %v2769_v63 = vadd.f32 %v2768_v58, %v6136_v43 }
 0x528   : > { %v2770_v0 = vpop.f32.mrf.mxu1 }
 0x529   : > { %v2771_v52 = vadd.f32 %v2770_v0, %v6138_v42  ;;  %v2761_v0 = vadd.f32 %v2760_v25, %v6142_v15 }
 0x52a   : > { %v2772_v38 = vpop.f32.mrf.mxu1 }
 0x52b   : > { %v2773_v46 = vadd.f32 %v2772_v38, %v6138_v42  ;;  %v2753_v42 = vadd.f32 %v2752_v56, %v6146_v47 }
 0x52c   : > { %v2776_v29 = vpop.f32.mrf.mxu1 }
 0x52d   : > { %v2777_v36 = vadd.f32 %v2776_v29, %v6132_v32  ;;  %v2892_v38 = vmax.f32 %v2773_v46, 0.0  ;;  %v2890_v29 = vmax.f32 %v2769_v63, 0.0 }
 0x52e   : > { %v2778_v37 = vpop.f32.mrf.mxu1 }
 0x52f   : > { %v2779_v34 = vadd.f32 %v2778_v37, %v6132_v32  ;;  %v2893_v39 = vmax.f32 %v2777_v36, 0.0  ;;  %v2759_v32 = vadd.f32 %v2758_v51, %v6140_v24  ;;  %v2749_v51 = vadd.f32 %v2748_v17, %v6144_v22 }
 0x530   : > { %v2780_v11 = vpop.f32.mrf.mxu1 }
 0x531   : > { %v2781_v26 = vadd.f32 %v2780_v11, %v6134_v57  ;;  %v2894_v45 = vmax.f32 %v2779_v34, 0.0  ;;  %v2767_v11 = vadd.f32 %v2766_v62, %v6136_v43  ;;  %v2888_v34 = vmax.f32 %v2763_v5, 0.0 }
 0x532   : > { %v2782_v1 = vpop.f32.mrf.mxu1  ;;  %v2743_v43 = vadd.f32 %v2742_v41, %v6150_v10  ;;  %v2757_v62 = vadd.f32 %v2756_v8, %v6140_v24  ;;  %v2886_v56 = vmax.f32 %v2759_v32, 0.0  ;;  %v2747_v8 = vadd.f32 %v6186_v49, %v6144_v22 }
 0x533   : > { %v2783_v27 = vadd.f32 %v2782_v1, %v6134_v57  ;;  %v2895_v44 = vmax.f32 %v2781_v26, 0.0  ;;  %v2440_v57 = vpop.permute.xlu1 %2439  ;;  %v2891_v26 = vmax.f32 %v2771_v52, 0.0  ;;  %v2942_v1 = vpack.c.bf16 %v2892_v38, %v2890_v29 }
 0x534   : > { %v2786_v61 = vpop.f32.mrf.mxu1  ;;  %v2940_v41 = vpack.c.bf16 %v2888_v34, %v2886_v56  ;;  %v2885_v5 = vmax.f32 %v2757_v62, 0.0  ;;  %v2882_v38 = vmax.f32 %v2749_v51, 0.0  ;;  %v2880_v29 = vmax.f32 %v2743_v43, 0.0 }
 0x535   : > { %v2896_v37 = vmax.f32 %v2783_v27, 0.0  ;;  %v2787_v12 = vadd.f32 %v2786_v61, %v2435_v30  ;;  %v2943_v4 = vpack.c.bf16 %v2895_v44, %v2893_v39  ;;  %v2751_v39 = vadd.f32 %v6193_v18, %v6146_v47 }
 0x536   : > { %v2788_v48 = vpop.f32.mrf.mxu1  ;;  %v2727_v62 = vadd.f32 %v6160_v19, %v6152_v13 }
 0x537   : > { %v2944_v58 = vpack.c.bf16 %v2896_v37, %v2894_v45  ;;  %v2789_v27 = vadd.f32 %v2788_v48, %v2435_v30  ;;  %v2889_v45 = vmax.f32 %v2767_v11, 0.0  ;;  %v2897_v63 = vmax.f32 %v2787_v12, 0.0 }
 0x538   : > { %v2790_v46 = vpop.f32.mrf.mxu1  ;;  %v2884_v48 = vmax.f32 %v2753_v42, 0.0  ;;  %v2887_v30 = vmax.f32 %v2761_v0, 0.0  ;;  %v2733_v37 = vadd.f32 %v6170_v33, %v6154_v55  ;;  %v2741_v11 = vadd.f32 %v6180_v9, %v6150_v10 }
 0x539   : > { %v2791_v6 = vadd.f32 %v2790_v46, %v2440_v57  ;;  %3347 = vmatprep.subr.bf16.mxu0 %v2944_v58  ;;  %v2941_v52 = vpack.c.bf16 %v2891_v26, %v2889_v45  ;;  %v2898_v61 = vmax.f32 %v2789_v27, 0.0  ;;  %v2883_v32 = vmax.f32 %v2751_v39, 0.0 }
 0x53a   : > { %v2792_v36 = vpop.f32.mrf.mxu1  ;;  %3348 = vmatpush1.bf16.msra.mxu0 %v2943_v4  ;;  %v2939_v22 = vpack.c.bf16 %v2887_v30, %v2885_v5  ;;  %v2938_v58 = vpack.c.bf16 %v2884_v48, %v2882_v38  ;;  %v2729_v42 = vadd.f32 %v6164_v40, %v6152_v13  ;;  %v2737_v0 = vadd.f32 %v6174_v14, %v6148_v28 }
 0x53b   : > { %v2899_v15 = vmax.f32 %v2791_v6, 0.0  ;;  %v2793_v25 = vadd.f32 %v2792_v36, %v2440_v57  ;;  %3349 = vmatprep.subr.bf16.mxu0 %v2942_v1  ;;  %v2739_v6 = vadd.f32 %v6178_v21, %v6148_v28  ;;  %v2881_v26 = vmax.f32 %v2747_v8, 0.0 }
 0x53c   : > { %v2796_v44 = vpop.f32.mrf.mxu1  ;;  %v2876_v34 = vmax.f32 %v2733_v37, 0.0  ;;  %v2879_v1 = vmax.f32 %v2741_v11, 0.0  ;;  %v2877_v45 = vmax.f32 %v2737_v0, 0.0 }
 0x53d   : > { %v6230_v17 = vpack.c.bf16 %v2899_v15, %v2897_v63  ;;  %v2900_v24 = vmax.f32 %v2793_v25, 0.0  ;;  %v2797_v18 = vadd.f32 %v2796_v44, %v6209_v20  ;;  %v2878_v4 = vmax.f32 %v2739_v6, 0.0 }
 0x53e   : > { %v2798_v12 = vpop.f32.mrf.mxu1  ;;  %3350 = vmatpush1.bf16.msra.mxu0 %v2941_v52  ;;  %v2937_v27 = vpack.c.bf16 %v2883_v32, %v2881_v26  ;;  %v2873_v25 = vmax.f32 %v2727_v62, 0.0 }
 0x53f   : > { %v6236_v47 = vpack.c.bf16 %v2900_v24, %v2898_v61  ;;  %3351 = vmatprep.subr.bf16.mxu0 %v2940_v41  ;;  %v2799_v57 = vadd.f32 %v2798_v12, %v6209_v20  ;;  %v2901_v10 = vmax.f32 %v2797_v18, 0.0  ;;  %v2731_v20 = vadd.f32 %v6168_v3, %v6154_v55 }
 0x540   : > { %v2800_v49 = vpop.f32.mrf.mxu1  ;;  %v2936_v40 = vpack.c.bf16 %v2880_v29, %v2878_v4  ;;  %v2935_v3 = vpack.c.bf16 %v2879_v1, %v2877_v45  ;;  %v6839_v45 = vld [vmem:[#allocation25_spill] sm:$0xff] }
 0x541   : > { %v2801_v21 = vadd.f32 %v2800_v49, %v6214_v53  ;;  %v2902_v51 = vmax.f32 %v2799_v57, 0.0  ;;  %v2875_v55 = vmax.f32 %v2731_v20, 0.0 }
 0x542   : > { %v2802_v33 = vpop.f32.mrf.mxu1  ;;  %3352 = vmatpush1.bf16.msra.mxu0 %v2939_v22 }
 0x543   : > { %v2903_v9 = vmax.f32 %v2801_v21, 0.0  ;;  %v2803_v46 = vadd.f32 %v2802_v33, %v6214_v53  ;;  %3353 = vmatprep.subr.bf16.mxu0 %v2938_v58  ;;  %v2874_v53 = vmax.f32 %v2729_v42, 0.0  ;;  %v2933_v48 = vpack.c.bf16 %v2875_v55, %v2873_v25 }
 0x544   : > { %v6252_v43 = vpop.f32.mrf.mxu1 }
 0x545   : > { %v6254_v28 = vpack.c.bf16 %v2903_v9, %v2901_v10  ;;  %v2904_v14 = vmax.f32 %v2803_v46, 0.0  ;;  %v2934_v15 = vpack.c.bf16 %v2876_v34, %v2874_v53 }
 0x546   : > { %v6258_v36 = vpop.f32.mrf.mxu1  ;;  %3354 = vmatpush1.bf16.msra.mxu0 %v2937_v27 }
 0x547   : > { %v6260_v56 = vpack.c.bf16 %v2904_v14, %v2902_v51  ;;  %3355 = vmatprep.subr.bf16.mxu0 %v2936_v40 }
 0x548   : > { %v6262_v63 = vpop.f32.mrf.mxu1 }
 0x54a   : > { %v6264_v39 = vpop.f32.mrf.mxu1  ;;  %3356 = vmatpush1.bf16.msra.mxu0 %v2935_v3 }
 0x54b   : > { %3357 = vmatprep.subr.bf16.mxu0 %v2934_v15 }
 0x54c   : > { %v6266_v13 = vpop.f32.mrf.mxu1 }
 0x54e   : > { %v6268_v19 = vpop.f32.mrf.mxu1  ;;  %3358 = vmatpush1.bf16.msra.mxu0 %v2933_v48 }
 0x54f   : > { %3359 = vmatprep.subr.bf16.mxu0 %v6166_v16 }
 0x550   : > { %v6271_v30 = vpop.f32.mrf.mxu1 }
 0x552   : > { %v2822_v52 = vpop.f32.mrf.mxu1  ;;  %3360 = vmatpush1.bf16.msra.mxu0 %v6162_v35 }
 0x553   : > { %3361 = vmatprep.subr.bf16.mxu0 %v6158_v50 }
 0x554   : > { %v2826_v44 = vpop.f32.mrf.mxu1 }
 0x556   : > { %v2828_v41 = vpop.f32.mrf.mxu1  ;;  %3362 = vmatpush1.bf16.msra.mxu0 %v6156_v60 }
 0x558   : > { %v2830_v61 = vpop.f32.mrf.mxu1 }
 0x55a   : > { %v2832_v24 = vpop.f32.mrf.mxu1 }
 0x55c   : > { %v2836_v8 = vpop.f32.mrf.mxu1 }
 0x55d   : > { %v2837_v14 = vadd.f32 %v2836_v8, %v6191_v31 }
 0x55e   : > { %v2838_v5 = vpop.f32.mrf.mxu1 }
 0x55f   : > { %v2839_v46 = vadd.f32 %v2838_v5, %v6191_v31 }
 0x560   : > { %v2840_v12 = vpop.f32.mrf.mxu1 }
 0x561   : > { %v2841_v34 = vadd.f32 %v2840_v12, %v6195_v2  ;;  %v2918_v53 = vmax.f32 %v2839_v46, 0.0  ;;  %v2917_v12 = vmax.f32 %v2837_v14, 0.0  ;;  %v4422_v46 = vld [vmem:[%s6640_s3 + $0x360] ss:$8 sps:$4 sm:$0xff]   ;;  %v4437_v14 = vld [vmem:[%s6640_s3 + $0x3b0] ss:$8 sps:$4 sm:$0xff]  }
 0x562   : > { %v2842_v6 = vpop.f32.mrf.mxu1 }
 0x563   : > { %v2843_v0 = vadd.f32 %v2842_v6, %v6195_v2  ;;  %v2919_v3 = vmax.f32 %v2841_v34, 0.0  ;;  %v6840_v2 = vld [vmem:[#allocation24_spill] sm:$0xff]  ;;  %v6841_v6 = vld [vmem:[#allocation11_spill] sm:$0xff] }
 0x564   : > { %v2846_v38 = vpop.f32.mrf.mxu1  ;;  %v2823_v25 = vadd.f32 %v2822_v52, %v6840_v2  ;;  %v2819_v31 = vadd.f32 %v6268_v19, %v6841_v6  ;;  %v4430_v34 = vld [vmem:[%s6640_s3 + $0x384] ss:$8 sps:$4 sm:$0xff]  }
 0x565   : > { %v2847_v10 = vadd.f32 %v2846_v38, %v6182_v59 }
 0x566   : > { %v2848_v18 = vpop.f32.mrf.mxu1  ;;  %v2912_v52 = vmax.f32 %v2823_v25, 0.0  ;;  %v6404_v25 = vpop.permute.xlu0 %3099 }
 0x567   : > { %v2849_v58 = vadd.f32 %v2848_v18, %v6182_v59  ;;  %v2921_v62 = vmax.f32 %v2847_v10, 0.0  ;;  %v2829_v59 = vadd.f32 %v2828_v41, %v6839_v45  ;;  %v2821_v41 = vadd.f32 %v6271_v30, %v6840_v2  ;;  %v6842_v18 = vld [vmem:[#allocation20_spill] sm:$0xff] }
 0x568   : > { %v2850_v16 = vpop.f32.mrf.mxu1  ;;  %v2811_v30 = vadd.f32 %v6262_v63, %v6842_v18  ;;  %v4407_v63 = vld [vmem:[%s6640_s3 + $0x314] ss:$8 sps:$4 sm:$0xff]   ;;  %v4419_v10 = vld [vmem:[%s6640_s3 + $0x350] ss:$8 sps:$4 sm:$0xff]  }
 0x569   : > { %v2851_v21 = vadd.f32 %v2850_v16, %v6184_v23  ;;  %v2922_v20 = vmax.f32 %v2849_v58, 0.0  ;;  %v2914_v8 = vmax.f32 %v2829_v59, 0.0  ;;  %v2813_v16 = vadd.f32 %v6264_v39, %v6842_v18  ;;  %v4445_v59 = vld [vmem:[%s6640_s3 + $0x3d4] ss:$8 sps:$4 sm:$0xff]   ;;  %v4449_v2 = vld [vmem:[%s6640_s3 + $0x3f0] ss:$8 sps:$4 sm:$0xff]  }
 0x56a   : > { %v2852_v37 = vpop.f32.mrf.mxu1  ;;  %v2907_v58 = vmax.f32 %v2811_v30, 0.0 }
 0x56b   : > { %v2853_v35 = vadd.f32 %v2852_v37, %v6184_v23  ;;  %v2923_v1 = vmax.f32 %v2851_v21, 0.0  ;;  %v2920_v23 = vmax.f32 %v2843_v0, 0.0  ;;  %v4415_v0 = vld [vmem:[%s6640_s3 + $0x330] ss:$8 sps:$4 sm:$0xff]  }
 0x56c   : > { %v2856_v11 = vpop.f32.mrf.mxu1 }
 0x56d   : > { %v2857_v60 = vadd.f32 %v2856_v11, %v6172_v54  ;;  %v2924_v26 = vmax.f32 %v2853_v35, 0.0  ;;  %v2957_v15 = vpack.c.bf16 %v2923_v1, %v2921_v62  ;;  %v2956_v5 = vpack.c.bf16 %v2920_v23, %v2918_v53  ;;  %v4428_v1 = vld [vmem:[%s6640_s3 + $0x380] ss:$8 sps:$4 sm:$0xff]   ;;  %v4442_v62 = vld [vmem:[%s6640_s3 + $0x3c4] ss:$8 sps:$4 sm:$0xff]  }
 0x56e   : > { %v2858_v32 = vpop.f32.mrf.mxu1  ;;  %v2911_v35 = vmax.f32 %v2821_v41, 0.0  ;;  %v4434_v23 = vld [vmem:[%s6640_s3 + $0x3a0] ss:$8 sps:$4 sm:$0xff]   ;;  %v4443_v53 = vld [vmem:[%s6640_s3 + $0x3d0] ss:$8 sps:$4 sm:$0xff]  }
 0x56f   : > { %v2859_v50 = vadd.f32 %v2858_v32, %v6172_v54  ;;  %v2925_v9 = vmax.f32 %v2857_v60, 0.0  ;;  %v2958_v51 = vpack.c.bf16 %v2924_v26, %v2922_v20  ;;  %v6843_v32 = vld [vmem:[#allocation12_spill] sm:$0xff]  ;;  %v4418_v26 = vld [vmem:[%s6640_s3 + $0x344] ss:$8 sps:$4 sm:$0xff]  }
 0x570   : > { %v2860_v22 = vpop.f32.mrf.mxu1  ;;  %v2809_v19 = vadd.f32 %v6258_v36, %v6843_v32  ;;  %v2807_v39 = vadd.f32 %v6252_v43, %v6843_v32  ;;  %v4404_v43 = vld [vmem:[%s6640_s3 + $0x300] ss:$8 sps:$4 sm:$0xff]   ;;  %v4427_v20 = vld [vmem:[%s6640_s3 + $0x374] ss:$8 sps:$4 sm:$0xff]  }
 0x571   : > { %v2861_v49 = vadd.f32 %v2860_v22, %v6176_v7  ;;  %v2926_v33 = vmax.f32 %v2859_v50, 0.0  ;;  %v2910_v22 = vmax.f32 %v2819_v31, 0.0 }
 0x572   : > { %v2862_v29 = vpop.f32.mrf.mxu1  ;;  %v2905_v36 = vmax.f32 %v2807_v39, 0.0 }
 0x573   : > { %v2863_v57 = vadd.f32 %v2862_v29, %v6176_v7  ;;  %v2927_v42 = vmax.f32 %v2861_v49, 0.0  ;;  %v6838_v7 = vld [vmem:[#allocation30_spill] sm:$0xff]  ;;  %v2908_v49 = vmax.f32 %v2813_v16, 0.0  ;;  %v2952_v60 = vpack.c.bf16 %v2912_v52, %v2910_v22 }
 0x574   : > { %v2833_v40 = vadd.f32 %v2832_v24, %v6838_v7  ;;  %v2831_v55 = vadd.f32 %v2830_v61, %v6838_v7  ;;  %v2827_v24 = vadd.f32 %v2826_v44, %v6839_v45  ;;  %v2955_v61 = vpack.c.bf16 %v2919_v3, %v2917_v12  ;;  %v4431_v7 = vld [vmem:[%s6640_s3 + $0x390] ss:$8 sps:$4 sm:$0xff]   ;;  %v4440_v45 = vld [vmem:[%s6640_s3 + $0x3c0] ss:$8 sps:$4 sm:$0xff]  }
 0x575   : > { %v2928_v4 = vmax.f32 %v2863_v57, 0.0  ;;  %v2959_v27 = vpack.c.bf16 %v2927_v42, %v2925_v9  ;;  %v2817_v44 = vadd.f32 %v6266_v13, %v6841_v6  ;;  %v2906_v13 = vmax.f32 %v2809_v19, 0.0  ;;  %v4424_v9 = vld [vmem:[%s6640_s3 + $0x364] ss:$8 sps:$4 sm:$0xff]   ;;  %v4446_v3 = vld [vmem:[%s6640_s3 + $0x3e0] ss:$8 sps:$4 sm:$0xff]  }
 0x576   : > { %v2916_v48 = vmax.f32 %v2833_v40, 0.0  ;;  %v2915_v38 = vmax.f32 %v2831_v55, 0.0  ;;  %v2913_v11 = vmax.f32 %v2827_v24, 0.0  ;;  %v2949_v42 = vpack.c.bf16 %v2907_v58, %v2905_v36  ;;  %v4436_v40 = vld [vmem:[%s6640_s3 + $0x3a4] ss:$8 sps:$4 sm:$0xff]  }
 0x577   : > { %v2960_v54 = vpack.c.bf16 %v2928_v4, %v2926_v33  ;;  %v2909_v29 = vmax.f32 %v2817_v44, 0.0  ;;  %v2950_v21 = vpack.c.bf16 %v2908_v49, %v2906_v13  ;;  %v4416_v33 = vld [vmem:[%s6640_s3 + $0x340] ss:$8 sps:$4 sm:$0xff]   ;;  %v4421_v4 = vld [vmem:[%s6640_s3 + $0x354] ss:$8 sps:$4 sm:$0xff]  }
 0x578   : > { %v2954_v37 = vpack.c.bf16 %v2916_v48, %v2914_v8  ;;  %v2953_v50 = vpack.c.bf16 %v2915_v38, %v2913_v11  ;;  %v4448_v55 = vld [vmem:[%s6640_s3 + $0x3e4] ss:$8 sps:$4 sm:$0xff]   ;;  %v6406_v48 = vpop.permute.xlu1 %3104 }
 0x579   : > { %3363 = vmatprep.subr.bf16.mxu0 %v2960_v54  ;;  %v2951_v57 = vpack.c.bf16 %v2911_v35, %v2909_v29  ;;  %v4425_v54 = vld [vmem:[%s6640_s3 + $0x370] ss:$8 sps:$4 sm:$0xff]  }
 0x57a   : > { %3364 = vmatpush2.bf16.msra.mxu0 %v2959_v27  ;;  %v4433_v27 = vld [vmem:[%s6640_s3 + $0x394] ss:$8 sps:$4 sm:$0xff]  }
 0x57b   : > { %3365 = vmatprep.subr.bf16.mxu0 %v2958_v51  ;;  %v4439_v51 = vld [vmem:[%s6640_s3 + $0x3b4] ss:$8 sps:$4 sm:$0xff]  }
 0x57c   : > { %v6410_v24 = vpop.permute.xlu1 %3094 }
 0x57e   : > { %3366 = vmatpush2.bf16.msra.mxu0 %v2957_v15  ;;  %v4451_v15 = vld [vmem:[%s6640_s3 + $0x3f4] ss:$8 sps:$4 sm:$0xff]  }
 0x57f   : > { %3367 = vmatprep.subr.bf16.mxu0 %v2956_v5  ;;  %v6408_v5 = vpop.permute.xlu0 %3089 }
 0x580   : > { %v6414_v6 = vpop.permute.xlu1 %3084 }
 0x582   : > { %3368 = vmatpush2.bf16.msra.mxu0 %v2955_v61 }
 0x583   : > { %3369 = vmatprep.subr.bf16.mxu0 %v2954_v37  ;;  %v6412_v12 = vpop.permute.xlu0 %3079 }
 0x584   : > { %v6418_v8 = vpop.permute.xlu1 %3074 }
 0x586   : > { %3370 = vmatpush2.bf16.msra.mxu0 %v2953_v50 }
 0x587   : > { %3371 = vmatprep.subr.bf16.mxu0 %v2952_v60  ;;  %v6416_v31 = vpop.permute.xlu0 %3069 }
 0x588   : > { %v6422_v38 = vpop.permute.xlu1 %3064 }
 0x58a   : > { %3372 = vmatpush2.bf16.msra.mxu0 %v2951_v57 }
 0x58b   : > { %3373 = vmatprep.subr.bf16.mxu0 %v2950_v21  ;;  %v6420_v41 = vpop.permute.xlu0 %3059 }
 0x58c   : > { %v6426_v18 = vpop.permute.xlu1 %3054 }
 0x58e   : > { %3374 = vmatpush2.bf16.msra.mxu0 %v2949_v42 }
 0x58f   : > { %3375 = vmatprep.subr.bf16.mxu0 %v6260_v56  ;;  %v4409_v56 = vld [vmem:[%s6640_s3 + $0x310] ss:$8 sps:$4 sm:$0xff]   ;;  %v6424_v61 = vpop.permute.xlu0 %3049 }
 0x590   : > { %v3045_v52 = vpop.permute.xlu1 %3044 }
 0x592   : > { %3376 = vmatpush2.bf16.msra.mxu0 %v6254_v28  ;;  %v4413_v28 = vld [vmem:[%s6640_s3 + $0x334] ss:$8 sps:$4 sm:$0xff]  }
 0x593   : > { %3377 = vmatprep.subr.bf16.mxu0 %v6236_v47  ;;  %v4410_v47 = vld [vmem:[%s6640_s3 + $0x324] ss:$8 sps:$4 sm:$0xff]   ;;  %v3040_v16 = vpop.permute.xlu0 %3039 }
 0x594   : > { %v3035_v19 = vpop.permute.xlu1 %3034 }
 0x596   : > { %3378 = vmatpush2.bf16.msra.mxu0 %v6230_v17  ;;  %v4412_v17 = vld [vmem:[%s6640_s3 + $0x320] ss:$8 sps:$4 sm:$0xff]  }
 0x597   : > { %v3030_v44 = vpop.permute.xlu0 %3029 }
 0x599   : > { %3380 = vmatmul.mubr.bf16.vlgmr.msra.gmra.mxu0 %v4404_v43 }
 0x59a   : > { %3389 = vmatprep.mubr.bf16.mxu0 %v4407_v63 }
 0x5a1   : > { %3390 = vmatmul.mubr.bf16.gmra.mxu0 %v4409_v56 }
 0x5a2   : > { %3399 = vmatprep.mubr.bf16.mxu0 %v4410_v47 }
 0x5a9   : > { %3400 = vmatmul.mubr.bf16.gmra.mxu0 %v4412_v17 }
 0x5aa   : > { %3409 = vmatprep.mubr.bf16.mxu0 %v4413_v28 }
 0x5b1   : > { %3410 = vmatmul.mubr.bf16.gmra.mxu0 %v4415_v0 }
 0x5b2   : > { %3419 = vmatprep.mubr.bf16.mxu0 %v4418_v26 }
 0x5b9   : > { %3420 = vmatmul.mubr.bf16.gmra.mxu0 %v4416_v33 }
 0x5ba   : > { %3429 = vmatprep.mubr.bf16.mxu0 %v4421_v4 }
 0x5c1   : > { %3430 = vmatmul.mubr.bf16.gmra.mxu0 %v4419_v10 }
 0x5c2   : > { %3439 = vmatprep.mubr.bf16.mxu0 %v4424_v9 }
 0x5c9   : > { %3440 = vmatmul.mubr.bf16.gmra.mxu0 %v4422_v46 }
 0x5ca   : > { %3449 = vmatprep.mubr.bf16.mxu0 %v4427_v20 }
 0x5d1   : > { %3450 = vmatmul.mubr.bf16.gmra.mxu0 %v4425_v54 }
 0x5d2   : > { %3459 = vmatprep.mubr.bf16.mxu0 %v4430_v34  ;;  %v4519_v34 = vmov 1966171168  }
 0x5d9   : > { %3460 = vmatmul.mubr.bf16.gmra.mxu0 %v4428_v1  ;;  %v3657_v1 = vunpack.c.l.s4 %v4519_v34 }
 0x5da   : > { %3469 = vmatprep.mubr.bf16.mxu0 %v4433_v27  ;;  %v6444_v27 = vpop.permute.xlu0 %3179 }
 0x5e1   : > { %3470 = vmatmul.mubr.bf16.gmra.mxu0 %v4431_v7 }
 0x5e2   : > { %3479 = vmatprep.mubr.bf16.mxu0 %v4436_v40  ;;  %v6693_v40 = vlaneseq }
 0x5e9   : > { %3480 = vmatmul.mubr.bf16.gmra.mxu0 %v4434_v23  ;;  %v6448_v23 = vpop.permute.xlu1 %3184 }
 0x5ea   : > { %3489 = vmatprep.mubr.bf16.mxu0 %v4439_v51 }
 0x5f1   : > { %3490 = vmatmul.mubr.bf16.gmra.mxu0 %v4437_v14  ;;  %v3658_v14 = vunpack.c.0.s8 %v3657_v1 }
 0x5f2   : > { %3499 = vmatprep.mubr.bf16.mxu0 %v4442_v62 }
 0x5f9   : > { %3500 = vmatmul.mubr.bf16.gmra.mxu0 %v4440_v45  ;;  %v6455_v45 = vshrl.u32 %v6693_v40, 7 }
 0x5fa   : > { %3509 = vmatprep.mubr.bf16.mxu0 %v4445_v59  ;;  %v6457_v59 = vpop.permute.xlu0 %3169 }
 0x5fb   : > { %6844 = vst [vmem:[#allocation13_spill] sm:$0xff] %v6455_v45 }
 0x601   : > { %3510 = vmatmul.mubr.bf16.gmra.mxu0 %v4443_v53 }
 0x602   : > { %3519 = vmatprep.mubr.bf16.mxu0 %v4448_v55  ;;  %v6462_v55 = vsub.s32 %v3658_v14, %v6455_v45 }
 0x604   : > { %6845 = vst [vmem:[#allocation21_spill] sm:$0xff] %v6462_v55 }
 0x609   : > { %3520 = vmatmul.mubr.bf16.gmra.mxu0 %v4446_v3  ;;  %v6464_v3 = vpop.permute.xlu1 %3174 }
 0x60a   : > { %3529 = vmatprep.mubr.bf16.mxu0 %v4451_v15 }
 0x611   : > { %3530 = vmatmul.mubr.bf16.gmra.mxu0 %v4449_v2  ;;  %v6471_v2 = vld.sshfl [vmem:[%s6642_s5] sm:$0x11 pattern:$0x75316420] }
 0x612   : > { %6846 = vst [vmem:[#allocation14_spill] sm:$0xff] %v6471_v2 }
 0x659   : > { %v3381_v37 = vpop.f32.mrf.mxu0 }
 0x65a   : > { %v3382_v32 = vadd.f32 %v3381_v37, %v3030_v44 }
 0x65b   : > { %v3383_v11 = vpop.f32.mrf.mxu0 }
 0x65c   : > { %v3384_v30 = vadd.f32 %v3383_v11, %v3030_v44  ;;  %v3540_v49 = vmax.f32 %v3382_v32, 0.0  ;;  %v6476_v44 = vpop.permute.xlu0 %3159  ;;  %v6480_v32 = vpop.permute.xlu1 %3164 }
 0x65d   : > { %v3385_v22 = vpop.f32.mrf.mxu0 }
 0x65e   : > { %v3386_v35 = vadd.f32 %v3385_v22, %v3035_v19  ;;  %v3541_v13 = vmax.f32 %v3384_v30, 0.0 }
 0x65f   : > { %v3387_v50 = vpop.f32.mrf.mxu0 }
 0x660   : > { %v3542_v60 = vmax.f32 %v3386_v35, 0.0  ;;  %v3388_v39 = vadd.f32 %v3387_v50, %v3035_v19  ;;  %v6482_v30 = vpop.permute.xlu0 %3149  ;;  %v6484_v50 = vpop.permute.xlu1 %3154 }
 0x661   : > { %v3391_v29 = vpop.f32.mrf.mxu0  ;;  %6847 = vst [vmem:[#allocation15_spill] sm:$0xff] %v6482_v30  ;;  %6848 = vst [vmem:[#allocation16_spill] sm:$0xff] %v6484_v50 }
 0x662   : > { %v6428_v58 = vpack.c.bf16 %v3542_v60, %v3540_v49  ;;  %v3543_v57 = vmax.f32 %v3388_v39, 0.0  ;;  %v3392_v42 = vadd.f32 %v3391_v29, %v3040_v16 }
 0x663   : > { %v3393_v21 = vpop.f32.mrf.mxu0 }
 0x664   : > { %v6430_v36 = vpack.c.bf16 %v3543_v57, %v3541_v13  ;;  %v3394_v63 = vadd.f32 %v3393_v21, %v3040_v16  ;;  %v3544_v17 = vmax.f32 %v3392_v42, 0.0  ;;  %v3655_v16 = vcombine.high %v6471_v2, %v6471_v2  ;;  %v6486_v39 = vpop.permute.xlu0 %3139  ;;  %v6488_v13 = vpop.permute.xlu1 %3144 }
 0x665   : > { %v3395_v43 = vpop.f32.mrf.mxu0  ;;  %6849 = vst [vmem:[#allocation17_spill] sm:$0xff] %v6486_v39  ;;  %6850 = vst [vmem:[#allocation27_spill] sm:$0xff] %v6488_v13 }
 0x666   : > { %v3396_v56 = vadd.f32 %v3395_v43, %v3045_v52  ;;  %v3545_v33 = vmax.f32 %v3394_v63, 0.0  ;;  %v3669_v37 = vrot.slane %v3655_v16, %v6462_v55 }
 0x667   : > { %v3397_v47 = vpop.f32.mrf.mxu0 }
 0x668   : > { %v3546_v28 = vmax.f32 %v3396_v56, 0.0  ;;  %v3398_v0 = vadd.f32 %v3397_v47, %v3045_v52  ;;  %3704 = vmatprep.mubr.bf16.mxu1 %v3669_v37  ;;  %v6490_v42 = vpop.permute.xlu0 %3129  ;;  %v6492_v63 = vpop.permute.xlu1 %3134 }
 0x669   : > { %v6432_v26 = vpop.f32.mrf.mxu0  ;;  %6851 = vst [vmem:[#allocation22_spill] sm:$0xff] %v6490_v42  ;;  %6852 = vst [vmem:[#allocation19_spill] sm:$0xff] %v6492_v63 }
 0x66a   : > { %v6434_v4 = vpack.c.bf16 %v3546_v28, %v3544_v17  ;;  %v3547_v10 = vmax.f32 %v3398_v0, 0.0 }
 0x66b   : > { %v6436_v9 = vpop.f32.mrf.mxu0 }
 0x66c   : > { %v6438_v46 = vpack.c.bf16 %v3547_v10, %v3545_v33  ;;  %v6494_v17 = vpop.permute.xlu0 %3119  ;;  %v6499_v34 = vpop.permute.xlu1 %3124 }
 0x66d   : > { %v6440_v20 = vpop.f32.mrf.mxu0 }
 0x66f   : > { %v6442_v54 = vpop.f32.mrf.mxu0 }
 0x670   : > { %v3110_v63 = vpop.permute.xlu0 %3109 }
 0x671   : > { %v6446_v7 = vpop.f32.mrf.mxu0 }
 0x673   : > { %v6450_v51 = vpop.f32.mrf.mxu0 }
 0x675   : > { %v6452_v62 = vpop.f32.mrf.mxu0 }
 0x677   : > { %v6459_v53 = vpop.f32.mrf.mxu0 }
 0x679   : > { %v6466_v15 = vpop.f32.mrf.mxu0 }
 0x67b   : > { %v3423_v52 = vpop.f32.mrf.mxu0 }
 0x67d   : > { %v6478_v11 = vpop.f32.mrf.mxu0 }
 0x67f   : > { %v3427_v19 = vpop.f32.mrf.mxu0 }
 0x681   : > { %v3431_v22 = vpop.f32.mrf.mxu0 }
 0x683   : > { %v3433_v35 = vpop.f32.mrf.mxu0 }
 0x685   : > { %v3435_v49 = vpop.f32.mrf.mxu0 }
 0x687   : > { %v3437_v60 = vpop.f32.mrf.mxu0 }
 0x688   : > { %v3438_v55 = vadd.f32 %v3437_v60, %v6414_v6 }
 0x689   : > { %v3441_v29 = vpop.f32.mrf.mxu0 }
 0x68b   : > { %v3443_v57 = vpop.f32.mrf.mxu0 }
 0x68c   : > { %v3444_v16 = vadd.f32 %v3443_v57, %v6408_v5 }
 0x68d   : > { %v3445_v21 = vpop.f32.mrf.mxu0 }
 0x68e   : > { %v3446_v40 = vadd.f32 %v3445_v21, %v6410_v24  ;;  %v3436_v21 = vadd.f32 %v3435_v49, %v6414_v6 }
 0x68f   : > { %v3447_v43 = vpop.f32.mrf.mxu0 }
 0x690   : > { %v3448_v0 = vadd.f32 %v3447_v43, %v6410_v24  ;;  %v3428_v24 = vadd.f32 %v3427_v19, %v6418_v8 }
 0x691   : > { %v3451_v56 = vpop.f32.mrf.mxu0 }
 0x692   : > { %v3452_v1 = vadd.f32 %v3451_v56, %v6404_v25  ;;  %v3567_v43 = vmax.f32 %v3448_v0, 0.0  ;;  %v3565_v56 = vmax.f32 %v3444_v16, 0.0  ;;  %v3559_v49 = vmax.f32 %v3428_v24, 0.0 }
 0x693   : > { %v3453_v47 = vpop.f32.mrf.mxu0  ;;  %v3404_v24 = vadd.f32 %v6436_v9, %v6424_v61 }
 0x694   : > { %v3454_v33 = vadd.f32 %v3453_v47, %v6404_v25  ;;  %v3568_v39 = vmax.f32 %v3452_v1, 0.0  ;;  %v3434_v25 = vadd.f32 %v3433_v35, %v6412_v12  ;;  %v3424_v35 = vadd.f32 %v3423_v52, %v6416_v31 }
 0x695   : > { %v3455_v28 = vpop.f32.mrf.mxu0 }
 0x696   : > { %v3456_v10 = vadd.f32 %v3455_v28, %v6406_v48  ;;  %v3569_v42 = vmax.f32 %v3454_v33, 0.0  ;;  %v3442_v28 = vadd.f32 %v3441_v29, %v6408_v5  ;;  %v3563_v33 = vmax.f32 %v3438_v55, 0.0 }
 0x697   : > { %v3457_v14 = vpop.f32.mrf.mxu0  ;;  %v3418_v5 = vadd.f32 %v6459_v53, %v6422_v38  ;;  %v3561_v19 = vmax.f32 %v3434_v25, 0.0  ;;  %v3426_v55 = vadd.f32 %v6478_v11, %v6418_v8 }
 0x698   : > { %v3458_v37 = vadd.f32 %v3457_v14, %v6406_v48  ;;  %v3570_v45 = vmax.f32 %v3456_v10, 0.0  ;;  %v3115_v48 = vpop.permute.xlu1 %3114  ;;  %v3566_v10 = vmax.f32 %v3446_v40, 0.0  ;;  %v3617_v14 = vpack.c.bf16 %v3567_v43, %v3565_v56 }
 0x699   : > { %v3461_v2 = vpop.f32.mrf.mxu0  ;;  %v3564_v29 = vmax.f32 %v3442_v28, 0.0  ;;  %v3615_v53 = vpack.c.bf16 %v3563_v33, %v3561_v19  ;;  %v3557_v43 = vmax.f32 %v3424_v35, 0.0  ;;  %v3416_v28 = vadd.f32 %v6452_v62, %v6422_v38 }
 0x69a   : > { %v3571_v47 = vmax.f32 %v3458_v37, 0.0  ;;  %v3462_v30 = vadd.f32 %v3461_v2, %v3110_v63  ;;  %v3618_v60 = vpack.c.bf16 %v3570_v45, %v3568_v39  ;;  %v3432_v2 = vadd.f32 %v3431_v22, %v6412_v12 }
 0x69b   : > { %v3463_v13 = vpop.f32.mrf.mxu0  ;;  %v3562_v39 = vmax.f32 %v3436_v21, 0.0  ;;  %v3422_v22 = vadd.f32 %v6466_v15, %v6416_v31  ;;  %v3558_v25 = vmax.f32 %v3426_v55, 0.0  ;;  %v3555_v56 = vmax.f32 %v3418_v5, 0.0 }
 0x69c   : > { %v3619_v57 = vpack.c.bf16 %v3571_v47, %v3569_v42  ;;  %v3464_v37 = vadd.f32 %v3463_v13, %v3110_v63  ;;  %v3572_v6 = vmax.f32 %v3462_v30, 0.0  ;;  %v3616_v13 = vpack.c.bf16 %v3566_v10, %v3564_v29 }
 0x69d   : > { %v3465_v0 = vpop.f32.mrf.mxu0  ;;  %v3560_v16 = vmax.f32 %v3432_v2, 0.0  ;;  %v3408_v47 = vadd.f32 %v6442_v54, %v6426_v18  ;;  %v3412_v21 = vadd.f32 %v6446_v7, %v6420_v41  ;;  %v3556_v10 = vmax.f32 %v3422_v22, 0.0 }
 0x69e   : > { %v3466_v50 = vadd.f32 %v3465_v0, %v3115_v48  ;;  %3672 = vmatprep.subr.bf16.mxu1 %v3619_v57  ;;  %v3573_v1 = vmax.f32 %v3464_v37, 0.0  ;;  %v3613_v57 = vpack.c.bf16 %v3559_v49, %v3557_v43  ;;  %v3402_v2 = vadd.f32 %v6432_v26, %v6424_v61 }
 0x69f   : > { %v3467_v42 = vpop.f32.mrf.mxu0  ;;  %3673 = vmatpush1.bf16.msra.mxu1 %v3618_v60  ;;  %v3614_v31 = vpack.c.bf16 %v3562_v39, %v3560_v16  ;;  %v3551_v33 = vmax.f32 %v3408_v47, 0.0  ;;  %v3612_v37 = vpack.c.bf16 %v3558_v25, %v3556_v10  ;;  %v3552_v29 = vmax.f32 %v3412_v21, 0.0 }
 0x6a0   : > { %v3574_v40 = vmax.f32 %v3466_v50, 0.0  ;;  %v3468_v45 = vadd.f32 %v3467_v42, %v3115_v48  ;;  %3674 = vmatprep.subr.bf16.mxu1 %v3617_v14  ;;  %v3414_v50 = vadd.f32 %v6450_v51, %v6420_v41  ;;  %v3554_v14 = vmax.f32 %v3416_v28, 0.0 }
 0x6a1   : > { %v3471_v63 = vpop.f32.mrf.mxu0 }
 0x6a2   : > { %v6516_v52 = vpack.c.bf16 %v3574_v40, %v3572_v6  ;;  %v3575_v12 = vmax.f32 %v3468_v45, 0.0  ;;  %v3472_v11 = vadd.f32 %v3471_v63, %v6494_v17  ;;  %v3553_v60 = vmax.f32 %v3414_v50, 0.0 }
 0x6a3   : > { %v3473_v30 = vpop.f32.mrf.mxu0  ;;  %3675 = vmatpush1.bf16.msra.mxu1 %v3616_v13  ;;  %v3548_v45 = vmax.f32 %v3402_v2, 0.0 }
 0x6a4   : > { %v6522_v8 = vpack.c.bf16 %v3575_v12, %v3573_v1  ;;  %3676 = vmatprep.subr.bf16.mxu1 %v3615_v53  ;;  %v3474_v48 = vadd.f32 %v3473_v30, %v6494_v17  ;;  %v3576_v38 = vmax.f32 %v3472_v11, 0.0  ;;  %v3406_v17 = vadd.f32 %v6440_v20, %v6426_v18 }
 0x6a5   : > { %v3475_v15 = vpop.f32.mrf.mxu0  ;;  %v3611_v9 = vpack.c.bf16 %v3555_v56, %v3553_v60  ;;  %v3610_v20 = vpack.c.bf16 %v3554_v14, %v3552_v29  ;;  %v6854_v29 = vld [vmem:[#allocation15_spill] sm:$0xff] }
 0x6a6   : > { %v3476_v51 = vadd.f32 %v3475_v15, %v6499_v34  ;;  %v3577_v35 = vmax.f32 %v3474_v48, 0.0  ;;  %v3550_v18 = vmax.f32 %v3406_v17, 0.0 }
 0x6a7   : > { %v3477_v54 = vpop.f32.mrf.mxu0  ;;  %3677 = vmatpush1.bf16.msra.mxu1 %v3614_v31 }
 0x6a8   : > { %v3578_v62 = vmax.f32 %v3476_v51, 0.0  ;;  %v3478_v0 = vadd.f32 %v3477_v54, %v6499_v34  ;;  %3678 = vmatprep.subr.bf16.mxu1 %v3613_v57  ;;  %v3549_v34 = vmax.f32 %v3404_v24, 0.0  ;;  %v3608_v49 = vpack.c.bf16 %v3550_v18, %v3548_v45 }
 0x6a9   : > { %v6538_v5 = vpop.f32.mrf.mxu0 }
 0x6aa   : > { %v6540_v41 = vpack.c.bf16 %v3578_v62, %v3576_v38  ;;  %v3579_v7 = vmax.f32 %v3478_v0, 0.0  ;;  %v3609_v40 = vpack.c.bf16 %v3551_v33, %v3549_v34 }
 0x6ab   : > { %v6544_v42 = vpop.f32.mrf.mxu0  ;;  %3679 = vmatpush1.bf16.msra.mxu1 %v3612_v37 }
 0x6ac   : > { %v6546_v19 = vpack.c.bf16 %v3579_v7, %v3577_v35  ;;  %3680 = vmatprep.subr.bf16.mxu1 %v3611_v9 }
 0x6ad   : > { %v6548_v6 = vpop.f32.mrf.mxu0 }
 0x6af   : > { %v6550_v55 = vpop.f32.mrf.mxu0  ;;  %3681 = vmatpush1.bf16.msra.mxu1 %v3610_v20 }
 0x6b0   : > { %3682 = vmatprep.subr.bf16.mxu1 %v3609_v40 }
 0x6b1   : > { %v6552_v61 = vpop.f32.mrf.mxu0 }
 0x6b3   : > { %v6554_v26 = vpop.f32.mrf.mxu0  ;;  %3683 = vmatpush1.bf16.msra.mxu1 %v3608_v49 }
 0x6b4   : > { %3684 = vmatprep.subr.bf16.mxu1 %v6438_v46 }
 0x6b5   : > { %v6557_v39 = vpop.f32.mrf.mxu0 }
 0x6b7   : > { %v3497_v13 = vpop.f32.mrf.mxu0  ;;  %3685 = vmatpush1.bf16.msra.mxu1 %v6434_v4 }
 0x6b8   : > { %3686 = vmatprep.subr.bf16.mxu1 %v6430_v36 }
 0x6b9   : > { %v3501_v63 = vpop.f32.mrf.mxu0 }
 0x6bb   : > { %v3503_v53 = vpop.f32.mrf.mxu0  ;;  %3687 = vmatpush1.bf16.msra.mxu1 %v6428_v58 }
 0x6bd   : > { %v3505_v1 = vpop.f32.mrf.mxu0 }
 0x6bf   : > { %v3507_v12 = vpop.f32.mrf.mxu0 }
 0x6c1   : > { %v3511_v22 = vpop.f32.mrf.mxu0 }
 0x6c2   : > { %v3512_v7 = vadd.f32 %v3511_v22, %v6476_v44 }
 0x6c3   : > { %v3513_v16 = vpop.f32.mrf.mxu0 }
 0x6c4   : > { %v3514_v0 = vadd.f32 %v3513_v16, %v6476_v44 }
 0x6c5   : > { %v3515_v30 = vpop.f32.mrf.mxu0 }
 0x6c6   : > { %v3516_v33 = vadd.f32 %v3515_v30, %v6480_v32  ;;  %v3593_v34 = vmax.f32 %v3514_v0, 0.0  ;;  %v3592_v30 = vmax.f32 %v3512_v7, 0.0 }
 0x6c7   : > { %v3517_v50 = vpop.f32.mrf.mxu0 }
 0x6c8   : > { %v3518_v21 = vadd.f32 %v3517_v50, %v6480_v32  ;;  %v3594_v20 = vmax.f32 %v3516_v33, 0.0  ;;  %v6855_v32 = vld [vmem:[#allocation27_spill] sm:$0xff]  ;;  %v6856_v50 = vld [vmem:[#allocation17_spill] sm:$0xff] }
 0x6c9   : > { %v3521_v43 = vpop.f32.mrf.mxu0  ;;  %v3498_v45 = vadd.f32 %v3497_v13, %v6855_v32  ;;  %v3494_v44 = vadd.f32 %v6554_v26, %v6856_v50 }
 0x6ca   : > { %v3522_v38 = vadd.f32 %v3521_v43, %v6457_v59 }
 0x6cb   : > { %v3523_v11 = vpop.f32.mrf.mxu0  ;;  %v3587_v13 = vmax.f32 %v3498_v45, 0.0 }
 0x6cc   : > { %v3524_v57 = vadd.f32 %v3523_v11, %v6457_v59  ;;  %v3596_v2 = vmax.f32 %v3522_v38, 0.0  ;;  %v3504_v59 = vadd.f32 %v3503_v53, %v6854_v29  ;;  %v3496_v53 = vadd.f32 %v6557_v39, %v6855_v32  ;;  %v6857_v11 = vld [vmem:[#allocation19_spill] sm:$0xff] }
 0x6cd   : > { %v3525_v46 = vpop.f32.mrf.mxu0  ;;  %v3486_v39 = vadd.f32 %v6548_v6, %v6857_v11  ;;  %v6859_v6 = vld [vmem:[#allocation21_spill] sm:$0xff] }
 0x6ce   : > { %v3526_v51 = vadd.f32 %v3525_v46, %v6464_v3  ;;  %v3597_v17 = vmax.f32 %v3524_v57, 0.0  ;;  %v3589_v22 = vmax.f32 %v3504_v59, 0.0  ;;  %v3488_v46 = vadd.f32 %v6550_v55, %v6857_v11 }
 0x6cf   : > { %v3527_v47 = vpop.f32.mrf.mxu0  ;;  %v3582_v57 = vmax.f32 %v3486_v39, 0.0 }
 0x6d0   : > { %v3528_v4 = vadd.f32 %v3527_v47, %v6464_v3  ;;  %v3598_v14 = vmax.f32 %v3526_v51, 0.0  ;;  %v3595_v3 = vmax.f32 %v3518_v21, 0.0 }
 0x6d1   : > { %v3531_v28 = vpop.f32.mrf.mxu0 }
 0x6d2   : > { %v3532_v58 = vadd.f32 %v3531_v28, %v6444_v27  ;;  %v3599_v10 = vmax.f32 %v3528_v4, 0.0  ;;  %v3632_v40 = vpack.c.bf16 %v3598_v14, %v3596_v2  ;;  %v3631_v16 = vpack.c.bf16 %v3595_v3, %v3593_v34 }
 0x6d3   : > { %v3533_v25 = vpop.f32.mrf.mxu0  ;;  %v3586_v4 = vmax.f32 %v3496_v53, 0.0 }
 0x6d4   : > { %v3534_v36 = vadd.f32 %v3533_v25, %v6444_v27  ;;  %v3600_v62 = vmax.f32 %v3532_v58, 0.0  ;;  %v3633_v35 = vpack.c.bf16 %v3599_v10, %v3597_v17  ;;  %v6858_v25 = vld [vmem:[#allocation22_spill] sm:$0xff]  ;;  %v6861_v10 = vld [vmem:[#allocation13_spill] sm:$0xff] }
 0x6d5   : > { %v3535_v31 = vpop.f32.mrf.mxu0  ;;  %v3484_v26 = vadd.f32 %v6544_v42, %v6858_v25  ;;  %v3482_v55 = vadd.f32 %v6538_v5, %v6858_v25  ;;  %v6860_v5 = vld [vmem:[#allocation14_spill] sm:$0xff] }
 0x6d6   : > { %v3536_v15 = vadd.f32 %v3535_v31, %v6448_v23  ;;  %v3601_v54 = vmax.f32 %v3534_v36, 0.0  ;;  %v3585_v31 = vmax.f32 %v3494_v44, 0.0  ;;  %v3662_v21 = vrot.slane %v6860_v5, %v6859_v6 }
 0x6d7   : > { %v3537_v56 = vpop.f32.mrf.mxu0  ;;  %v3580_v42 = vmax.f32 %v3482_v55, 0.0 }
 0x6d8   : > { %v3538_v48 = vadd.f32 %v3537_v56, %v6448_v23  ;;  %v3602_v24 = vmax.f32 %v3536_v15, 0.0  ;;  %v6853_v23 = vld [vmem:[#allocation16_spill] sm:$0xff]  ;;  %v3583_v15 = vmax.f32 %v3488_v46, 0.0  ;;  %v3627_v58 = vpack.c.bf16 %v3587_v13, %v3585_v31 }
 0x6d9   : > { %v3508_v9 = vadd.f32 %v3507_v12, %v6853_v23  ;;  %v3506_v18 = vadd.f32 %v3505_v1, %v6853_v23  ;;  %v3502_v12 = vadd.f32 %v3501_v63, %v6854_v29  ;;  %v3630_v1 = vpack.c.bf16 %v3594_v20, %v3592_v30 }
 0x6da   : > { %v3603_v60 = vmax.f32 %v3538_v48, 0.0  ;;  %v3634_v37 = vpack.c.bf16 %v3602_v24, %v3600_v62  ;;  %v3492_v63 = vadd.f32 %v6552_v61, %v6856_v50  ;;  %v3581_v61 = vmax.f32 %v3484_v26, 0.0 }
 0x6db   : > { %v3591_v49 = vmax.f32 %v3508_v9, 0.0  ;;  %v3590_v43 = vmax.f32 %v3506_v18, 0.0  ;;  %v3588_v28 = vmax.f32 %v3502_v12, 0.0  ;;  %v3624_v24 = vpack.c.bf16 %v3582_v57, %v3580_v42 }
 0x6dc   : > { %v3635_v27 = vpack.c.bf16 %v3603_v60, %v3601_v54  ;;  %v3584_v56 = vmax.f32 %v3492_v63, 0.0  ;;  %v3625_v51 = vpack.c.bf16 %v3583_v15, %v3581_v61  ;;  %v3645_v54 = vsub.s32 0, %v6861_v10  ;;  %v3641_v60 = vpop.permute.xlu0 %3640 }
 0x6dd   : > { %v3629_v47 = vpack.c.bf16 %v3591_v49, %v3589_v22  ;;  %v3628_v36 = vpack.c.bf16 %v3590_v43, %v3588_v28 }
 0x6de   : > { %3688 = vmatprep.subr.bf16.mxu1 %v3635_v27  ;;  %v3626_v48 = vpack.c.bf16 %v3586_v4, %v3584_v56  ;;  %v3646_v38 = vrot.slane %v3641_v60, %v3645_v54 }
 0x6df   : > { %3689 = vmatpush2.bf16.msra.mxu1 %v3634_v37 }
 0x6e0   : > { %3690 = vmatprep.subr.bf16.mxu1 %v3633_v35 }
 0x6e3   : > { %3691 = vmatpush2.bf16.msra.mxu1 %v3632_v40  ;;  %v6862_v40 = vlaneseq }
 0x6e4   : > { %3692 = vmatprep.subr.bf16.mxu1 %v3631_v16 }
 0x6e5   : > { %vm3749_vm4 = vcmp.lt.s32.totalorder %v6862_v40, 256 }
 0x6e7   : > { %3693 = vmatpush2.bf16.msra.mxu1 %v3630_v1 }
 0x6e8   : > { %3694 = vmatprep.subr.bf16.mxu1 %v3629_v47 }
 0x6eb   : > { %3695 = vmatpush2.bf16.msra.mxu1 %v3628_v36 }
 0x6ec   : > { %3696 = vmatprep.subr.bf16.mxu1 %v3627_v58 }
 0x6ef   : > { %3697 = vmatpush2.bf16.msra.mxu1 %v3626_v48 }
 0x6f0   : > { %3698 = vmatprep.subr.bf16.mxu1 %v3625_v51 }
 0x6f3   : > { %3699 = vmatpush2.bf16.msra.mxu1 %v3624_v24 }
 0x6f4   : > { %3700 = vmatprep.subr.bf16.mxu1 %v6546_v19 }
 0x6f7   : > { %3701 = vmatpush2.bf16.msra.mxu1 %v6540_v41 }
 0x6f8   : > { %3702 = vmatprep.subr.bf16.mxu1 %v6522_v8 }
 0x6fb   : > { %3703 = vmatpush2.bf16.msra.mxu1 %v6516_v52 }
 0x6fe   : > { %3705 = vmatmul.mubr.bf16.vlgmr.msra.gmra.mxu1 %v3662_v21 }
 0x7be   : > { %v3706_v62 = vpop.f32.mrf.mxu1 }
 0x7bf   : > { %v3707_v0 = vadd.f32 %v3706_v62, %v3646_v38 }
 0x7c0   : > { %v3708_v17 = vpop.f32.mrf.mxu1 }
 0x7c1   : > { %v3715_v27 = vmin.f32 %v3707_v0, 0.0  ;;  %v3709_v19 = vadd.f32 %v3708_v17, %v3646_v38  ;;  %vm3713_vm2 = vcmp.gt.f32.partialorder %v3707_v0, 0.0 }
 0x7c2   : > { %v3710_v33 = vpop.f32.mrf.mxu1 }
 0x7c3   : > { %v3717_v41 = vmul.f32 1.442695, %v3715_v27  ;;  %v3716_v14 = vmin.f32 %v3709_v19, 0.0  ;;  %vm3714_vm3 = vcmp.gt.f32.partialorder %v3709_v19, 0.0 }
 0x7c4   : > { %v3711_v8 = vpop.f32.mrf.mxu1 }
 0x7c5   : > { %4452 = vpow2.f32 %v3717_v41  ;;  %v3719_v37 = vmul.f32 1.442695, %v3716_v14 }
 0x7c7   : > { %4454 = vpow2.f32 %v3719_v37 }
 0x7d2   : > { %v4453_v52 = vpop.eup %4452 }
 0x7d3   : > { %v4189_v23 = vadd.f32 -1.0, %v4453_v52 }
 0x7d4   : > { %v4455_v9 = vpop.eup %4454 }
 0x7d5   : > { %v3723_v3 = vmul.f32 1.6732632, %v4189_v23  ;;  %v4190_v35 = vadd.f32 -1.0, %v4455_v9 }
 0x7d7   : > { %v3725_v7 = vsel %vm3713_vm2, %v3707_v0, %v3723_v3  ;;  %v3724_v2 = vmul.f32 1.6732632, %v4190_v35 }
 0x7d8   : > { %v3727_v59 = vmul.f32 1.050701, %v3725_v7 }
 0x7d9   : > { %v3726_v29 = vsel %vm3714_vm3, %v3709_v19, %v3724_v2 }
 0x7da   : > { %v3728_v34 = vmul.f32 1.050701, %v3726_v29 }
 0x7dc   : > { %v3731_v18 = vcombine.low %v3727_v59, %v3728_v34 }
 0x7de   : > { %v3738_v20 = vrot.slane %v3731_v18, %v6859_v6 }
 0x7e0   : > { %v3745_v32 = vrot.slane %v3738_v20, %v6859_v6 }
 0x7e2   : > { %3751 = vst.msk [vmem:[%s274_s17] sm:$0x3] %vm3749_vm4, %v3745_v32 }
 0x7e3   : > { %4469 = shalt.err (!%p4466_p3)
}
 0x7e4   : > { %s4470_s30 = scalar_lea.hbm %s3765_s21, 32  ;;  %s4474_s14 = scalar_lea.hbm %s6644_s7, 128 }
 0x7e5   : > { %p4471_p4 = scmp.ne.s32.totalorder %s3765_s21, %s4470_s30  ;;  %p4475_p9 = scmp.lt.s32.totalorder %s3765_s21, %s6644_s7 }
 0x7e6   : > { %p4476_p10 = scmp.lt.s32.totalorder %s4474_s14, %s4470_s30 }
 0x7e7   : > { %p4472_p7 = pnand %p4471_p4, %p4602_p5 }
 0x7e8   : > { %p4477_p11 = por %p4476_p10, %p4475_p9 }
 0x7e9   : > { %p4473_p8 = pneg %p4472_p7 }
 0x7eb   : > { %p4478_p12 = pnand %p4477_p11, %p4473_p8 }
 0x7ed   : > { %4481 = shalt.err (!%p4478_p12)
}
 0x7ee   : > { %4199 = dma.vmem_to_hbm [thread:$0]  (%p4602_p5), %s3768_s18, 32, %s3765_s21, %s3753_s22  }
 0x7ef PF: > { %p4205_p13 = scmp.ge.s32.totalorder %s4516_s29, 2  ;;  %s3779_s17 = sand.u32 1, %s4504_s26  }
 0x7f0   : > { %s3780_s19 = scalar_lea.sflag [#allocation4], %s3779_s17 }
 0x7f1   : > { %p4202_p0 = pnand %p4205_p13, %p4606_p6 }
 0x7f3   : > { %p4203_p1 = pneg %p4202_p0 }
 0x7f5   : > { %4499 = dma.done.wait (%p4203_p1), %s3780_s19, 32  }
 0x7f6   : > { %4501 = vsyncadd (%p4203_p1), %s3780_s19, 4294967264  ;;  %p19_p2 = scmp.ge.s32.totalorder %s4589_s8, 6   ;;  %s6863_s26 = smov %s4508_s27 }
 0x7f7   : > { %s6864_s27 = smov %s4512_s28  ;;  %s6865_s28 = smov %s4600_s11 }
 0x7f8   : > { %s6866_s29 = smov %s4589_s8  ;;  %21 = sbr.rel (!%p19_p2) target bundleno = 6 (0x6), region = 89 }
 0x7fd   :  { %3785 = vsyncpa [#allocation4], 1 }
 0x7fe   :  { %3787 = vsyncpa [#allocation4 + $0x1], 1 }

</bundles_post_ra>
